<compile_context>
chip_gen: v6e
topology: v6e:2x2x1
jax: 0.10.0
libtpu: 0.0.40
codegen_flags: <defaults>
</compile_context>

<pallas_src>
import functools

import jax
import jax.numpy as jnp
from jax import lax
from jax.experimental import pallas as pl
from jax.experimental.pallas import tpu as pltpu


# Channel paddings (multiples of 8 so all sublane slices / stores stay aligned).
CIN1_P, COUT1_P = 8, 24     # conv1: 3 -> 8 in, 20 -> 24 out (zero-padded channels)
CIN2_P, COUT2_P = 24, 56    # conv2: 24 (20 real) in, 50 -> 56 out
FC1_TK = 8192               # fc1 contraction tile


def _round_up(x, m):
    return (x + m - 1) // m * m


# ----------------------------------------------------------------------------
# Fused Conv2d(5x5, valid) + ReLU + MaxPool(2x2, stride 2).
# One grid step per image; an in-kernel loop walks the pooled output rows.
#
# Input layout per image: (H * cin_p, W) with row index h*cin_p + ci, so the
# patch for conv row h (all kh taps, all channels) is ONE aligned sublane slice
# x[h*cin_p : (h+5)*cin_p, :] -> a single matmul with K = 5*cin_p per kw tap.
# ----------------------------------------------------------------------------
def _conv_relu_pool_kernel(x_ref, w_ref, b_ref, o_ref, *, cin_p, cout_p, c_out,
                           ksize, h_pool, w_out, w_pool, packed_out):
    # 0/1 selection matrices for the horizontal stride-2 max-pool:
    # (row @ sel_even)[:, w] == row[:, 2w], (row @ sel_odd)[:, w] == row[:, 2w+1].
    r_idx = lax.broadcasted_iota(jnp.int32, (w_out, w_pool), 0)
    c_idx = lax.broadcasted_iota(jnp.int32, (w_out, w_pool), 1)
    sel_even = (r_idx == 2 * c_idx).astype(jnp.float32)
    sel_odd = (r_idx == 2 * c_idx + 1).astype(jnp.float32)

    bias = b_ref[...]                                    # (cout_p, 1)
    w_taps = [w_ref[kw] for kw in range(ksize)]          # each (cout_p, ksize*cin_p), bf16

    @pl.loop(0, h_pool)
    def _(p):
        # Input rows needed for conv rows 2p and 2p+1 (aligned dynamic slice).
        start = pl.multiple_of(2 * cin_p * p, 2 * cin_p)
        blk = x_ref[pl.ds(start, (ksize + 1) * cin_p), :]    # ((ksize+1)*cin_p, W)

        def conv_row(j):                                  # conv output row 2p + j
            patch = blk[j * cin_p:(j + ksize) * cin_p, :].astype(jnp.bfloat16)
            acc = jnp.zeros((cout_p, w_out), jnp.float32)
            for kw in range(ksize):
                a = jnp.dot(w_taps[kw], patch,
                            preferred_element_type=jnp.float32)   # (cout_p, W)
                acc = acc + a[:, kw:kw + w_out]           # shift the kw tap onto out cols
            return acc

        row = jnp.maximum(conv_row(0), conv_row(1))       # vertical half of the 2x2 pool
        row = jnp.maximum(row + bias, 0.0)                # bias + ReLU
        hp = jnp.maximum(                                 # horizontal half of the pool
            jnp.dot(row, sel_even, preferred_element_type=jnp.float32),
            jnp.dot(row, sel_odd, preferred_element_type=jnp.float32))
        if packed_out:
            # (h_pool * cout_p, w_pool): directly consumable by the next conv layer.
            o_ref[pl.ds(pl.multiple_of(p * cout_p, cout_p), cout_p), :] = hp
        else:
            # (h_pool, c_out, w_pool): flattens to (h, c, w) order for fc1.
            o_ref[p] = hp[:c_out, :]


def conv_relu_pool(x, w_folded, bias, *, c_in_p, c_out, packed_out):
    n, hc, w_img = x.shape
    ksize, c_out_p, kc = w_folded.shape
    assert kc == ksize * c_in_p and hc % c_in_p == 0
    h_img = hc // c_in_p
    h_out, w_out = h_img - ksize + 1, w_img - ksize + 1
    assert h_out % 2 == 0 and w_out % 2 == 0, "pool assumes even conv output size"
    h_pool, w_pool = h_out // 2, w_out // 2

    kernel = functools.partial(
        _conv_relu_pool_kernel, cin_p=c_in_p, cout_p=c_out_p, c_out=c_out,
        ksize=ksize, h_pool=h_pool, w_out=w_out, w_pool=w_pool,
        packed_out=packed_out)

    if packed_out:
        out_shape = jax.ShapeDtypeStruct((n, h_pool * c_out_p, w_pool), jnp.float32)
        out_spec = pl.BlockSpec((None, h_pool * c_out_p, w_pool), lambda b: (b, 0, 0))
    else:
        out_shape = jax.ShapeDtypeStruct((n, h_pool, c_out, w_pool), jnp.float32)
        out_spec = pl.BlockSpec((None, h_pool, c_out, w_pool), lambda b: (b, 0, 0, 0))

    return pl.pallas_call(
        kernel,
        out_shape=out_shape,
        grid_spec=pltpu.PrefetchScalarGridSpec(
            num_scalar_prefetch=0,
            grid=(n,),
            in_specs=[
                pl.BlockSpec((None, hc, w_img), lambda b: (b, 0, 0)),
                pl.BlockSpec((ksize, c_out_p, kc), lambda b: (0, 0, 0)),
                pl.BlockSpec((c_out_p, 1), lambda b: (0, 0)),
            ],
            out_specs=out_spec,
        ),
        compiler_params=pltpu.CompilerParams(dimension_semantics=("parallel",)),
    )(x, w_folded, bias)


# ----------------------------------------------------------------------------
# fc1 (K-tiled, bf16 weight stream, f32 accumulate) + ReLU, with fc2 + log-softmax
# fused into the final grid step.
# ----------------------------------------------------------------------------
def _mlp_head_kernel(x_ref, w1_ref, b1_ref, w2_ref, b2_ref, o_ref, acc_ref):
    k = pl.program_id(0)

    @pl.when(k == 0)
    def _():
        acc_ref[...] = jnp.zeros_like(acc_ref)

    acc_ref[...] += jnp.dot(x_ref[...], w1_ref[...],
                            preferred_element_type=jnp.float32)

    @pl.when(k == pl.num_programs(0) - 1)
    def _():
        h = jnp.maximum(acc_ref[...] + b1_ref[...], 0.0)          # fc1 bias + ReLU
        logits = jnp.dot(h, w2_ref[...],
                         preferred_element_type=jnp.float32) + b2_ref[...]
        m = jnp.max(logits, axis=-1, keepdims=True)
        s = logits - m
        lse = jnp.log(jnp.sum(jnp.exp(s), axis=-1, keepdims=True))
        o_ref[...] = s - lse                                       # log-softmax


def mlp_head(x, w1, b1, w2, b2, *, tk=FC1_TK):
    n, k_pad = x.shape
    assert k_pad % tk == 0 and w1.shape[0] == k_pad
    d_hidden = w1.shape[1]
    d_out = w2.shape[1]
    k_tiles = k_pad // tk
    return pl.pallas_call(
        _mlp_head_kernel,
        out_shape=jax.ShapeDtypeStruct((n, d_out), jnp.float32),
        grid_spec=pltpu.PrefetchScalarGridSpec(
            num_scalar_prefetch=0,
            grid=(k_tiles,),
            in_specs=[
                pl.BlockSpec((n, tk), lambda k: (0, k)),
                pl.BlockSpec((tk, d_hidden), lambda k: (k, 0)),
                pl.BlockSpec((1, d_hidden), lambda k: (0, 0)),
                pl.BlockSpec((d_hidden, d_out), lambda k: (0, 0)),
                pl.BlockSpec((1, d_out), lambda k: (0, 0)),
            ],
            out_specs=pl.BlockSpec((n, d_out), lambda k: (0, 0)),
            scratch_shapes=[pltpu.VMEM((n, d_hidden), jnp.float32)],
        ),
        compiler_params=pltpu.CompilerParams(dimension_semantics=("arbitrary",)),
    )(x, w1, b1, w2, b2)


# ----------------------------------------------------------------------------
# Full forward pass matching the PyTorch CNN module (eval mode).
# ----------------------------------------------------------------------------
def cnn_forward(x_nchw, params):
    n, c_in, h, w = x_nchw.shape
    # NCHW -> per-image (H * Cpad, W) layout (channels on sublanes, W on lanes).
    x = jnp.transpose(x_nchw, (0, 2, 1, 3))                        # (N, H, C, W)
    x = jnp.pad(x, ((0, 0), (0, 0), (0, CIN1_P - c_in), (0, 0)))
    x = x.reshape(n, h * CIN1_P, w)

    x = conv_relu_pool(x, params["conv1_wf"], params["conv1_bf"],
                       c_in_p=CIN1_P, c_out=20, packed_out=True)   # (N, 110*24, 110)
    # TODO(synk): dropout(0.7) -> eval-mode identity
    x = conv_relu_pool(x, params["conv2_wf"], params["conv2_bf"],
                       c_in_p=CIN2_P, c_out=50, packed_out=False)  # (N, 53, 50, 53)

    # Flatten in (h, c, w) order (fc1 weight rows were pre-permuted to match),
    # zero-pad K to the tile multiple and cast to bf16 (weights are bf16 too).
    x = x.reshape(n, -1)
    k_pad = params["fc1_w"].shape[0]
    x = jnp.pad(x, ((0, 0), (0, k_pad - x.shape[1]))).astype(jnp.bfloat16)
    # TODO(synk): dropout(0.7) -> eval-mode identity
    return mlp_head(x, params["fc1_w"], params["fc1_b"],
                    params["fc2_w"], params["fc2_b"])              # (N, 10) log-probs


# ----------------------------------------------------------------------------
# Parameter preparation (one-time, outside the jitted forward).
# ----------------------------------------------------------------------------
def _fold_conv_weight(w_oihw, c_in_p, c_out_p):
    # (c_out, c_in, kh, kw) -> (kw, c_out_p, kh*c_in_p) with zero-padded channels.
    c_out, c_in, kh, kw = w_oihw.shape
    wt = jnp.transpose(w_oihw, (3, 0, 2, 1))                       # (kw, co, kh, ci)
    wt = jnp.pad(wt, ((0, 0), (0, c_out_p - c_out), (0, 0), (0, c_in_p - c_in)))
    return wt.reshape(kw, c_out_p, kh * c_in_p).astype(jnp.bfloat16)


def prepare_params(raw, *, img=224, tk=FC1_TK):
    h1 = (img - 4) // 2                # 110 after conv1 + pool
    h2 = (h1 - 4) // 2                 # 53 after conv2 + pool
    c2 = raw["conv2_w"].shape[0]       # 50
    k_in = c2 * h2 * h2                # 140450
    k_pad = _round_up(k_in, tk)

    # fc1: torch (out, c*h*w) -> rows reordered to our (h, c, w) flatten order,
    # transposed to (K, out), zero-padded on K, cast to bf16.  Done ONCE here.
    fw = raw["fc1_w"].reshape(128, c2, h2, h2)                     # (out, c, h, w)
    fw = jnp.transpose(fw, (2, 1, 3, 0)).reshape(k_in, 128)        # (h, c, w) x out
    fw = jnp.pad(fw, ((0, k_pad - k_in), (0, 0))).astype(jnp.bfloat16)

    return {
        "conv1_wf": _fold_conv_weight(raw["conv1_w"], CIN1_P, COUT1_P),
        "conv1_bf": jnp.pad(raw["conv1_b"], (0, COUT1_P - 20)).reshape(COUT1_P, 1),
        "conv2_wf": _fold_conv_weight(raw["conv2_w"], CIN2_P, COUT2_P),
        "conv2_bf": jnp.pad(raw["conv2_b"], (0, COUT2_P - 50)).reshape(COUT2_P, 1),
        "fc1_w": fw,
        "fc1_b": raw["fc1_b"].reshape(1, 128).astype(jnp.float32),
        "fc2_w": jnp.transpose(raw["fc2_w"]).astype(jnp.float32),   # (128, 10)
        "fc2_b": raw["fc2_b"].reshape(1, 10).astype(jnp.float32),
    }


def init_raw_params(key):
    ks = jax.random.split(key, 8)
    flat = 50 * 53 * 53
    return {
        "conv1_w": 0.10 * jax.random.normal(ks[0], (20, 3, 5, 5), jnp.float32),
        "conv1_b": 0.10 * jax.random.normal(ks[1], (20,), jnp.float32),
        "conv2_w": 0.05 * jax.random.normal(ks[2], (50, 20, 5, 5), jnp.float32),
        "conv2_b": 0.05 * jax.random.normal(ks[3], (50,), jnp.float32),
        "fc1_w": 0.01 * jax.random.normal(ks[4], (128, flat), jnp.float32),
        "fc1_b": 0.01 * jax.random.normal(ks[5], (128,), jnp.float32),
        "fc2_w": 0.10 * jax.random.normal(ks[6], (10, 128), jnp.float32),
        "fc2_b": 0.10 * jax.random.normal(ks[7], (10,), jnp.float32),
    }


if __name__ == "__main__":
    key = jax.random.PRNGKey(0)
    k_x, k_p = jax.random.split(key)
    # Spatial size 224 is implied by fc1's 50*53*53 input features.
    x = jax.random.normal(k_x, (2, 3, 224, 224), jnp.float32)
    raw = init_raw_params(k_p)
    params = prepare_params(raw)          # one-time layout / dtype conversion

    out = jax.jit(cnn_forward)(x, params)
    out = jax.block_until_ready(out)

    assert out.shape == (2, 10), out.shape
    assert bool(jnp.all(jnp.isfinite(out)))
    # log-softmax rows should exponentiate-sum to ~1
    assert bool(jnp.allclose(jnp.sum(jnp.exp(out), axis=1), 1.0, atol=1e-3))
    print("KERNEL_OK")
</pallas_src>

<mosaic_0001>
module attributes {stable_mosaic.version = 11 : i64} {
  func.func @_conv_relu_pool_kernel(%arg0: i32, %arg1: memref<1x1792x224xf32, #tpu.memory_space<vmem>>, %arg2: memref<5x24x40xbf16, #tpu.memory_space<vmem>>, %arg3: memref<24x1xf32, #tpu.memory_space<vmem>>, %arg4: memref<1x2640x110xf32, #tpu.memory_space<vmem>>) attributes {dimension_semantics = [#tpu.dimension_semantics<parallel>], iteration_bounds = array<i64: 2>, scalar_prefetch = 0 : i64, scratch_operands = 0 : i64, tpu.core_type = #tpu.core_type<tc>, window_params = [{transform_indices = @transform_0, window_bounds = array<i64: 1, 1792, 224>}, {pipeline_mode = #tpu.pipeline_mode<synchronous>, transform_indices = @transform_1, window_bounds = array<i64: 5, 24, 40>}, {pipeline_mode = #tpu.pipeline_mode<synchronous>, transform_indices = @transform_2, window_bounds = array<i64: 24, 1>}, {transform_indices = @transform_3, window_bounds = array<i64: 1, 2640, 110>}]} {
    %0 = tpu.iota {dimensions = array<i32: 0>} : vector<220x110xi32>
    %1 = tpu.iota {dimensions = array<i32: 1>} : vector<220x110xi32>
    %c2_i32 = arith.constant 2 : i32
    %2 = vector.broadcast %c2_i32 : i32 to vector<220x110xi32>
    %3 = arith.muli %2, %1 : vector<220x110xi32>
    %4 = arith.cmpi eq, %0, %3 : vector<220x110xi32>
    %5 = arith.extui %4 : vector<220x110xi1> to vector<220x110xi32>
    %6 = arith.sitofp %5 : vector<220x110xi32> to vector<220x110xf32>
    %c2_i32_0 = arith.constant 2 : i32
    %7 = vector.broadcast %c2_i32_0 : i32 to vector<220x110xi32>
    %8 = arith.muli %7, %1 : vector<220x110xi32>
    %c1_i32 = arith.constant 1 : i32
    %9 = vector.broadcast %c1_i32 : i32 to vector<220x110xi32>
    %10 = arith.addi %8, %9 : vector<220x110xi32>
    %11 = arith.cmpi eq, %0, %10 : vector<220x110xi32>
    %12 = arith.extui %11 : vector<220x110xi1> to vector<220x110xi32>
    %13 = arith.sitofp %12 : vector<220x110xi32> to vector<220x110xf32>
    %c0 = arith.constant 0 : index
    %c0_1 = arith.constant 0 : index
    %14 = vector.load %arg3[%c0, %c0_1] : memref<24x1xf32, #tpu.memory_space<vmem>>, vector<24x1xf32>
    %c0_2 = arith.constant 0 : index
    %c0_3 = arith.constant 0 : index
    %c0_4 = arith.constant 0 : index
    %15 = vector.load %arg2[%c0_2, %c0_3, %c0_4] : memref<5x24x40xbf16, #tpu.memory_space<vmem>>, vector<1x24x40xbf16>
    %16 = vector.shape_cast %15 : vector<1x24x40xbf16> to vector<24x40xbf16>
    %c1 = arith.constant 1 : index
    %c0_5 = arith.constant 0 : index
    %c0_6 = arith.constant 0 : index
    %17 = vector.load %arg2[%c1, %c0_5, %c0_6] : memref<5x24x40xbf16, #tpu.memory_space<vmem>>, vector<1x24x40xbf16>
    %18 = vector.shape_cast %17 : vector<1x24x40xbf16> to vector<24x40xbf16>
    %c2 = arith.constant 2 : index
    %c0_7 = arith.constant 0 : index
    %c0_8 = arith.constant 0 : index
    %19 = vector.load %arg2[%c2, %c0_7, %c0_8] : memref<5x24x40xbf16, #tpu.memory_space<vmem>>, vector<1x24x40xbf16>
    %20 = vector.shape_cast %19 : vector<1x24x40xbf16> to vector<24x40xbf16>
    %c3 = arith.constant 3 : index
    %c0_9 = arith.constant 0 : index
    %c0_10 = arith.constant 0 : index
    %21 = vector.load %arg2[%c3, %c0_9, %c0_10] : memref<5x24x40xbf16, #tpu.memory_space<vmem>>, vector<1x24x40xbf16>
    %22 = vector.shape_cast %21 : vector<1x24x40xbf16> to vector<24x40xbf16>
    %c4 = arith.constant 4 : index
    %c0_11 = arith.constant 0 : index
    %c0_12 = arith.constant 0 : index
    %23 = vector.load %arg2[%c4, %c0_11, %c0_12] : memref<5x24x40xbf16, #tpu.memory_space<vmem>>, vector<1x24x40xbf16>
    %24 = vector.shape_cast %23 : vector<1x24x40xbf16> to vector<24x40xbf16>
    %c0_i32 = arith.constant 0 : i32
    %c110_i32 = arith.constant 110 : i32
    %25 = arith.addi %c0_i32, %c110_i32 : i32
    %c1_i32_13 = arith.constant 1 : i32
    scf.for %arg5 = %c0_i32 to %25 step %c1_i32_13  : i32 {
      %c1_i32_15 = arith.constant 1 : i32
      %26 = arith.muli %arg5, %c1_i32_15 : i32
      %c0_i32_16 = arith.constant 0 : i32
      %27 = arith.addi %c0_i32_16, %26 : i32
      %c16_i32 = arith.constant 16 : i32
      %28 = arith.muli %c16_i32, %27 : i32
      %29 = tpu.assume_multiple %28, 16 : i32
      %c0_17 = arith.constant 0 : index
      %30 = arith.index_cast %29 : i32 to index
      %c0_18 = arith.constant 0 : index
      %31 = vector.load %arg1[%c0_17, %30, %c0_18] : memref<1x1792x224xf32, #tpu.memory_space<vmem>>, vector<1x48x224xf32>
      %32 = vector.shape_cast %31 : vector<1x48x224xf32> to vector<48x224xf32>
      %33 = vector.extract_strided_slice %32 {offsets = [0, 0], sizes = [40, 224], strides = [1, 1]} : vector<48x224xf32> to vector<40x224xf32>
      %34 = arith.truncf %33 : vector<40x224xf32> to vector<40x224xbf16>
      %cst = arith.constant 0.000000e+00 : f32
      %35 = vector.broadcast %cst : f32 to vector<24x220xf32>
      %cst_19 = arith.constant dense<0.000000e+00> : vector<24x224xf32>
      %36 = tpu.matmul %16, %34, %cst_19 {dimension_numbers = #tpu.dot_dimension_numbers<[1], [0], [0], [1], [0, 0, 1, 1], [], []>} : vector<24x40xbf16>, vector<40x224xbf16>, vector<24x224xf32> -> vector<24x224xf32>
      %37 = vector.extract_strided_slice %36 {offsets = [0, 0], sizes = [24, 220], strides = [1, 1]} : vector<24x224xf32> to vector<24x220xf32>
      %38 = arith.addf %35, %37 : vector<24x220xf32>
      %cst_20 = arith.constant dense<0.000000e+00> : vector<24x224xf32>
      %39 = tpu.matmul %18, %34, %cst_20 {dimension_numbers = #tpu.dot_dimension_numbers<[1], [0], [0], [1], [0, 0, 1, 1], [], []>} : vector<24x40xbf16>, vector<40x224xbf16>, vector<24x224xf32> -> vector<24x224xf32>
      %40 = vector.extract_strided_slice %39 {offsets = [0, 1], sizes = [24, 220], strides = [1, 1]} : vector<24x224xf32> to vector<24x220xf32>
      %41 = arith.addf %38, %40 : vector<24x220xf32>
      %cst_21 = arith.constant dense<0.000000e+00> : vector<24x224xf32>
      %42 = tpu.matmul %20, %34, %cst_21 {dimension_numbers = #tpu.dot_dimension_numbers<[1], [0], [0], [1], [0, 0, 1, 1], [], []>} : vector<24x40xbf16>, vector<40x224xbf16>, vector<24x224xf32> -> vector<24x224xf32>
      %43 = vector.extract_strided_slice %42 {offsets = [0, 2], sizes = [24, 220], strides = [1, 1]} : vector<24x224xf32> to vector<24x220xf32>
      %44 = arith.addf %41, %43 : vector<24x220xf32>
      %cst_22 = arith.constant dense<0.000000e+00> : vector<24x224xf32>
      %45 = tpu.matmul %22, %34, %cst_22 {dimension_numbers = #tpu.dot_dimension_numbers<[1], [0], [0], [1], [0, 0, 1, 1], [], []>} : vector<24x40xbf16>, vector<40x224xbf16>, vector<24x224xf32> -> vector<24x224xf32>
      %46 = vector.extract_strided_slice %45 {offsets = [0, 3], sizes = [24, 220], strides = [1, 1]} : vector<24x224xf32> to vector<24x220xf32>
      %47 = arith.addf %44, %46 : vector<24x220xf32>
      %cst_23 = arith.constant dense<0.000000e+00> : vector<24x224xf32>
      %48 = tpu.matmul %24, %34, %cst_23 {dimension_numbers = #tpu.dot_dimension_numbers<[1], [0], [0], [1], [0, 0, 1, 1], [], []>} : vector<24x40xbf16>, vector<40x224xbf16>, vector<24x224xf32> -> vector<24x224xf32>
      %49 = vector.extract_strided_slice %48 {offsets = [0, 4], sizes = [24, 220], strides = [1, 1]} : vector<24x224xf32> to vector<24x220xf32>
      %50 = arith.addf %47, %49 : vector<24x220xf32>
      %51 = vector.extract_strided_slice %32 {offsets = [8, 0], sizes = [40, 224], strides = [1, 1]} : vector<48x224xf32> to vector<40x224xf32>
      %52 = arith.truncf %51 : vector<40x224xf32> to vector<40x224xbf16>
      %cst_24 = arith.constant 0.000000e+00 : f32
      %53 = vector.broadcast %cst_24 : f32 to vector<24x220xf32>
      %cst_25 = arith.constant dense<0.000000e+00> : vector<24x224xf32>
      %54 = tpu.matmul %16, %52, %cst_25 {dimension_numbers = #tpu.dot_dimension_numbers<[1], [0], [0], [1], [0, 0, 1, 1], [], []>} : vector<24x40xbf16>, vector<40x224xbf16>, vector<24x224xf32> -> vector<24x224xf32>
      %55 = vector.extract_strided_slice %54 {offsets = [0, 0], sizes = [24, 220], strides = [1, 1]} : vector<24x224xf32> to vector<24x220xf32>
      %56 = arith.addf %53, %55 : vector<24x220xf32>
      %cst_26 = arith.constant dense<0.000000e+00> : vector<24x224xf32>
      %57 = tpu.matmul %18, %52, %cst_26 {dimension_numbers = #tpu.dot_dimension_numbers<[1], [0], [0], [1], [0, 0, 1, 1], [], []>} : vector<24x40xbf16>, vector<40x224xbf16>, vector<24x224xf32> -> vector<24x224xf32>
      %58 = vector.extract_strided_slice %57 {offsets = [0, 1], sizes = [24, 220], strides = [1, 1]} : vector<24x224xf32> to vector<24x220xf32>
      %59 = arith.addf %56, %58 : vector<24x220xf32>
      %cst_27 = arith.constant dense<0.000000e+00> : vector<24x224xf32>
      %60 = tpu.matmul %20, %52, %cst_27 {dimension_numbers = #tpu.dot_dimension_numbers<[1], [0], [0], [1], [0, 0, 1, 1], [], []>} : vector<24x40xbf16>, vector<40x224xbf16>, vector<24x224xf32> -> vector<24x224xf32>
      %61 = vector.extract_strided_slice %60 {offsets = [0, 2], sizes = [24, 220], strides = [1, 1]} : vector<24x224xf32> to vector<24x220xf32>
      %62 = arith.addf %59, %61 : vector<24x220xf32>
      %cst_28 = arith.constant dense<0.000000e+00> : vector<24x224xf32>
      %63 = tpu.matmul %22, %52, %cst_28 {dimension_numbers = #tpu.dot_dimension_numbers<[1], [0], [0], [1], [0, 0, 1, 1], [], []>} : vector<24x40xbf16>, vector<40x224xbf16>, vector<24x224xf32> -> vector<24x224xf32>
      %64 = vector.extract_strided_slice %63 {offsets = [0, 3], sizes = [24, 220], strides = [1, 1]} : vector<24x224xf32> to vector<24x220xf32>
      %65 = arith.addf %62, %64 : vector<24x220xf32>
      %cst_29 = arith.constant dense<0.000000e+00> : vector<24x224xf32>
      %66 = tpu.matmul %24, %52, %cst_29 {dimension_numbers = #tpu.dot_dimension_numbers<[1], [0], [0], [1], [0, 0, 1, 1], [], []>} : vector<24x40xbf16>, vector<40x224xbf16>, vector<24x224xf32> -> vector<24x224xf32>
      %67 = vector.extract_strided_slice %66 {offsets = [0, 4], sizes = [24, 220], strides = [1, 1]} : vector<24x224xf32> to vector<24x220xf32>
      %68 = arith.addf %65, %67 : vector<24x220xf32>
      %69 = arith.maximumf %50, %68 : vector<24x220xf32>
      %70 = vector.broadcast %14 : vector<24x1xf32> to vector<24x220xf32>
      %71 = arith.addf %69, %70 : vector<24x220xf32>
      %cst_30 = arith.constant 0.000000e+00 : f32
      %72 = vector.broadcast %cst_30 : f32 to vector<24x220xf32>
      %73 = arith.maximumf %71, %72 : vector<24x220xf32>
      %cst_31 = arith.constant dense<0.000000e+00> : vector<24x110xf32>
      %74 = tpu.matmul %73, %6, %cst_31 {dimension_numbers = #tpu.dot_dimension_numbers<[1], [0], [0], [1], [0, 0, 1, 1], [], []>} : vector<24x220xf32>, vector<220x110xf32>, vector<24x110xf32> -> vector<24x110xf32>
      %cst_32 = arith.constant dense<0.000000e+00> : vector<24x110xf32>
      %75 = tpu.matmul %73, %13, %cst_32 {dimension_numbers = #tpu.dot_dimension_numbers<[1], [0], [0], [1], [0, 0, 1, 1], [], []>} : vector<24x220xf32>, vector<220x110xf32>, vector<24x110xf32> -> vector<24x110xf32>
      %76 = arith.maximumf %74, %75 : vector<24x110xf32>
      %c24_i32 = arith.constant 24 : i32
      %77 = arith.muli %27, %c24_i32 : i32
      %78 = tpu.assume_multiple %77, 24 : i32
      %c0_33 = arith.constant 0 : index
      %79 = arith.index_cast %78 : i32 to index
      %c0_34 = arith.constant 0 : index
      %80 = vector.load %arg4[%c0_33, %79, %c0_34] : memref<1x2640x110xf32, #tpu.memory_space<vmem>>, vector<1x24x110xf32>
      %81 = vector.shape_cast %80 : vector<1x24x110xf32> to vector<24x110xf32>
      %82 = vector.shape_cast %76 : vector<24x110xf32> to vector<1x24x110xf32>
      tpu.vector_store %arg4[%c0_33, %79, %c0_34], %82 {strides = array<i32>} : memref<1x2640x110xf32, #tpu.memory_space<vmem>>, vector<1x24x110xf32>,
    }
    %c110_i32_14 = arith.constant 110 : i32
    return
  }
  func.func @transform_0(%arg0: i32) -> (i32, i32, i32) {
    %c0_i32 = arith.constant 0 : i32
    %c0_i32_0 = arith.constant 0 : i32
    %c0_i32_1 = arith.constant 0 : i32
    return %arg0, %c0_i32, %c0_i32_0 : i32, i32, i32
  }
  func.func @transform_1(%arg0: i32) -> (i32, i32, i32) {
    %c0_i32 = arith.constant 0 : i32
    %c0_i32_0 = arith.constant 0 : i32
    %c0_i32_1 = arith.constant 0 : i32
    %c0_i32_2 = arith.constant 0 : i32
    return %c0_i32, %c0_i32_0, %c0_i32_1 : i32, i32, i32
  }
  func.func @transform_2(%arg0: i32) -> (i32, i32) {
    %c0_i32 = arith.constant 0 : i32
    %c0_i32_0 = arith.constant 0 : i32
    %c0_i32_1 = arith.constant 0 : i32
    return %c0_i32, %c0_i32_0 : i32, i32
  }
  func.func @transform_3(%arg0: i32) -> (i32, i32, i32) {
    %c0_i32 = arith.constant 0 : i32
    %c0_i32_0 = arith.constant 0 : i32
    %c0_i32_1 = arith.constant 0 : i32
    return %arg0, %c0_i32, %c0_i32_0 : i32, i32, i32
  }
}

module attributes {stable_mosaic.version = 11 : i64} {
  func.func @_conv_relu_pool_kernel(%arg0: i32, %arg1: memref<1x2640x110xf32, #tpu.memory_space<vmem>>, %arg2: memref<5x56x120xbf16, #tpu.memory_space<vmem>>, %arg3: memref<56x1xf32, #tpu.memory_space<vmem>>, %arg4: memref<1x53x50x53xf32, #tpu.memory_space<vmem>>) attributes {dimension_semantics = [#tpu.dimension_semantics<parallel>], iteration_bounds = array<i64: 2>, scalar_prefetch = 0 : i64, scratch_operands = 0 : i64, tpu.core_type = #tpu.core_type<tc>, window_params = [{transform_indices = @transform_0, window_bounds = array<i64: 1, 2640, 110>}, {pipeline_mode = #tpu.pipeline_mode<synchronous>, transform_indices = @transform_1, window_bounds = array<i64: 5, 56, 120>}, {pipeline_mode = #tpu.pipeline_mode<synchronous>, transform_indices = @transform_2, window_bounds = array<i64: 56, 1>}, {transform_indices = @transform_3, window_bounds = array<i64: 1, 53, 50, 53>}]} {
    %0 = tpu.iota {dimensions = array<i32: 0>} : vector<106x53xi32>
    %1 = tpu.iota {dimensions = array<i32: 1>} : vector<106x53xi32>
    %c2_i32 = arith.constant 2 : i32
    %2 = vector.broadcast %c2_i32 : i32 to vector<106x53xi32>
    %3 = arith.muli %2, %1 : vector<106x53xi32>
    %4 = arith.cmpi eq, %0, %3 : vector<106x53xi32>
    %5 = arith.extui %4 : vector<106x53xi1> to vector<106x53xi32>
    %6 = arith.sitofp %5 : vector<106x53xi32> to vector<106x53xf32>
    %c2_i32_0 = arith.constant 2 : i32
    %7 = vector.broadcast %c2_i32_0 : i32 to vector<106x53xi32>
    %8 = arith.muli %7, %1 : vector<106x53xi32>
    %c1_i32 = arith.constant 1 : i32
    %9 = vector.broadcast %c1_i32 : i32 to vector<106x53xi32>
    %10 = arith.addi %8, %9 : vector<106x53xi32>
    %11 = arith.cmpi eq, %0, %10 : vector<106x53xi32>
    %12 = arith.extui %11 : vector<106x53xi1> to vector<106x53xi32>
    %13 = arith.sitofp %12 : vector<106x53xi32> to vector<106x53xf32>
    %c0 = arith.constant 0 : index
    %c0_1 = arith.constant 0 : index
    %14 = vector.load %arg3[%c0, %c0_1] : memref<56x1xf32, #tpu.memory_space<vmem>>, vector<56x1xf32>
    %c0_2 = arith.constant 0 : index
    %c0_3 = arith.constant 0 : index
    %c0_4 = arith.constant 0 : index
    %15 = vector.load %arg2[%c0_2, %c0_3, %c0_4] : memref<5x56x120xbf16, #tpu.memory_space<vmem>>, vector<1x56x120xbf16>
    %16 = vector.shape_cast %15 : vector<1x56x120xbf16> to vector<56x120xbf16>
    %c1 = arith.constant 1 : index
    %c0_5 = arith.constant 0 : index
    %c0_6 = arith.constant 0 : index
    %17 = vector.load %arg2[%c1, %c0_5, %c0_6] : memref<5x56x120xbf16, #tpu.memory_space<vmem>>, vector<1x56x120xbf16>
    %18 = vector.shape_cast %17 : vector<1x56x120xbf16> to vector<56x120xbf16>
    %c2 = arith.constant 2 : index
    %c0_7 = arith.constant 0 : index
    %c0_8 = arith.constant 0 : index
    %19 = vector.load %arg2[%c2, %c0_7, %c0_8] : memref<5x56x120xbf16, #tpu.memory_space<vmem>>, vector<1x56x120xbf16>
    %20 = vector.shape_cast %19 : vector<1x56x120xbf16> to vector<56x120xbf16>
    %c3 = arith.constant 3 : index
    %c0_9 = arith.constant 0 : index
    %c0_10 = arith.constant 0 : index
    %21 = vector.load %arg2[%c3, %c0_9, %c0_10] : memref<5x56x120xbf16, #tpu.memory_space<vmem>>, vector<1x56x120xbf16>
    %22 = vector.shape_cast %21 : vector<1x56x120xbf16> to vector<56x120xbf16>
    %c4 = arith.constant 4 : index
    %c0_11 = arith.constant 0 : index
    %c0_12 = arith.constant 0 : index
    %23 = vector.load %arg2[%c4, %c0_11, %c0_12] : memref<5x56x120xbf16, #tpu.memory_space<vmem>>, vector<1x56x120xbf16>
    %24 = vector.shape_cast %23 : vector<1x56x120xbf16> to vector<56x120xbf16>
    %c0_i32 = arith.constant 0 : i32
    %c53_i32 = arith.constant 53 : i32
    %25 = arith.addi %c0_i32, %c53_i32 : i32
    %c1_i32_13 = arith.constant 1 : i32
    scf.for %arg5 = %c0_i32 to %25 step %c1_i32_13  : i32 {
      %c1_i32_15 = arith.constant 1 : i32
      %26 = arith.muli %arg5, %c1_i32_15 : i32
      %c0_i32_16 = arith.constant 0 : i32
      %27 = arith.addi %c0_i32_16, %26 : i32
      %c48_i32 = arith.constant 48 : i32
      %28 = arith.muli %c48_i32, %27 : i32
      %29 = tpu.assume_multiple %28, 48 : i32
      %c0_17 = arith.constant 0 : index
      %30 = arith.index_cast %29 : i32 to index
      %c0_18 = arith.constant 0 : index
      %31 = vector.load %arg1[%c0_17, %30, %c0_18] : memref<1x2640x110xf32, #tpu.memory_space<vmem>>, vector<1x144x110xf32>
      %32 = vector.shape_cast %31 : vector<1x144x110xf32> to vector<144x110xf32>
      %33 = vector.extract_strided_slice %32 {offsets = [0, 0], sizes = [120, 110], strides = [1, 1]} : vector<144x110xf32> to vector<120x110xf32>
      %34 = arith.truncf %33 : vector<120x110xf32> to vector<120x110xbf16>
      %cst = arith.constant 0.000000e+00 : f32
      %35 = vector.broadcast %cst : f32 to vector<56x106xf32>
      %cst_19 = arith.constant dense<0.000000e+00> : vector<56x110xf32>
      %36 = tpu.matmul %16, %34, %cst_19 {dimension_numbers = #tpu.dot_dimension_numbers<[1], [0], [0], [1], [0, 0, 1, 1], [], []>} : vector<56x120xbf16>, vector<120x110xbf16>, vector<56x110xf32> -> vector<56x110xf32>
      %37 = vector.extract_strided_slice %36 {offsets = [0, 0], sizes = [56, 106], strides = [1, 1]} : vector<56x110xf32> to vector<56x106xf32>
      %38 = arith.addf %35, %37 : vector<56x106xf32>
      %cst_20 = arith.constant dense<0.000000e+00> : vector<56x110xf32>
      %39 = tpu.matmul %18, %34, %cst_20 {dimension_numbers = #tpu.dot_dimension_numbers<[1], [0], [0], [1], [0, 0, 1, 1], [], []>} : vector<56x120xbf16>, vector<120x110xbf16>, vector<56x110xf32> -> vector<56x110xf32>
      %40 = vector.extract_strided_slice %39 {offsets = [0, 1], sizes = [56, 106], strides = [1, 1]} : vector<56x110xf32> to vector<56x106xf32>
      %41 = arith.addf %38, %40 : vector<56x106xf32>
      %cst_21 = arith.constant dense<0.000000e+00> : vector<56x110xf32>
      %42 = tpu.matmul %20, %34, %cst_21 {dimension_numbers = #tpu.dot_dimension_numbers<[1], [0], [0], [1], [0, 0, 1, 1], [], []>} : vector<56x120xbf16>, vector<120x110xbf16>, vector<56x110xf32> -> vector<56x110xf32>
      %43 = vector.extract_strided_slice %42 {offsets = [0, 2], sizes = [56, 106], strides = [1, 1]} : vector<56x110xf32> to vector<56x106xf32>
      %44 = arith.addf %41, %43 : vector<56x106xf32>
      %cst_22 = arith.constant dense<0.000000e+00> : vector<56x110xf32>
      %45 = tpu.matmul %22, %34, %cst_22 {dimension_numbers = #tpu.dot_dimension_numbers<[1], [0], [0], [1], [0, 0, 1, 1], [], []>} : vector<56x120xbf16>, vector<120x110xbf16>, vector<56x110xf32> -> vector<56x110xf32>
      %46 = vector.extract_strided_slice %45 {offsets = [0, 3], sizes = [56, 106], strides = [1, 1]} : vector<56x110xf32> to vector<56x106xf32>
      %47 = arith.addf %44, %46 : vector<56x106xf32>
      %cst_23 = arith.constant dense<0.000000e+00> : vector<56x110xf32>
      %48 = tpu.matmul %24, %34, %cst_23 {dimension_numbers = #tpu.dot_dimension_numbers<[1], [0], [0], [1], [0, 0, 1, 1], [], []>} : vector<56x120xbf16>, vector<120x110xbf16>, vector<56x110xf32> -> vector<56x110xf32>
      %49 = vector.extract_strided_slice %48 {offsets = [0, 4], sizes = [56, 106], strides = [1, 1]} : vector<56x110xf32> to vector<56x106xf32>
      %50 = arith.addf %47, %49 : vector<56x106xf32>
      %51 = vector.extract_strided_slice %32 {offsets = [24, 0], sizes = [120, 110], strides = [1, 1]} : vector<144x110xf32> to vector<120x110xf32>
      %52 = arith.truncf %51 : vector<120x110xf32> to vector<120x110xbf16>
      %cst_24 = arith.constant 0.000000e+00 : f32
      %53 = vector.broadcast %cst_24 : f32 to vector<56x106xf32>
      %cst_25 = arith.constant dense<0.000000e+00> : vector<56x110xf32>
      %54 = tpu.matmul %16, %52, %cst_25 {dimension_numbers = #tpu.dot_dimension_numbers<[1], [0], [0], [1], [0, 0, 1, 1], [], []>} : vector<56x120xbf16>, vector<120x110xbf16>, vector<56x110xf32> -> vector<56x110xf32>
      %55 = vector.extract_strided_slice %54 {offsets = [0, 0], sizes = [56, 106], strides = [1, 1]} : vector<56x110xf32> to vector<56x106xf32>
      %56 = arith.addf %53, %55 : vector<56x106xf32>
      %cst_26 = arith.constant dense<0.000000e+00> : vector<56x110xf32>
      %57 = tpu.matmul %18, %52, %cst_26 {dimension_numbers = #tpu.dot_dimension_numbers<[1], [0], [0], [1], [0, 0, 1, 1], [], []>} : vector<56x120xbf16>, vector<120x110xbf16>, vector<56x110xf32> -> vector<56x110xf32>
      %58 = vector.extract_strided_slice %57 {offsets = [0, 1], sizes = [56, 106], strides = [1, 1]} : vector<56x110xf32> to vector<56x106xf32>
      %59 = arith.addf %56, %58 : vector<56x106xf32>
      %cst_27 = arith.constant dense<0.000000e+00> : vector<56x110xf32>
      %60 = tpu.matmul %20, %52, %cst_27 {dimension_numbers = #tpu.dot_dimension_numbers<[1], [0], [0], [1], [0, 0, 1, 1], [], []>} : vector<56x120xbf16>, vector<120x110xbf16>, vector<56x110xf32> -> vector<56x110xf32>
      %61 = vector.extract_strided_slice %60 {offsets = [0, 2], sizes = [56, 106], strides = [1, 1]} : vector<56x110xf32> to vector<56x106xf32>
      %62 = arith.addf %59, %61 : vector<56x106xf32>
      %cst_28 = arith.constant dense<0.000000e+00> : vector<56x110xf32>
      %63 = tpu.matmul %22, %52, %cst_28 {dimension_numbers = #tpu.dot_dimension_numbers<[1], [0], [0], [1], [0, 0, 1, 1], [], []>} : vector<56x120xbf16>, vector<120x110xbf16>, vector<56x110xf32> -> vector<56x110xf32>
      %64 = vector.extract_strided_slice %63 {offsets = [0, 3], sizes = [56, 106], strides = [1, 1]} : vector<56x110xf32> to vector<56x106xf32>
      %65 = arith.addf %62, %64 : vector<56x106xf32>
      %cst_29 = arith.constant dense<0.000000e+00> : vector<56x110xf32>
      %66 = tpu.matmul %24, %52, %cst_29 {dimension_numbers = #tpu.dot_dimension_numbers<[1], [0], [0], [1], [0, 0, 1, 1], [], []>} : vector<56x120xbf16>, vector<120x110xbf16>, vector<56x110xf32> -> vector<56x110xf32>
      %67 = vector.extract_strided_slice %66 {offsets = [0, 4], sizes = [56, 106], strides = [1, 1]} : vector<56x110xf32> to vector<56x106xf32>
      %68 = arith.addf %65, %67 : vector<56x106xf32>
      %69 = arith.maximumf %50, %68 : vector<56x106xf32>
      %70 = vector.broadcast %14 : vector<56x1xf32> to vector<56x106xf32>
      %71 = arith.addf %69, %70 : vector<56x106xf32>
      %cst_30 = arith.constant 0.000000e+00 : f32
      %72 = vector.broadcast %cst_30 : f32 to vector<56x106xf32>
      %73 = arith.maximumf %71, %72 : vector<56x106xf32>
      %cst_31 = arith.constant dense<0.000000e+00> : vector<56x53xf32>
      %74 = tpu.matmul %73, %6, %cst_31 {dimension_numbers = #tpu.dot_dimension_numbers<[1], [0], [0], [1], [0, 0, 1, 1], [], []>} : vector<56x106xf32>, vector<106x53xf32>, vector<56x53xf32> -> vector<56x53xf32>
      %cst_32 = arith.constant dense<0.000000e+00> : vector<56x53xf32>
      %75 = tpu.matmul %73, %13, %cst_32 {dimension_numbers = #tpu.dot_dimension_numbers<[1], [0], [0], [1], [0, 0, 1, 1], [], []>} : vector<56x106xf32>, vector<106x53xf32>, vector<56x53xf32> -> vector<56x53xf32>
      %76 = arith.maximumf %74, %75 : vector<56x53xf32>
      %77 = vector.extract_strided_slice %76 {offsets = [0, 0], sizes = [50, 53], strides = [1, 1]} : vector<56x53xf32> to vector<50x53xf32>
      %c0_33 = arith.constant 0 : index
      %78 = arith.index_cast %27 : i32 to index
      %c0_34 = arith.constant 0 : index
      %c0_35 = arith.constant 0 : index
      %79 = vector.load %arg4[%c0_33, %78, %c0_34, %c0_35] : memref<1x53x50x53xf32, #tpu.memory_space<vmem>>, vector<1x1x50x53xf32>
      %80 = vector.shape_cast %79 : vector<1x1x50x53xf32> to vector<50x53xf32>
      %81 = vector.shape_cast %77 : vector<50x53xf32> to vector<1x1x50x53xf32>
      tpu.vector_store %arg4[%c0_33, %78, %c0_34, %c0_35], %81 {strides = array<i32>} : memref<1x53x50x53xf32, #tpu.memory_space<vmem>>, vector<1x1x50x53xf32>,
    }
    %c53_i32_14 = arith.constant 53 : i32
    return
  }
  func.func @transform_0(%arg0: i32) -> (i32, i32, i32) {
    %c0_i32 = arith.constant 0 : i32
    %c0_i32_0 = arith.constant 0 : i32
    %c0_i32_1 = arith.constant 0 : i32
    return %arg0, %c0_i32, %c0_i32_0 : i32, i32, i32
  }
  func.func @transform_1(%arg0: i32) -> (i32, i32, i32) {
    %c0_i32 = arith.constant 0 : i32
    %c0_i32_0 = arith.constant 0 : i32
    %c0_i32_1 = arith.constant 0 : i32
    %c0_i32_2 = arith.constant 0 : i32
    return %c0_i32, %c0_i32_0, %c0_i32_1 : i32, i32, i32
  }
  func.func @transform_2(%arg0: i32) -> (i32, i32) {
    %c0_i32 = arith.constant 0 : i32
    %c0_i32_0 = arith.constant 0 : i32
    %c0_i32_1 = arith.constant 0 : i32
    return %c0_i32, %c0_i32_0 : i32, i32
  }
  func.func @transform_3(%arg0: i32) -> (i32, i32, i32, i32) {
    %c0_i32 = arith.constant 0 : i32
    %c0_i32_0 = arith.constant 0 : i32
    %c0_i32_1 = arith.constant 0 : i32
    %c0_i32_2 = arith.constant 0 : i32
    return %arg0, %c0_i32, %c0_i32_0, %c0_i32_1 : i32, i32, i32, i32
  }
}

module attributes {stable_mosaic.version = 11 : i64} {
  func.func @_mlp_head_kernel(%arg0: i32, %arg1: memref<2x8192xbf16, #tpu.memory_space<vmem>>, %arg2: memref<8192x128xbf16, #tpu.memory_space<vmem>>, %arg3: memref<1x128xf32, #tpu.memory_space<vmem>>, %arg4: memref<128x10xf32, #tpu.memory_space<vmem>>, %arg5: memref<1x10xf32, #tpu.memory_space<vmem>>, %arg6: memref<2x10xf32, #tpu.memory_space<vmem>>, %arg7: memref<2x128xf32, #tpu.memory_space<vmem>>) attributes {dimension_semantics = [#tpu.dimension_semantics<arbitrary>], iteration_bounds = array<i64: 18>, scalar_prefetch = 0 : i64, scratch_operands = 1 : i64, tpu.core_type = #tpu.core_type<tc>, window_params = [{transform_indices = @transform_0, window_bounds = array<i64: 2, 8192>}, {transform_indices = @transform_1, window_bounds = array<i64: 8192, 128>}, {pipeline_mode = #tpu.pipeline_mode<synchronous>, transform_indices = @transform_2, window_bounds = array<i64: 1, 128>}, {pipeline_mode = #tpu.pipeline_mode<synchronous>, transform_indices = @transform_3, window_bounds = array<i64: 128, 10>}, {pipeline_mode = #tpu.pipeline_mode<synchronous>, transform_indices = @transform_4, window_bounds = array<i64: 1, 10>}, {pipeline_mode = #tpu.pipeline_mode<synchronous>, transform_indices = @transform_5, window_bounds = array<i64: 2, 10>}]} {
    %c0_i32 = arith.constant 0 : i32
    %0 = arith.cmpi eq, %arg0, %c0_i32 : i32
    %1 = arith.extui %0 : i1 to i32
    %c0_i32_0 = arith.constant 0 : i32
    %2 = arith.cmpi ne, %1, %c0_i32_0 : i32
    scf.if %2 {
      %cst_9 = arith.constant 0.000000e+00 : f32
      %12 = vector.broadcast %cst_9 : f32 to vector<2x128xf32>
      %c0_10 = arith.constant 0 : index
      %c0_11 = arith.constant 0 : index
      %13 = vector.load %arg7[%c0_10, %c0_11] : memref<2x128xf32, #tpu.memory_space<vmem>>, vector<2x128xf32>
      tpu.vector_store %arg7[%c0_10, %c0_11], %12 {strides = array<i32>} : memref<2x128xf32, #tpu.memory_space<vmem>>, vector<2x128xf32>,
    } else {
    }
    %c0 = arith.constant 0 : index
    %c0_1 = arith.constant 0 : index
    %3 = vector.load %arg7[%c0, %c0_1] : memref<2x128xf32, #tpu.memory_space<vmem>>, vector<2x128xf32>
    %c0_2 = arith.constant 0 : index
    %c0_3 = arith.constant 0 : index
    %4 = vector.load %arg1[%c0_2, %c0_3] : memref<2x8192xbf16, #tpu.memory_space<vmem>>, vector<2x8192xbf16>
    %c0_4 = arith.constant 0 : index
    %c0_5 = arith.constant 0 : index
    %5 = vector.load %arg2[%c0_4, %c0_5] : memref<8192x128xbf16, #tpu.memory_space<vmem>>, vector<8192x128xbf16>
    %cst = arith.constant dense<0.000000e+00> : vector<2x128xf32>
    %6 = tpu.matmul %4, %5, %cst {dimension_numbers = #tpu.dot_dimension_numbers<[1], [0], [0], [1], [0, 0, 1, 1], [], []>} : vector<2x8192xbf16>, vector<8192x128xbf16>, vector<2x128xf32> -> vector<2x128xf32>
    %7 = arith.addf %3, %6 : vector<2x128xf32>
    %c0_6 = arith.constant 0 : index
    %c0_7 = arith.constant 0 : index
    %8 = vector.load %arg7[%c0_6, %c0_7] : memref<2x128xf32, #tpu.memory_space<vmem>>, vector<2x128xf32>
    tpu.vector_store %arg7[%c0_6, %c0_7], %7 {strides = array<i32>} : memref<2x128xf32, #tpu.memory_space<vmem>>, vector<2x128xf32>,
    %c17_i32 = arith.constant 17 : i32
    %9 = arith.cmpi eq, %arg0, %c17_i32 : i32
    %10 = arith.extui %9 : i1 to i32
    %c0_i32_8 = arith.constant 0 : i32
    %11 = arith.cmpi ne, %10, %c0_i32_8 : i32
    scf.if %11 {
      %c0_9 = arith.constant 0 : index
      %c0_10 = arith.constant 0 : index
      %12 = vector.load %arg7[%c0_9, %c0_10] : memref<2x128xf32, #tpu.memory_space<vmem>>, vector<2x128xf32>
      %c0_11 = arith.constant 0 : index
      %c0_12 = arith.constant 0 : index
      %13 = vector.load %arg3[%c0_11, %c0_12] : memref<1x128xf32, #tpu.memory_space<vmem>>, vector<1x128xf32>
      %14 = vector.broadcast %13 : vector<1x128xf32> to vector<2x128xf32>
      %15 = arith.addf %12, %14 : vector<2x128xf32>
      %cst_13 = arith.constant 0.000000e+00 : f32
      %16 = vector.broadcast %cst_13 : f32 to vector<2x128xf32>
      %17 = arith.maximumf %15, %16 : vector<2x128xf32>
      %c0_14 = arith.constant 0 : index
      %c0_15 = arith.constant 0 : index
      %18 = vector.load %arg4[%c0_14, %c0_15] : memref<128x10xf32, #tpu.memory_space<vmem>>, vector<128x10xf32>
      %cst_16 = arith.constant dense<0.000000e+00> : vector<2x10xf32>
      %19 = tpu.matmul %17, %18, %cst_16 {dimension_numbers = #tpu.dot_dimension_numbers<[1], [0], [0], [1], [0, 0, 1, 1], [], []>} : vector<2x128xf32>, vector<128x10xf32>, vector<2x10xf32> -> vector<2x10xf32>
      %c0_17 = arith.constant 0 : index
      %c0_18 = arith.constant 0 : index
      %20 = vector.load %arg5[%c0_17, %c0_18] : memref<1x10xf32, #tpu.memory_space<vmem>>, vector<1x10xf32>
      %21 = vector.broadcast %20 : vector<1x10xf32> to vector<2x10xf32>
      %22 = arith.addf %19, %21 : vector<2x10xf32>
      %cst_19 = arith.constant dense<0xFF800000> : vector<2xf32>
      %23 = vector.multi_reduction <maximumf>, %22, %cst_19 [1] : vector<2x10xf32> to vector<2xf32>
      %24 = vector.shape_cast %23 : vector<2xf32> to vector<2x1xf32>
      %25 = vector.broadcast %24 : vector<2x1xf32> to vector<2x10xf32>
      %26 = arith.subf %22, %25 : vector<2x10xf32>
      %27 = math.exp %26 : vector<2x10xf32>
      %cst_20 = arith.constant dense<0.000000e+00> : vector<2xf32>
      %28 = vector.multi_reduction <add>, %27, %cst_20 [1] : vector<2x10xf32> to vector<2xf32>
      %29 = vector.shape_cast %28 : vector<2xf32> to vector<2x1xf32>
      %30 = math.log %29 : vector<2x1xf32>
      %31 = vector.broadcast %30 : vector<2x1xf32> to vector<2x10xf32>
      %32 = arith.subf %26, %31 : vector<2x10xf32>
      %c0_21 = arith.constant 0 : index
      %c0_22 = arith.constant 0 : index
      %33 = vector.load %arg6[%c0_21, %c0_22] : memref<2x10xf32, #tpu.memory_space<vmem>>, vector<2x10xf32>
      tpu.vector_store %arg6[%c0_21, %c0_22], %32 {strides = array<i32>} : memref<2x10xf32, #tpu.memory_space<vmem>>, vector<2x10xf32>,
    } else {
    }
    return
  }
  func.func @transform_0(%arg0: i32) -> (i32, i32) {
    %c0_i32 = arith.constant 0 : i32
    %c0_i32_0 = arith.constant 0 : i32
    return %c0_i32, %arg0 : i32, i32
  }
  func.func @transform_1(%arg0: i32) -> (i32, i32) {
    %c0_i32 = arith.constant 0 : i32
    %c0_i32_0 = arith.constant 0 : i32
    return %arg0, %c0_i32 : i32, i32
  }
  func.func @transform_2(%arg0: i32) -> (i32, i32) {
    %c0_i32 = arith.constant 0 : i32
    %c0_i32_0 = arith.constant 0 : i32
    %c0_i32_1 = arith.constant 0 : i32
    return %c0_i32, %c0_i32_0 : i32, i32
  }
  func.func @transform_3(%arg0: i32) -> (i32, i32) {
    %c0_i32 = arith.constant 0 : i32
    %c0_i32_0 = arith.constant 0 : i32
    %c0_i32_1 = arith.constant 0 : i32
    return %c0_i32, %c0_i32_0 : i32, i32
  }
  func.func @transform_4(%arg0: i32) -> (i32, i32) {
    %c0_i32 = arith.constant 0 : i32
    %c0_i32_0 = arith.constant 0 : i32
    %c0_i32_1 = arith.constant 0 : i32
    return %c0_i32, %c0_i32_0 : i32, i32
  }
  func.func @transform_5(%arg0: i32) -> (i32, i32) {
    %c0_i32 = arith.constant 0 : i32
    %c0_i32_0 = arith.constant 0 : i32
    %c0_i32_1 = arith.constant 0 : i32
    return %c0_i32, %c0_i32_0 : i32, i32
  }
}

</mosaic_0001>

<bundles_post_ra>
// kernel: cnn_forward.3
= control target key start
LH: loop header
LB: loop body
LE: loop exit
PB: predicated region body
PF: predicated region fallthrough
CT: control target
= control target key end

     0   :  { %s1842_s12 = smov 0   ;;  %s2763_s0 = inlined_call_operand.vmem [shape: f32[2,1792,224], index: 0, kind: input, shape index: {}]   ;;  %s2764_s1 = inlined_call_operand.vmem [shape: bf16[5,24,40], index: 1, kind: input, shape index: {}]   ;;  %s2765_s2 = inlined_call_operand.vmem [shape: f32[24,1], index: 2, kind: input, shape index: {}]   ;;  %s2766_s3 = inlined_call_operand.vmem [shape: f32[2,2640,110], index: 3, kind: output, shape index: {}]  }
   0x1 LB: > { %s1587_s13 = sadd.s32 4294967295, %s1808_s12   ;;  %p1591_p0 = scmp.ge.s32.totalorder %s1808_s12, 1  ;;  %s1808_s12 = sphi %s1842_s12, %s13_s12  }
   0x2   : > { %p137_p1 = scmp.lt.s32.totalorder %s1808_s12, 3 }
   0x4   : > { %p138_p2 = pnand %p1591_p0, %p137_p1 }
   0x5   : > { %p161_p3 = scmp.lt.s32.totalorder (!%p138_p2), %s1587_s13, 1  ;;  %s2154_s5 = smov (!%p138_p2), 0  }
   0x6   : > { %141 = sbr.rel (%p138_p2) target bundleno = 675 (0x2a3), region = 32 }
   0xb   : > { %v172_v0 = vlaneseq  ;;  %v1853_v1 = vld [vmem:[%s2765_s2] sm:$0xff]  ;;  %v1858_v2 = vld [vmem:[%s2765_s2 + $0x8] sm:$0xff]  ;;  %v1863_v3 = vld [vmem:[%s2765_s2 + $0x10] sm:$0xff]  ;;  %s2947_s13 = smov (!%p161_p3, %s1587_s13), 1  ;;  %v1814_v49 = vmov 0.0  }
   0xc   : > { %2823 = vst [vmem:[#allocation2_spill] sm:$0xff] %v1853_v1  ;;  %2824 = vst [vmem:[#allocation3_spill] sm:$0xff] %v1858_v2  ;;  %v1868_v4 = vld [vmem:[%s2764_s1] sm:$0xf]  ;;  %v1873_v5 = vld [vmem:[%s2764_s1 + $0x4] sm:$0xf] }
   0xd   : > { %2825 = vst [vmem:[#allocation4_spill] sm:$0xff] %v1863_v3  ;;  %2826 = vst [vmem:[#allocation5_spill] sm:$0xff] %v1868_v4  ;;  %v1878_v6 = vld [vmem:[%s2764_s1 + $0x8] sm:$0xf]  ;;  %v1880_v7 = vshrl.u32 %v172_v0, 7  ;;  %v202_v8 = vand.u32 127, %v172_v0 }
   0xe   : > { %2827 = vst [vmem:[#allocation6_spill] sm:$0xff] %v1873_v5  ;;  %2828 = vst [vmem:[#allocation7_spill] sm:$0xff] %v1878_v6  ;;  %v1885_v9 = vld [vmem:[%s2764_s1 + $0xc] sm:$0xf]  ;;  %v1890_v10 = vld [vmem:[%s2764_s1 + $0x10] sm:$0xf] }
   0xf   : > { %2829 = vst [vmem:[#allocation8_spill] sm:$0xff] %v1880_v7  ;;  %2830 = vst [vmem:[#allocation9_spill] sm:$0xff] %v1885_v9  ;;  %v1895_v11 = vld [vmem:[%s2764_s1 + $0x14] sm:$0xf]  ;;  %v1900_v12 = vld [vmem:[%s2764_s1 + $0x18] sm:$0xf] }
  0x10   : > { %2831 = vst [vmem:[#allocation10_spill] sm:$0xff] %v1890_v10  ;;  %2832 = vst [vmem:[#allocation11_spill] sm:$0xff] %v1895_v11  ;;  %s1770_s7 = smul.u32 3584, %s2947_s13  ;;  %v1903_v13 = vadd.s32 8, %v1880_v7  ;;  %v1906_v14 = vadd.s32 16, %v1880_v7  ;;  %v1909_v15 = vadd.s32 24, %v1880_v7 }
  0x11   : > { %2833 = vst [vmem:[#allocation12_spill] sm:$0xff] %v1900_v12  ;;  %v1912_v16 = vadd.s32 32, %v1880_v7  ;;  %s1771_s8 = smul.u32 2640, %s2947_s13  ;;  %v1915_v17 = vadd.s32 40, %v1880_v7  ;;  %v1918_v18 = vadd.s32 48, %v1880_v7  ;;  %v1921_v19 = vadd.s32 56, %v1880_v7 }
  0x12   : > { %2834 = vst [vmem:[#allocation13_spill] sm:$0xff] %v1903_v13  ;;  %2835 = vst [vmem:[#allocation14_spill] sm:$0xff] %v1906_v14  ;;  %v1924_v20 = vadd.s32 64, %v1880_v7  ;;  %s1929_s11 = scalar_lea.vmem %s2763_s0, %s1770_s7  ;;  %v1932_v21 = vadd.s32 72, %v1880_v7  ;;  %v1935_v22 = vadd.s32 80, %v1880_v7  ;;  %v1938_v23 = vadd.s32 88, %v1880_v7 }
  0x13   : > { %2836 = vst [vmem:[#allocation15_spill] sm:$0xff] %v1909_v15  ;;  %2837 = vst [vmem:[#allocation16_spill] sm:$0xff] %v1912_v16  ;;  %v1941_v24 = vadd.s32 96, %v1880_v7  ;;  %v1946_v25 = vld [vmem:[%s2764_s1 + $0x1c] sm:$0xf]  ;;  %s1951_s17 = scalar_lea.vmem %s2766_s3, %s1771_s8  ;;  %v1954_v26 = vadd.s32 104, %v1880_v7 }
  0x14   : > { %2838 = vst [vmem:[#allocation17_spill] sm:$0xff] %v1915_v17  ;;  %2839 = vst [vmem:[#allocation18_spill] sm:$0xff] %v1918_v18  ;;  %v1957_v27 = vadd.s32 112, %v1880_v7  ;;  %v1960_v28 = vadd.s32 120, %v1880_v7  ;;  %v1963_v29 = vadd.s32 128, %v1880_v7  ;;  %v1971_v31 = vadd.s32 136, %v1880_v7 }
  0x15   : > { %2840 = vst [vmem:[#allocation19_spill] sm:$0xff] %v1921_v19  ;;  %2841 = vst [vmem:[#allocation20_spill] sm:$0xff] %v1924_v20  ;;  %v1968_v30 = vld [vmem:[%s2764_s1 + $0x20] sm:$0xf]  ;;  %v1974_v32 = vadd.s32 144, %v1880_v7  ;;  %v1977_v33 = vadd.s32 152, %v1880_v7 }
  0x16   : > { %2842 = vst [vmem:[#allocation21_spill] sm:$0xff] %v1932_v21  ;;  %2843 = vst [vmem:[#allocation22_spill] sm:$0xff] %v1935_v22  ;;  %v1980_v34 = vadd.s32 160, %v1880_v7  ;;  %v1985_v35 = vld [vmem:[%s2764_s1 + $0x24] sm:$0xf]  ;;  %v1988_v36 = vadd.s32 168, %v1880_v7 }
  0x17   : > { %2844 = vst [vmem:[#allocation23_spill] sm:$0xff] %v1938_v23  ;;  %2845 = vst [vmem:[#allocation24_spill] sm:$0xff] %v1941_v24  ;;  %v1991_v37 = vadd.s32 176, %v1880_v7  ;;  %v1994_v38 = vadd.s32 184, %v1880_v7  ;;  %v1997_v39 = vadd.s32 192, %v1880_v7  ;;  %v2005_v41 = vadd.s32 200, %v1880_v7 }
  0x18   : > { %2846 = vst [vmem:[#allocation25_spill] sm:$0xff] %v1946_v25  ;;  %2847 = vst [vmem:[#allocation26_spill] sm:$0xff] %v1954_v26  ;;  %v2002_v40 = vld [vmem:[%s2764_s1 + $0x28] sm:$0xf]  ;;  %v2008_v42 = vadd.s32 208, %v1880_v7  ;;  %v2011_v43 = vadd.s32 216, %v1880_v7 }
  0x19   : > { %2848 = vst [vmem:[#allocation27_spill] sm:$0xff] %v1957_v27  ;;  %2849 = vst [vmem:[#allocation28_spill] sm:$0xff] %v1960_v28  ;;  %v2013_v44 = vmul.u32 2, %v202_v8  ;;  %v2018_v45 = vld [vmem:[%s2764_s1 + $0x2c] sm:$0xf] }
  0x1a   : > { %2850 = vst [vmem:[#allocation29_spill] sm:$0xff] %v1963_v29  ;;  %2851 = vst [vmem:[#allocation30_spill] sm:$0xff] %v1968_v30  ;;  %v2023_v46 = vld [vmem:[%s2764_s1 + $0x30] sm:$0xf]  ;;  %v2028_v47 = vld [vmem:[%s2764_s1 + $0x34] sm:$0xf] }
  0x1b   : > { %2852 = vst [vmem:[#allocation31_spill] sm:$0xff] %v1971_v31  ;;  %2853 = vst [vmem:[#allocation32_spill] sm:$0xff] %v1974_v32  ;;  %v2033_v48 = vld [vmem:[%s2764_s1 + $0x38] sm:$0xf]  ;;  %vm215_vm11 = vcmp.eq.s32.totalorder %v1938_v23, %v2013_v44  ;;  %vm216_vm12 = vcmp.eq.s32.totalorder %v1941_v24, %v2013_v44  ;;  %vm217_vm13 = vcmp.eq.s32.totalorder %v1954_v26, %v2013_v44  ;;  %v2094_v51 = vadd.s32 1, %v2013_v44 }
  0x1c   : > { %2854 = vst [vmem:[#allocation33_spill] sm:$0xff] %v1977_v33  ;;  %2855 = vst [vmem:[#allocation34_spill] sm:$0xff] %v1980_v34  ;;  %vm218_vm14 = vcmp.eq.s32.totalorder %v1957_v27, %v2013_v44  ;;  %vm219_vm15 = vcmp.eq.s32.totalorder %v1960_v28, %v2013_v44  ;;  %vm231_vm4 = vcmp.eq.s32.totalorder %v2011_v43, %v2013_v44 }
  0x1d   : > { %2856 = vst [vmem:[#allocation35_spill] sm:$0xff] %v1985_v35  ;;  %2857 = vst [vmem:[#allocation36_spill] sm:$0xff] %v1988_v36  ;;  %v2091_v50 = vsel %vm231_vm4, 1.0, %v1814_v49  ;;  %vm303_vm5 = vcmp.eq.s32.totalorder %v1957_v27, %v2094_v51  ;;  %vm304_vm7 = vcmp.eq.s32.totalorder %v1960_v28, %v2094_v51  ;;  %vm311_vm2 = vcmp.eq.s32.totalorder %v1991_v37, %v2094_v51 }
  0x1e   : > { %2858 = vst [vmem:[#allocation37_spill] sm:$0xff] %v1991_v37  ;;  %2859 = vst [vmem:[#allocation38_spill] sm:$0xff] %v1994_v38  ;;  %vm312_vm6 = vcmp.eq.s32.totalorder %v1994_v38, %v2094_v51  ;;  %vm313_vm8 = vcmp.eq.s32.totalorder %v1997_v39, %v2094_v51  ;;  %vm315_vm9 = vcmp.eq.s32.totalorder %v2008_v42, %v2094_v51 }
  0x1f   : > { %2860 = vst [vmem:[#allocation39_spill] sm:$0xff] %v1997_v39  ;;  %2861 = vst [vmem:[#allocation40_spill] sm:$0xff] %v2002_v40  ;;  %vm316_vm1 = vcmp.eq.s32.totalorder %v2011_v43, %v2094_v51 }
  0x20   : > { %v2152_v52 = vsel %vm316_vm1, 1.0, %v1814_v49 }
  0x21 LB: >> { %v2871_v26 = vld [vmem:[#allocation26_spill] sm:$0xff]  ;;  %v2872_v24 = vld [vmem:[#allocation24_spill] sm:$0xff]  ;;  %v2873_v23 = vld [vmem:[#allocation23_spill] sm:$0xff]  ;;  %v2767_v53 = vmov 0   ;;  %s1662_s6 = sshll.u32 %s1812_s5, 4  ;;  %vm440_vm1 = vcmask 1043456   ;;  %vm2928_vm0 = vcmp.eq.s32.totalorder %v2005_v41, %v2094_v51  ;;  %s1812_s5 = sphi %s2154_s5, %s400_s5  }
  0x22   : >> { %v2868_v32 = vld [vmem:[#allocation32_spill] sm:$0xff]  ;;  %v2874_v22 = vld [vmem:[#allocation22_spill] sm:$0xff]  ;;  %v2875_v21 = vld [vmem:[#allocation21_spill] sm:$0xff]  ;;  %479 = vmatprep.mubr.bf16.mxu0 %v2767_v53  ;;  %550 = vmatprep.mubr.bf16.mxu1 %v2767_v53  ;;  %s402_s7 = sshra.s32 %s1662_s6, 3  ;;  %vm433_vm10 = vcmask 326656   ;;  %s1816_s10 = smov 127   ;;  %vm2900_vm3 = vcmp.eq.s32.totalorder %v2871_v26, %v2094_v51  ;;  %vm2901_vm4 = vcmp.eq.s32.totalorder %v2872_v24, %v2094_v51 }
  0x23   : >> { %v2866_v34 = vld [vmem:[#allocation34_spill] sm:$0xff]  ;;  %v2867_v33 = vld [vmem:[#allocation33_spill] sm:$0xff]  ;;  %v2876_v20 = vld [vmem:[#allocation20_spill] sm:$0xff]  ;;  %1796 = vset.pattern.permute.xlu0 %v2767_v53  ;;  %1797 = vset.pattern.permute.xlu1 %v2767_v53  ;;  %s1769_s8 = sshll.u32 %s402_s7, 4  ;;  %s1817_s13 = smov 126  }
  0x24   : >> { %v2865_v36 = vld [vmem:[#allocation36_spill] sm:$0xff]  ;;  %v2877_v19 = vld [vmem:[#allocation19_spill] sm:$0xff]  ;;  %v2878_v18 = vld [vmem:[#allocation18_spill] sm:$0xff]  ;;  %s2167_s9 = scalar_lea.vmem %s1929_s11, %s1769_s8  ;;  %s1818_s14 = smov 125  }
  0x25   : >> { %v2863_v38 = vld [vmem:[#allocation38_spill] sm:$0xff]  ;;  %v2864_v37 = vld [vmem:[#allocation37_spill] sm:$0xff]  ;;  %v2880_v16 = vld [vmem:[#allocation16_spill] sm:$0xff]  ;;  %s1821_s15 = smov 124   ;;  %s1517_s16 = smul.u32 24, %s1812_s5 }
  0x26   : >> { %v2862_v39 = vld [vmem:[#allocation39_spill] sm:$0xff]  ;;  %v2879_v17 = vld [vmem:[#allocation17_spill] sm:$0xff]  ;;  %v2881_v7 = vld [vmem:[#allocation8_spill] sm:$0xff]  ;;  %s400_s5 = sadd.s32 1, %s1812_s5  }
  0x27   : >> { %v2882_v15 = vld [vmem:[#allocation15_spill] sm:$0xff]  ;;  %v2883_v14 = vld [vmem:[#allocation14_spill] sm:$0xff]  ;;  %v2884_v13 = vld [vmem:[#allocation13_spill] sm:$0xff]  ;;  %s1518_s18 = scalar_lea.vmem %s1951_s17, %s1517_s16  ;;  %p397_p4 = scmp.ge.s32.totalorder %s400_s5, 110  }
  0x28   : >> { %v2885_v1 = vld [vmem:[#allocation2_spill] sm:$0xff]  ;;  %v2886_v3 = vld [vmem:[#allocation4_spill] sm:$0xff]  ;;  %v2170_v54 = vld [vmem:[%s2167_s9 + $0x48] sm:$0xff] }
  0x29   : >> { %1313 = vperm.xlu0 %1796, %v2885_v1   ;;  %1323 = vperm.xlu1 %1797, %v2886_v3   ;;  %v424_v55 = vpack.c.bf16 %v2170_v54, %v2170_v54  ;;  %v2175_v56 = vld [vmem:[%s2167_s9 + $0x40] sm:$0xff]  ;;  %v2178_v57 = vld [vmem:[%s2167_s9 + $0x28] sm:$0xff]  ;;  %v414_v58 = vld [vmem:[%s2167_s9 + $0x38] sm:$0xff] }
  0x2a   : >> { %v2887_v2 = vld [vmem:[#allocation3_spill] sm:$0xff]  ;;  %v2183_v59 = vld [vmem:[%s2167_s9 + $0x20] sm:$0xff]  ;;  %v413_v60 = vld [vmem:[%s2167_s9 + $0x30] sm:$0xff]  ;;  %v423_v61 = vpack.c.bf16 %v2175_v56, %v2175_v56  ;;  %v2189_v62 = vpack.c.bf16 %v414_v58, %v2178_v57  ;;  %v903_v31 = vpack.c.bf16 %v2170_v54, %v414_v58  ;;  %v1681_v54 = vcombine.low %v2018_v45, %v2018_v45 }
  0x2b   : >> { %1667 = vmatprep.subr.msk.bf16.mxu0 %vm440_vm1, %v424_v55  ;;  %1672 = vmatprep.subr.msk.bf16.mxu1 %vm440_vm1, %v424_v55  ;;  %v408_v63 = vld [vmem:[%s2167_s9 + $0x8] sm:$0xff]  ;;  %v410_v0 = vld [vmem:[%s2167_s9 + $0x18] sm:$0xff]  ;;  %v421_v43 = vpack.c.bf16 %v413_v60, %v2183_v59  ;;  %v407_v53 = vld [vmem:[%s2167_s9] sm:$0xff] }
  0x2c   : >> { %v442_v8 = vsel %vm440_vm1, %v423_v61, 0  ;;  %v420_v49 = vpack.c.bf16 %v410_v0, %v408_v63  ;;  %v409_v1 = vld [vmem:[%s2167_s9 + $0x10] sm:$0xff]  ;;  %v2888_v5 = vld [vmem:[#allocation6_spill] sm:$0xff]  ;;  %v2889_v4 = vld [vmem:[#allocation5_spill] sm:$0xff] }
  0x2d   : >> { %1318 = vperm.xlu0 %1796, %v2887_v2   ;;  %458 = vmatpush1.bf16.msra.mxu0 %v442_v8  ;;  %v419_v2 = vpack.c.bf16 %v409_v1, %v407_v53  ;;  %v2203_v3 = vcombine.low %v2889_v4, %v2888_v5  ;;  %v2890_v10 = vld [vmem:[#allocation10_spill] sm:$0xff]  ;;  %v2891_v9 = vld [vmem:[#allocation9_spill] sm:$0xff]  ;;  %v2892_v53 = vmov 0   ;;  %v2893_v6 = vld [vmem:[#allocation7_spill] sm:$0xff] }
  0x2e   : >> { %529 = vmatpush1.bf16.msra.mxu1 %v442_v8  ;;  %459 = vmatprep.subr.bf16.mxu0 %v2189_v62  ;;  %v2207_v61 = vcombine.low %v2891_v9, %v2890_v10  ;;  %v1666_v63 = vcombine.low %v2893_v6, %v2893_v6  ;;  %v2894_v11 = vld [vmem:[#allocation11_spill] sm:$0xff]  ;;  %v418_v5 = vld [vmem:[%s2167_s9 + $0x58] sm:$0xff]  ;;  %v417_v10 = vld [vmem:[%s2167_s9 + $0x50] sm:$0xff] }
  0x2f   : >> { %530 = vmatprep.subr.bf16.mxu1 %v2189_v62  ;;  %v2223_v4 = vcombine.low %v2894_v11, %v2894_v11  ;;  %v905_v9 = vpack.c.bf16 %v418_v5, %v418_v5  ;;  %v904_v6 = vpack.c.bf16 %v417_v10, %v417_v10  ;;  %v2895_v25 = vld [vmem:[#allocation25_spill] sm:$0xff]  ;;  %v2896_v12 = vld [vmem:[#allocation12_spill] sm:$0xff]  ;;  %v2898_v35 = vld [vmem:[#allocation35_spill] sm:$0xff]  ;;  %v902_v10 = vpack.c.bf16 %v2175_v56, %v413_v60 }
  0x30   : >> { %v1675_v5 = vcombine.low %v2896_v12, %v2895_v25  ;;  %v2897_v40 = vld [vmem:[#allocation40_spill] sm:$0xff]  ;;  %v2899_v30 = vld [vmem:[#allocation30_spill] sm:$0xff]  ;;  %v900_v56 = vpack.c.bf16 %v2183_v59, %v409_v1  ;;  %v1686_v1 = vcombine.low %v2033_v48, %v2033_v48 }
  0x31   : >> { %460 = vmatpush1.bf16.msra.mxu0 %v421_v43  ;;  %v2238_v11 = vcombine.low %v2898_v35, %v2897_v40  ;;  %v907_v29 = vsel %vm440_vm1, %v904_v6, 0  ;;  %v1676_v6 = vcombine.low %v2899_v30, %v2899_v30 }
  0x32   : >> { %531 = vmatpush1.bf16.msra.mxu1 %v421_v43  ;;  %461 = vmatprep.subr.bf16.mxu0 %v420_v49 }
  0x33   : >> { %532 = vmatprep.subr.bf16.mxu1 %v420_v49 }
  0x35   : >> { %462 = vmatpush1.bf16.msra.mxu0 %v419_v2 }
  0x36   : >> { %533 = vmatpush1.bf16.msra.mxu1 %v419_v2  ;;  %1677 = vmatprep.subr.msk.bf16.mxu0 %vm440_vm1, %v424_v55 }
  0x37   : >> { %1682 = vmatprep.subr.msk.bf16.mxu1 %vm440_vm1, %v424_v55 }
  0x38   : >> { %1668 = vmatmul.mubr.msk.bf16.vlgmr.msra.gmra.mxu0 %vm433_vm10, %v2203_v3 }
  0x39   : >> { %1673 = vmatmul.mubr.msk.bf16.vlgmr.msra.gmra.mxu1 %vm433_vm10, %v2207_v61  ;;  %628 = vmatpush1.bf16.msra.mxu0 %v442_v8 }
  0x3a   : >> { %727 = vmatpush1.bf16.msra.mxu1 %v442_v8  ;;  %629 = vmatprep.subr.bf16.mxu0 %v2189_v62 }
  0x3b   : >> { %489 = vmatprep.mubr.bf16.mxu0 %v2892_v53  ;;  %560 = vmatprep.mubr.bf16.mxu1 %v2892_v53 }
  0x3c   : >> { %728 = vmatprep.subr.bf16.mxu1 %v2189_v62 }
  0x3d   : >> { %630 = vmatpush1.bf16.msra.mxu0 %v421_v43 }
  0x3e   : >> { %729 = vmatpush1.bf16.msra.mxu1 %v421_v43  ;;  %631 = vmatprep.subr.bf16.mxu0 %v420_v49 }
  0x3f   : >> { %730 = vmatprep.subr.bf16.mxu1 %v420_v49 }
  0x40   : >> { %1669 = vmatmul.mubr.msk.bf16.gmra.mxu0 %vm433_vm10, %v1666_v63 }
  0x41   : >> { %1674 = vmatmul.mubr.msk.bf16.gmra.mxu1 %vm433_vm10, %v2223_v4  ;;  %632 = vmatpush1.bf16.msra.mxu0 %v419_v2 }
  0x42   : >> { %731 = vmatpush1.bf16.msra.mxu1 %v419_v2  ;;  %649 = vmatprep.mubr.bf16.mxu0 %v2892_v53 }
  0x43   : >> { %748 = vmatprep.mubr.bf16.mxu1 %v2892_v53  ;;  %1687 = vmatprep.subr.msk.bf16.mxu0 %vm440_vm1, %v424_v55  ;;  %v901_v55 = vpack.c.bf16 %v2178_v57, %v410_v0  ;;  %v1685_v57 = vcombine.low %v2023_v46, %v2028_v47 }
  0x44   : >> { %1690 = vmatprep.subr.msk.bf16.mxu1 %vm440_vm1, %v905_v9 }
  0x48   : >> { %1678 = vmatmul.mubr.msk.bf16.vlgmr.msra.gmra.mxu0 %vm433_vm10, %v1675_v5 }
  0x49   : >> { %1683 = vmatmul.mubr.msk.bf16.vlgmr.msra.gmra.mxu1 %vm433_vm10, %v2238_v11  ;;  %826 = vmatpush1.bf16.msra.mxu0 %v442_v8 }
  0x4a   : >> { %923 = vmatpush1.bf16.msra.mxu1 %v907_v29  ;;  %659 = vmatprep.mubr.bf16.mxu0 %v2892_v53 }
  0x4b   : >> { %758 = vmatprep.mubr.bf16.mxu1 %v2892_v53  ;;  %827 = vmatprep.subr.bf16.mxu0 %v2189_v62 }
  0x4c   : >> { %924 = vmatprep.subr.bf16.mxu1 %v903_v31 }
  0x4d   : >> { %828 = vmatpush1.bf16.msra.mxu0 %v421_v43 }
  0x4e   : >> { %925 = vmatpush1.bf16.msra.mxu1 %v902_v10  ;;  %829 = vmatprep.subr.bf16.mxu0 %v420_v49 }
  0x4f   : >> { %926 = vmatprep.subr.bf16.mxu1 %v901_v55 }
  0x50   : >> { %1679 = vmatmul.mubr.msk.bf16.gmra.mxu0 %vm433_vm10, %v1676_v6 }
  0x51   : >> { %1684 = vmatmul.mubr.msk.bf16.gmra.mxu1 %vm433_vm10, %v1681_v54  ;;  %830 = vmatpush1.bf16.msra.mxu0 %v419_v2 }
  0x52   : >> { %927 = vmatpush1.bf16.msra.mxu1 %v900_v56  ;;  %847 = vmatprep.mubr.bf16.mxu0 %v2892_v53 }
  0x53   : >> { %944 = vmatprep.mubr.bf16.mxu1 %v2892_v53  ;;  %1693 = vmatprep.subr.msk.bf16.mxu0 %vm440_vm1, %v905_v9 }
  0x54   : >> { %1696 = vmatprep.subr.msk.bf16.mxu1 %vm440_vm1, %v905_v9 }
  0x58   : >> { %1688 = vmatmul.mubr.msk.bf16.vlgmr.msra.gmra.mxu0 %vm433_vm10, %v1685_v57 }
  0x59   : >> { %1691 = vmatmul.mubr.msk.bf16.vlgmr.msra.gmra.mxu1 %vm433_vm10, %v2203_v3  ;;  %980 = vmatpush1.bf16.msra.mxu0 %v907_v29 }
  0x5a   : >> { %1064 = vmatpush1.bf16.msra.mxu1 %v907_v29  ;;  %857 = vmatprep.mubr.bf16.mxu0 %v2892_v53 }
  0x5b   : >> { %954 = vmatprep.mubr.bf16.mxu1 %v2892_v53  ;;  %981 = vmatprep.subr.bf16.mxu0 %v903_v31 }
  0x5c   : >> { %1065 = vmatprep.subr.bf16.mxu1 %v903_v31 }
  0x5d   : >> { %982 = vmatpush1.bf16.msra.mxu0 %v902_v10 }
  0x5e   : >> { %1066 = vmatpush1.bf16.msra.mxu1 %v902_v10  ;;  %983 = vmatprep.subr.bf16.mxu0 %v901_v55 }
  0x5f   : >> { %1067 = vmatprep.subr.bf16.mxu1 %v901_v55 }
  0x60   : >> { %1689 = vmatmul.mubr.msk.bf16.gmra.mxu0 %vm433_vm10, %v1686_v1 }
  0x61   : >> { %1692 = vmatmul.mubr.msk.bf16.gmra.mxu1 %vm433_vm10, %v1666_v63  ;;  %984 = vmatpush1.bf16.msra.mxu0 %v900_v56 }
  0x62   : >> { %1068 = vmatpush1.bf16.msra.mxu1 %v900_v56  ;;  %1001 = vmatprep.mubr.bf16.mxu0 %v2892_v53 }
  0x63   : >> { %1085 = vmatprep.mubr.bf16.mxu1 %v2892_v53  ;;  %1699 = vmatprep.subr.msk.bf16.mxu0 %vm440_vm1, %v905_v9 }
  0x64   : >> { %1702 = vmatprep.subr.msk.bf16.mxu1 %vm440_vm1, %v905_v9 }
  0x68   : >> { %1694 = vmatmul.mubr.msk.bf16.vlgmr.msra.gmra.mxu0 %vm433_vm10, %v2207_v61 }
  0x69   : >> { %1697 = vmatmul.mubr.msk.bf16.vlgmr.msra.gmra.mxu1 %vm433_vm10, %v1675_v5  ;;  %1148 = vmatpush1.bf16.msra.mxu0 %v907_v29 }
  0x6a   : >> { %1011 = vmatprep.mubr.bf16.mxu0 %v2892_v53  ;;  %1149 = vmatprep.subr.bf16.mxu0 %v903_v31 }
  0x6b   : >> { %1095 = vmatprep.mubr.bf16.mxu1 %v2892_v53  ;;  %1232 = vmatpush1.bf16.msra.mxu1 %v907_v29 }
  0x6c   : >> { %1233 = vmatprep.subr.bf16.mxu1 %v903_v31 }
  0x6d   : >> { %1150 = vmatpush1.bf16.msra.mxu0 %v902_v10 }
  0x6e   : >> { %1151 = vmatprep.subr.bf16.mxu0 %v901_v55 }
  0x6f   : >> { %1234 = vmatpush1.bf16.msra.mxu1 %v902_v10 }
  0x70   : >> { %1695 = vmatmul.mubr.msk.bf16.gmra.mxu0 %vm433_vm10, %v2223_v4  ;;  %1235 = vmatprep.subr.bf16.mxu1 %v901_v55 }
  0x71   : >> { %1698 = vmatmul.mubr.msk.bf16.gmra.mxu1 %vm433_vm10, %v1676_v6  ;;  %1152 = vmatpush1.bf16.msra.mxu0 %v900_v56 }
  0x72   : >> { %1169 = vmatprep.mubr.bf16.mxu0 %v2892_v53  ;;  %1253 = vmatprep.mubr.bf16.mxu1 %v2892_v53 }
  0x73   : >> { %1236 = vmatpush1.bf16.msra.mxu1 %v900_v56 }
  0x78   : >> { %1700 = vmatmul.mubr.msk.bf16.vlgmr.msra.gmra.mxu0 %vm433_vm10, %v2238_v11 }
  0x79   : >> { %1703 = vmatmul.mubr.msk.bf16.vlgmr.msra.gmra.mxu1 %vm433_vm10, %v1685_v57  ;;  %1179 = vmatprep.mubr.bf16.mxu0 %v2892_v53 }
  0x7a   : >> { %1263 = vmatprep.mubr.bf16.mxu1 %v2892_v53 }
  0x80   : >> { %1701 = vmatmul.mubr.msk.bf16.gmra.mxu0 %vm433_vm10, %v1681_v54 }
  0x81   : >> { %1704 = vmatmul.mubr.msk.bf16.gmra.mxu1 %vm433_vm10, %v1686_v1  ;;  %vm2902_vm10 = vcmp.eq.s32.totalorder %v2873_v23, %v2094_v51 }
  0xf8   : >> { %v2293_v2 = vpop.f32.mrf.mxu0 }
  0xf9   : >> { %v552_v3 = vpop.f32.mrf.mxu1 }
  0xfa   : >> { %575 = vrot.lane.b32.xlu0 %v552_v3, %s1816_s10  ;;  %v2296_v4 = vpop.f32.mrf.mxu0 }
  0xfb   : >> { %v554_v9 = vpop.f32.mrf.mxu1 }
  0xfc   : >> { %v2298_v11 = vpop.f32.mrf.mxu0 }
  0xfd   : >> { %v556_v29 = vpop.f32.mrf.mxu1 }
  0xfe   : >> { %577 = vrot.lane.b32.xlu0 %v554_v9, %s1816_s10  ;;  %v2301_v31 = vpop.f32.mrf.mxu0 }
  0xff   : >> { %v558_v58 = vpop.f32.mrf.mxu1 }
 0x100   : >> { %581 = vrot.lane.b32.xlu1 %v558_v58, %s1816_s10  ;;  %v2304_v59 = vpop.f32.mrf.mxu0 }
 0x101   : >> { %v562_v60 = vpop.f32.mrf.mxu1 }
 0x102   : >> { %579 = vrot.lane.b32.xlu0 %v556_v29, %s1816_s10  ;;  %v2307_v62 = vpop.f32.mrf.mxu0 }
 0x103   : >> { %v564_v0 = vpop.f32.mrf.mxu1 }
 0x104   : >> { %585 = vrot.lane.b32.xlu1 %v564_v0, %s1816_s10  ;;  %v495_v8 = vpop.f32.mrf.mxu0 }
 0x105   : >> { %v566_v43 = vpop.f32.mrf.mxu1  ;;  %v1819_v8 = vmov 0.0  }
 0x106   : >> { %583 = vrot.lane.b32.xlu0 %v562_v60, %s1816_s10  ;;  %v496_v49 = vpop.f32.mrf.mxu0  ;;  %1351 = vmatprep.subr.mxu0 %v1819_v8 }
 0x107   : >> { %v567_v61 = vpop.f32.mrf.mxu1  ;;  %1434 = vmatprep.subr.mxu1 %v1819_v8 }
 0x108   : >> { %v651_v53 = vpop.f32.mrf.mxu0  ;;  %v2779_v61 = vmov 1.0  }
 0x109   : >> { %v750_v63 = vpop.f32.mrf.mxu1  ;;  %1705 = vmatpush1.msk.msra.mxu0 %vm219_vm15, %v2779_v61  ;;  %1736 = vmatpush1.msk.msra.mxu1 %vm304_vm7, %v2779_v61 }
 0x10a   : >> { %674 = vrot.lane.b32.xlu0 %v651_v53, %s1817_s13  ;;  %v653_v5 = vpop.f32.mrf.mxu0  ;;  %1353 = vmatprep.subr.mxu0 %v1819_v8 }
 0x10b   : >> { %v752_v10 = vpop.f32.mrf.mxu1  ;;  %676 = vrot.lane.b32.xlu1 %v653_v5, %s1817_s13  ;;  %1436 = vmatprep.subr.mxu1 %v1819_v8 }
 0x10c   : >> { %v655_v55 = vpop.f32.mrf.mxu0  ;;  %1706 = vmatpush1.msk.msra.mxu0 %vm218_vm14, %v2779_v61  ;;  %1737 = vmatpush1.msk.msra.mxu1 %vm303_vm5, %v2779_v61 }
 0x10d   : >> { %v754_v6 = vpop.f32.mrf.mxu1  ;;  %1355 = vmatprep.subr.mxu0 %v1819_v8  ;;  %1438 = vmatprep.subr.mxu1 %v1819_v8 }
 0x10e   : >> { %773 = vrot.lane.b32.xlu0 %v750_v63, %s1818_s14  ;;  %v657_v54 = vpop.f32.mrf.mxu0  ;;  %1707 = vmatpush1.msk.msra.mxu0 %vm217_vm13, %v2779_v61 }
 0x10f   : >> { %v756_v56 = vpop.f32.mrf.mxu1  ;;  %775 = vrot.lane.b32.xlu1 %v752_v10, %s1818_s14  ;;  %1738 = vmatpush1.msk.msra.mxu1 %vm2900_vm3, %v2779_v61  ;;  %vm2903_vm3 = vcmp.eq.s32.totalorder %v2874_v22, %v2013_v44 }
 0x110   : >> { %v661_v57 = vpop.f32.mrf.mxu0  ;;  %1357 = vmatprep.subr.mxu0 %v1819_v8  ;;  %1440 = vmatprep.subr.mxu1 %v1819_v8 }
 0x111   : >> { %v760_v1 = vpop.f32.mrf.mxu1  ;;  %1708 = vmatpush1.msk.msra.mxu0 %vm216_vm12, %v2779_v61  ;;  %1739 = vmatpush1.msk.msra.mxu1 %vm2901_vm4, %v2779_v61  ;;  %vm2904_vm4 = vcmp.eq.s32.totalorder %v2874_v22, %v2094_v51 }
 0x112   : >> { %777 = vrot.lane.b32.xlu0 %v754_v6, %s1818_s14  ;;  %v663_v3 = vpop.f32.mrf.mxu0  ;;  %1359 = vmatprep.subr.mxu0 %v1819_v8 }
 0x113   : >> { %v762_v9 = vpop.f32.mrf.mxu1  ;;  %678 = vrot.lane.b32.xlu1 %v655_v55, %s1817_s13  ;;  %1442 = vmatprep.subr.mxu1 %v1819_v8 }
 0x114   : >> { %v665_v29 = vpop.f32.mrf.mxu0  ;;  %1709 = vmatpush1.msk.msra.mxu0 %vm215_vm11, %v2779_v61  ;;  %1740 = vmatpush1.msk.msra.mxu1 %vm2902_vm10, %v2779_v61  ;;  %vm2905_vm10 = vcmp.eq.s32.totalorder %v2875_v21, %v2013_v44 }
 0x115   : >> { %v764_v58 = vpop.f32.mrf.mxu1  ;;  %1361 = vmatprep.subr.mxu0 %v1819_v8  ;;  %1444 = vmatprep.subr.mxu1 %v1819_v8 }
 0x116   : >> { %684 = vrot.lane.b32.xlu0 %v663_v3, %s1817_s13  ;;  %v666_v60 = vpop.f32.mrf.mxu0  ;;  %1710 = vmatpush1.msk.msra.mxu0 %vm2903_vm3, %v2779_v61  ;;  %vm2906_vm3 = vcmp.eq.s32.totalorder %v2875_v21, %v2094_v51 }
 0x117   : >> { %v765_v0 = vpop.f32.mrf.mxu1  ;;  %680 = vrot.lane.b32.xlu1 %v657_v54, %s1817_s13  ;;  %1741 = vmatpush1.msk.msra.mxu1 %vm2904_vm4, %v2779_v61  ;;  %vm2907_vm4 = vcmp.eq.s32.totalorder %v2876_v20, %v2013_v44 }
 0x118   : >> { %v849_v43 = vpop.f32.mrf.mxu0  ;;  %1363 = vmatprep.subr.mxu0 %v1819_v8  ;;  %1446 = vmatprep.subr.mxu1 %v1819_v8 }
 0x119   : >> { %v2320_v49 = vpop.f32.mrf.mxu1  ;;  %1711 = vmatpush1.msk.msra.mxu0 %vm2905_vm10, %v2779_v61  ;;  %1742 = vmatpush1.msk.msra.mxu1 %vm2906_vm3, %v2779_v61  ;;  %vm2908_vm10 = vcmp.eq.s32.totalorder %v2876_v20, %v2094_v51  ;;  %vm2909_vm3 = vcmp.eq.s32.totalorder %v2877_v19, %v2013_v44 }
 0x11a   : >> { %783 = vrot.lane.b32.xlu0 %v762_v9, %s1818_s14  ;;  %v851_v53 = vpop.f32.mrf.mxu0  ;;  %1365 = vmatprep.subr.mxu0 %v1819_v8 }
 0x11b   : >> { %v2332_v63 = vpop.f32.mrf.mxu1  ;;  %779 = vrot.lane.b32.xlu1 %v756_v56, %s1818_s14  ;;  %1448 = vmatprep.subr.mxu1 %v1819_v8 }
 0x11c   : >> { %v853_v5 = vpop.f32.mrf.mxu0  ;;  %1712 = vmatpush1.msk.msra.mxu0 %vm2907_vm4, %v2779_v61  ;;  %1743 = vmatpush1.msk.msra.mxu1 %vm2908_vm10, %v2779_v61  ;;  %vm2910_vm4 = vcmp.eq.s32.totalorder %v2877_v19, %v2094_v51  ;;  %vm2911_vm10 = vcmp.eq.s32.totalorder %v2878_v18, %v2013_v44 }
 0x11d   : >> { %v2341_v10 = vpop.f32.mrf.mxu1  ;;  %1367 = vmatprep.subr.mxu0 %v1819_v8  ;;  %1450 = vmatprep.subr.mxu1 %v1819_v8 }
 0x11e   : >> { %872 = vrot.lane.b32.xlu0 %v849_v43, %s1821_s15  ;;  %v855_v55 = vpop.f32.mrf.mxu0  ;;  %1713 = vmatpush1.msk.msra.mxu0 %vm2909_vm3, %v2779_v61  ;;  %vm2912_vm3 = vcmp.eq.s32.totalorder %v2878_v18, %v2094_v51 }
 0x11f   : >> { %v2350_v6 = vpop.f32.mrf.mxu1  ;;  %682 = vrot.lane.b32.xlu1 %v661_v57, %s1817_s13  ;;  %1744 = vmatpush1.msk.msra.mxu1 %vm2910_vm4, %v2779_v61  ;;  %vm2913_vm4 = vcmp.eq.s32.totalorder %v2879_v17, %v2013_v44 }
 0x120   : >> { %v859_v54 = vpop.f32.mrf.mxu0  ;;  %1369 = vmatprep.subr.mxu0 %v1819_v8  ;;  %1452 = vmatprep.subr.mxu1 %v1819_v8 }
 0x121   : >> { %v2362_v56 = vpop.f32.mrf.mxu1  ;;  %1714 = vmatpush1.msk.msra.mxu0 %vm2911_vm10, %v2779_v61  ;;  %1745 = vmatpush1.msk.msra.mxu1 %vm2912_vm3, %v2779_v61  ;;  %vm2914_vm10 = vcmp.eq.s32.totalorder %v2879_v17, %v2094_v51  ;;  %vm2915_vm3 = vcmp.eq.s32.totalorder %v2880_v16, %v2013_v44 }
 0x122   : >> { %878 = vrot.lane.b32.xlu0 %v855_v55, %s1821_s15  ;;  %v861_v57 = vpop.f32.mrf.mxu0  ;;  %1371 = vmatprep.subr.mxu0 %v1819_v8 }
 0x123   : >> { %v2374_v3 = vpop.f32.mrf.mxu1  ;;  %781 = vrot.lane.b32.xlu1 %v760_v1, %s1818_s14  ;;  %1454 = vmatprep.subr.mxu1 %v1819_v8 }
 0x124   : >> { %v863_v9 = vpop.f32.mrf.mxu0  ;;  %1715 = vmatpush1.msk.msra.mxu0 %vm2913_vm4, %v2779_v61  ;;  %1746 = vmatpush1.msk.msra.mxu1 %vm2914_vm10, %v2779_v61  ;;  %vm2916_vm4 = vcmp.eq.s32.totalorder %v2880_v16, %v2094_v51  ;;  %vm2917_vm10 = vcmp.eq.s32.totalorder %v2882_v15, %v2013_v44 }
 0x125   : >> { %v960_v29 = vpop.f32.mrf.mxu1  ;;  %1373 = vmatprep.subr.mxu0 %v1819_v8  ;;  %1456 = vmatprep.subr.mxu1 %v1819_v8 }
 0x126   : >> { %880 = vrot.lane.b32.xlu0 %v859_v54, %s1821_s15  ;;  %v864_v58 = vpop.f32.mrf.mxu0  ;;  %1716 = vmatpush1.msk.msra.mxu0 %vm2915_vm3, %v2779_v61  ;;  %vm2918_vm3 = vcmp.eq.s32.totalorder %v2882_v15, %v2094_v51 }
 0x127   : >> { %v961_v1 = vpop.f32.mrf.mxu1  ;;  %874 = vrot.lane.b32.xlu1 %v851_v53, %s1821_s15  ;;  %1747 = vmatpush1.msk.msra.mxu1 %vm2916_vm4, %v2779_v61  ;;  %vm2919_vm4 = vcmp.eq.s32.totalorder %v2883_v14, %v2013_v44 }
 0x128   : >> { %v1003_v60 = vpop.f32.mrf.mxu0  ;;  %1375 = vmatprep.subr.mxu0 %v1819_v8  ;;  %1458 = vmatprep.subr.mxu1 %v1819_v8 }
 0x129   : >> { %v1087_v0 = vpop.f32.mrf.mxu1  ;;  %1717 = vmatpush1.msk.msra.mxu0 %vm2917_vm10, %v2779_v61  ;;  %1748 = vmatpush1.msk.msra.mxu1 %vm2918_vm3, %v2779_v61  ;;  %vm2920_vm10 = vcmp.eq.s32.totalorder %v2883_v14, %v2094_v51  ;;  %vm2921_vm3 = vcmp.eq.s32.totalorder %v2884_v13, %v2013_v44 }
 0x12a   : >> { %1110 = vrot.lane.b32.xlu0 %v1087_v0, %s1817_s13  ;;  %v1005_v43 = vpop.f32.mrf.mxu0  ;;  %1377 = vmatprep.subr.mxu0 %v1819_v8 }
 0x12b   : >> { %v1089_v53 = vpop.f32.mrf.mxu1  ;;  %876 = vrot.lane.b32.xlu1 %v853_v5, %s1821_s15  ;;  %1460 = vmatprep.subr.mxu1 %v1819_v8 }
 0x12c   : >> { %v1007_v55 = vpop.f32.mrf.mxu0  ;;  %1718 = vmatpush1.msk.msra.mxu0 %vm2919_vm4, %v2779_v61  ;;  %1749 = vmatpush1.msk.msra.mxu1 %vm2920_vm10, %v2779_v61  ;;  %vm2922_vm4 = vcmp.eq.s32.totalorder %v2884_v13, %v2094_v51  ;;  %vm2923_vm10 = vcmp.eq.s32.totalorder %v2881_v7, %v2013_v44 }
 0x12d   : >> { %v1091_v54 = vpop.f32.mrf.mxu1  ;;  %1379 = vmatprep.subr.mxu0 %v1819_v8  ;;  %1462 = vmatprep.subr.mxu1 %v1819_v8 }
 0x12e   : >> { %1030 = vrot.lane.b32.xlu0 %v1007_v55, %s1816_s10  ;;  %v1009_v9 = vpop.f32.mrf.mxu0  ;;  %1719 = vmatpush1.msk.msra.mxu0 %vm2921_vm3, %v2779_v61  ;;  %vm2924_vm3 = vcmp.eq.s32.totalorder %v2881_v7, %v2094_v51  ;;  %v2925_v7 = vmov 1.0  }
 0x12f   : >> { %v1093_v5 = vpop.f32.mrf.mxu1  ;;  %882 = vrot.lane.b32.xlu1 %v861_v57, %s1821_s15  ;;  %1750 = vmatpush1.msk.msra.mxu1 %vm2922_vm4, %v2779_v61  ;;  %vm2926_vm4 = vcmp.eq.s32.totalorder %v2008_v42, %v2013_v44 }
 0x130   : >> { %v1013_v29 = vpop.f32.mrf.mxu0  ;;  %1381 = vmatprep.subr.mxu0 %v1819_v8  ;;  %1464 = vmatprep.subr.mxu1 %v1819_v8 }
 0x131   : >> { %v2434_v58 = vpop.f32.mrf.mxu1  ;;  %1720 = vmatpush1.msk.msra.mxu0 %vm2923_vm10, %v2779_v61  ;;  %1751 = vmatpush1.msk.msra.mxu1 %vm2924_vm3, %v2779_v61  ;;  %vm2929_vm10 = vcmp.eq.s32.totalorder %v2862_v39, %v2013_v44  ;;  %vm2930_vm3 = vcmp.eq.s32.totalorder %v2863_v38, %v2013_v44 }
 0x132   : >> { %1114 = vrot.lane.b32.xlu0 %v1091_v54, %s1817_s13  ;;  %v2446_v57 = vpop.f32.mrf.mxu0  ;;  %1391 = vmatprep.subr.mxu0 %v1819_v8 }
 0x133   : >> { %v1099_v1 = vpop.f32.mrf.mxu1  ;;  %1026 = vrot.lane.b32.xlu1 %v1003_v60, %s1816_s10  ;;  %1474 = vmatprep.subr.mxu1 %v1819_v8 }
 0x134   : >> { %v1017_v0 = vpop.f32.mrf.mxu0  ;;  %1721 = vmatpush2.msk.msra.mxu0 %vm440_vm1, %v2091_v50  ;;  %1752 = vmatpush2.msk.msra.mxu1 %vm440_vm1, %v2152_v52  ;;  %vm2927_vm1 = vcmp.eq.s32.totalorder %v2005_v41, %v2013_v44 }
 0x135   : >> { %v1101_v55 = vpop.f32.mrf.mxu1  ;;  %1393 = vmatprep.subr.mxu0 %v1819_v8  ;;  %1476 = vmatprep.subr.mxu1 %v1819_v8 }
 0x136   : >> { %1034 = vrot.lane.b32.xlu0 %v1013_v29, %s1816_s10  ;;  %v1018_v54 = vpop.f32.mrf.mxu0  ;;  %1722 = vmatpush2.msk.msra.mxu0 %vm2926_vm4, %v2925_v7  ;;  %vm2931_vm4 = vcmp.eq.s32.totalorder %v2864_v37, %v2013_v44 }
 0x137   : >> { %v1102_v60 = vpop.f32.mrf.mxu1  ;;  %1028 = vrot.lane.b32.xlu1 %v1005_v43, %s1816_s10  ;;  %1753 = vmatpush2.msk.msra.mxu1 %vm315_vm9, %v2925_v7 }
 0x138   : >> { %v1171_v0 = vpop.f32.mrf.mxu0  ;;  %1395 = vmatprep.subr.mxu0 %v1819_v8  ;;  %1478 = vmatprep.subr.mxu1 %v1819_v8 }
 0x139   : >> { %v1255_v29 = vpop.f32.mrf.mxu1  ;;  %1723 = vmatpush2.msk.msra.mxu0 %vm2927_vm1, %v2925_v7  ;;  %1754 = vmatpush2.msk.msra.mxu1 %vm2928_vm0, %v2925_v7  ;;  %vm2932_vm1 = vcmp.eq.s32.totalorder %v2865_v36, %v2013_v44  ;;  %vm1338_vm0 = vcmask 752640  }
 0x13a   : >> { %1120 = vrot.lane.b32.xlu0 %v1099_v1, %s1817_s13  ;;  %v1173_v55 = vpop.f32.mrf.mxu0  ;;  %1397 = vmatprep.subr.mxu0 %v1819_v8 }
 0x13b   : >> { %v1257_v43 = vpop.f32.mrf.mxu1  ;;  %1112 = vrot.lane.b32.xlu1 %v1089_v53, %s1817_s13  ;;  %1480 = vmatprep.subr.mxu1 %v1819_v8 }
 0x13c   : >> { %v1175_v54 = vpop.f32.mrf.mxu0  ;;  %1724 = vmatpush2.msk.msra.mxu0 %vm2929_vm10, %v2925_v7  ;;  %1755 = vmatpush2.msk.msra.mxu1 %vm313_vm8, %v2925_v7  ;;  %vm2933_vm10 = vcmp.eq.s32.totalorder %v2865_v36, %v2094_v51 }
 0x13d   : >> { %v2489_v1 = vpop.f32.mrf.mxu1  ;;  %1399 = vmatprep.subr.mxu0 %v1819_v8  ;;  %1482 = vmatprep.subr.mxu1 %v1819_v8 }
 0x13e   : >> { %1194 = vrot.lane.b32.xlu0 %v1171_v0, %s1818_s14  ;;  %v2498_v53 = vpop.f32.mrf.mxu0  ;;  %1725 = vmatpush2.msk.msra.mxu0 %vm2930_vm3, %v2925_v7  ;;  %vm2934_vm3 = vcmp.eq.s32.totalorder %v2866_v34, %v2013_v44 }
 0x13f   : >> { %v1261_v60 = vpop.f32.mrf.mxu1  ;;  %1032 = vrot.lane.b32.xlu1 %v1009_v9, %s1816_s10  ;;  %1756 = vmatpush2.msk.msra.mxu1 %vm312_vm6, %v2925_v7 }
 0x140   : >> { %v2510_v0 = vpop.f32.mrf.mxu0  ;;  %1401 = vmatprep.subr.mxu0 %v1819_v8  ;;  %1484 = vmatprep.subr.mxu1 %v1819_v8 }
 0x141   : >> { %v1265_v12 = vpop.f32.mrf.mxu1  ;;  %1726 = vmatpush2.msk.msra.mxu0 %vm2931_vm4, %v2925_v7  ;;  %1757 = vmatpush2.msk.msra.mxu1 %vm311_vm2, %v2925_v7  ;;  %vm2935_vm4 = vcmp.eq.s32.totalorder %v2866_v34, %v2094_v51 }
 0x142   : >> { %1278 = vrot.lane.b32.xlu0 %v1255_v29, %s1821_s15  ;;  %v1183_v9 = vpop.f32.mrf.mxu0  ;;  %1403 = vmatprep.subr.mxu0 %v1819_v8 }
 0x143   : >> { %v2522_v13 = vpop.f32.mrf.mxu1  ;;  %1116 = vrot.lane.b32.xlu1 %v1093_v5, %s1817_s13  ;;  %1486 = vmatprep.subr.mxu1 %v1819_v8  ;;  %v2663_v5 = vpop.permute.xlu1 %1323 }
 0x144   : >> { %v1185_v14 = vpop.f32.mrf.mxu0  ;;  %1727 = vmatpush2.msk.msra.mxu0 %vm2932_vm1, %v2925_v7  ;;  %1758 = vmatpush2.msk.msra.mxu1 %vm2933_vm10, %v2925_v7  ;;  %vm2936_vm1 = vcmp.eq.s32.totalorder %v2867_v33, %v2013_v44  ;;  %vm2937_vm10 = vcmp.eq.s32.totalorder %v2867_v33, %v2094_v51 }
 0x145   : >> { %v1269_v15 = vpop.f32.mrf.mxu1  ;;  %1405 = vmatprep.subr.mxu0 %v1819_v8  ;;  %1488 = vmatprep.subr.mxu1 %v1819_v8  ;;  %v2943_v14 = vld [vmem:[#allocation29_spill] sm:$0xff] }
 0x146   : >> { %1198 = vrot.lane.b32.xlu0 %v1175_v54, %s1818_s14  ;;  %v1186_v29 = vpop.f32.mrf.mxu0  ;;  %1728 = vmatpush2.msk.msra.mxu0 %vm2934_vm3, %v2925_v7  ;;  %vm2938_vm3 = vcmp.eq.s32.totalorder %v2868_v32, %v2013_v44  ;;  %v2653_v15 = vpop.permute.xlu0 %1313 }
 0x147   : >> { %v1270_v61 = vpop.f32.mrf.mxu1  ;;  %1118 = vrot.lane.b32.xlu1 %v2434_v58, %s1817_s13  ;;  %1759 = vmatpush2.msk.msra.mxu1 %vm2935_vm4, %v2925_v7  ;;  %vm2939_vm4 = vcmp.eq.s32.totalorder %v2868_v32, %v2094_v51 }
 0x148   : >> { %1407 = vmatprep.subr.mxu0 %v1819_v8  ;;  %1490 = vmatprep.subr.mxu1 %v1819_v8 }
 0x149   : >> { %1729 = vmatpush2.msk.msra.mxu0 %vm2936_vm1, %v2925_v7  ;;  %1760 = vmatpush2.msk.msra.mxu1 %vm2937_vm10, %v2925_v7 }
 0x14a   : >> { %1284 = vrot.lane.b32.xlu0 %v1261_v60, %s1821_s15  ;;  %1409 = vmatprep.subr.mxu0 %v1819_v8  ;;  %v2661_v61 = vpop.permute.xlu0 %1318 }
 0x14b   : >> { %1036 = vrot.lane.b32.xlu1 %v2446_v57, %s1816_s10  ;;  %1492 = vmatprep.subr.mxu1 %v1819_v8 }
 0x14c   : >> { %1730 = vmatpush2.msk.msra.mxu0 %vm2938_vm3, %v2925_v7  ;;  %1761 = vmatpush2.msk.msra.mxu1 %vm2939_vm4, %v2925_v7  ;;  %vm2944_vm3 = vcmp.eq.s32.totalorder %v2943_v14, %v2013_v44  ;;  %vm2945_vm4 = vcmp.eq.s32.totalorder %v2943_v14, %v2094_v51 }
 0x14d   : >> { %1411 = vmatprep.subr.mxu0 %v1819_v8  ;;  %1494 = vmatprep.subr.mxu1 %v1819_v8 }
 0x14e   : >> { %1204 = vrot.lane.b32.xlu0 %v1183_v9, %s1818_s14 }
 0x14f   : >> { %1196 = vrot.lane.b32.xlu1 %v1173_v55, %s1818_s14 }
 0x152   : >> { %1286 = vrot.lane.b32.xlu0 %v1265_v12, %s1821_s15  ;;  %v2940_v12 = vld [vmem:[#allocation31_spill] sm:$0xff] }
 0x153   : >> { %1280 = vrot.lane.b32.xlu1 %v1257_v43, %s1821_s15  ;;  %vm2941_vm1 = vcmp.eq.s32.totalorder %v2940_v12, %v2013_v44  ;;  %vm2942_vm10 = vcmp.eq.s32.totalorder %v2940_v12, %v2094_v51 }
 0x154   : >> { %1731 = vmatpush2.msk.msra.mxu0 %vm2941_vm1, %v2925_v7  ;;  %1762 = vmatpush2.msk.msra.mxu1 %vm2942_vm10, %v2925_v7  ;;  %vm587_vm1 = vcmask 1039360   ;;  %vm686_vm10 = vcmask 1031168  }
 0x155   : >> { %1413 = vmatprep.subr.mxu0 %v1819_v8  ;;  %1496 = vmatprep.subr.mxu1 %v1819_v8 }
 0x156   : >> { %1732 = vmatpush2.msk.msra.mxu0 %vm2944_vm3, %v2925_v7  ;;  %1763 = vmatpush2.msk.msra.mxu1 %vm2945_vm4, %v2925_v7  ;;  %vm785_vm3 = vcmask 1022976   ;;  %vm884_vm4 = vcmask 1014784  }
 0x157   : >> { %1282 = vrot.lane.b32.xlu1 %v2489_v1, %s1821_s15 }
 0x15b   : >> { %1200 = vrot.lane.b32.xlu1 %v2498_v53, %s1818_s14 }
 0x15f   : >> { %1202 = vrot.lane.b32.xlu1 %v2510_v0, %s1818_s14 }
 0x163   : >> { %1288 = vrot.lane.b32.xlu1 %v2522_v13, %s1821_s15 }
 0x16c   : >> { %v576_v8 = vpop.permute.xlu0 %575 }
 0x170   : >> { %v578_v58 = vpop.permute.xlu0 %577 }
 0x171   : >> { %v588_v53 = vsel %vm587_vm1, %v576_v8, %v578_v58  ;;  %v598_v9 = vadd.f32 %v578_v58, %v2296_v4 }
 0x172   : >> { %v582_v57 = vpop.permute.xlu1 %581  ;;  %v597_v60 = vadd.f32 %v588_v53, %v2293_v2 }
 0x173   : >> { %v600_v2 = vadd.f32 %v582_v57, %v2301_v31 }
 0x174   : >> { %v580_v55 = vpop.permute.xlu0 %579 }
 0x175   : >> { %v589_v43 = vsel %vm587_vm1, %v580_v55, %v582_v57 }
 0x176   : >> { %v2666_v54 = vpop.permute.xlu1 %585  ;;  %v599_v53 = vadd.f32 %v589_v43, %v2298_v11 }
 0x178   : >> { %v584_v1 = vpop.permute.xlu0 %583 }
 0x179   : >> { %v590_v7 = vsel %vm587_vm1, %v584_v1, %v2666_v54 }
 0x17c   : >> { %v675_v13 = vpop.permute.xlu0 %674 }
 0x17d   : >> { %v677_v0 = vpop.permute.xlu1 %676 }
 0x17e   : >> { %v687_v29 = vsel %vm686_vm10, %v675_v13, %v677_v0  ;;  %v697_v55 = vadd.f32 %v677_v0, %v598_v9  ;;  %v601_v9 = vadd.f32 %v590_v7, %v2304_v59 }
 0x17f   : >> { %v696_v12 = vadd.f32 %v687_v29, %v597_v60 }
 0x180   : >> { %v774_v14 = vpop.permute.xlu0 %773 }
 0x181   : >> { %v776_v16 = vpop.permute.xlu1 %775 }
 0x182   : >> { %v786_v17 = vsel %vm785_vm3, %v774_v14, %v776_v16  ;;  %v796_v18 = vadd.f32 %v776_v16, %v697_v55 }
 0x183   : >> { %v795_v1 = vadd.f32 %v786_v17, %v696_v12 }
 0x184   : >> { %v778_v19 = vpop.permute.xlu0 %777 }
 0x185   : >> { %v679_v8 = vpop.permute.xlu1 %678 }
 0x188   : >> { %v2675_v20 = vpop.permute.xlu0 %684 }
 0x189   : >> { %v681_v4 = vpop.permute.xlu1 %680 }
 0x18a   : >> { %v688_v58 = vsel %vm686_vm10, %v679_v8, %v681_v4  ;;  %v699_v13 = vadd.f32 %v681_v4, %v600_v2 }
 0x18b   : >> { %v698_v60 = vadd.f32 %v688_v58, %v599_v53 }
 0x18c   : >> { %v2680_v29 = vpop.permute.xlu0 %783 }
 0x18d   : >> { %v780_v0 = vpop.permute.xlu1 %779 }
 0x18e   : >> { %v787_v14 = vsel %vm785_vm3, %v778_v19, %v780_v0  ;;  %v2683_v16 = vadd.f32 %v780_v0, %v699_v13 }
 0x18f   : >> { %v2685_v17 = vadd.f32 %v787_v14, %v698_v60 }
 0x190   : >> { %v873_v12 = vpop.permute.xlu0 %872 }
 0x191   : >> { %v683_v31 = vpop.permute.xlu1 %682 }
 0x192   : >> { %v689_v11 = vsel %vm686_vm10, %v683_v31, %v2675_v20 }
 0x193   : >> { %v2690_v57 = vadd.f32 %v689_v11, %v601_v9 }
 0x194   : >> { %v2692_v43 = vpop.permute.xlu0 %878 }
 0x195   : >> { %v2694_v55 = vpop.permute.xlu1 %781 }
 0x198   : >> { %v2696_v8 = vpop.permute.xlu0 %880 }
 0x199   : >> { %v875_v19 = vpop.permute.xlu1 %874 }
 0x19a   : >> { %v885_v34 = vsel %vm884_vm4, %v873_v12, %v875_v19 }
 0x19c   : >> { %v1111_v2 = vpop.permute.xlu0 %1110 }
 0x19d   : >> { %v877_v53 = vpop.permute.xlu1 %876 }
 0x1a0   : >> { %v1031_v58 = vpop.permute.xlu0 %1030 }
 0x1a1   : >> { %v2698_v4 = vpop.permute.xlu1 %882 }
 0x1a4   : >> { %v1115_v59 = vpop.permute.xlu0 %1114 }
 0x1a5   : >> { %v1027_v13 = vpop.permute.xlu1 %1026 }
 0x1a8   : >> { %v1035_v60 = vpop.permute.xlu0 %1034 }
 0x1a9   : >> { %v1029_v7 = vpop.permute.xlu1 %1028 }
 0x1aa   : >> { %v1038_v23 = vsel %vm587_vm1, %v1027_v13, %v1029_v7  ;;  %v1048_v25 = vadd.f32 %v1029_v7, %v2332_v63  ;;  %v895_v13 = vadd.f32 %v875_v19, %v796_v18  ;;  %v894_v7 = vadd.f32 %v885_v34, %v795_v1 }
 0x1ab   : >> { %v1047_v27 = vadd.f32 %v1038_v23, %v2320_v49 }
 0x1ac   : >> { %v2700_v9 = vpop.permute.xlu0 %1120 }
 0x1ad   : >> { %v1113_v0 = vpop.permute.xlu1 %1112 }
 0x1ae   : >> { %v1122_v26 = vsel %vm686_vm10, %v1111_v2, %v1113_v0  ;;  %v1132_v30 = vadd.f32 %v1113_v0, %v1048_v25 }
 0x1af   : >> { %v1131_v33 = vadd.f32 %v1122_v26, %v1047_v27 }
 0x1b0   : >> { %v1195_v11 = vpop.permute.xlu0 %1194 }
 0x1b1   : >> { %v1033_v14 = vpop.permute.xlu1 %1032 }
 0x1b2   : >> { %v1039_v40 = vsel %vm587_vm1, %v1031_v58, %v1033_v14  ;;  %v1050_v0 = vadd.f32 %v1033_v14, %v2350_v6 }
 0x1b4   : >> { %v1279_v24 = vpop.permute.xlu0 %1278 }
 0x1b5   : >> { %v1117_v31 = vpop.permute.xlu1 %1116 }
 0x1b6   : >> { %v1123_v26 = vsel %vm686_vm10, %v1115_v59, %v1117_v31 }
 0x1b8   : >> { %v1199_v36 = vpop.permute.xlu0 %1198 }
 0x1b9   : >> { %v1119_v21 = vpop.permute.xlu1 %1118 }
 0x1bd   : >> { %v1037_v22 = vpop.permute.xlu1 %1036 }
 0x1c1   : >> { %v1197_v28 = vpop.permute.xlu1 %1196 }
 0x1c2   : >> { %v1206_v32 = vsel %vm785_vm3, %v1195_v11, %v1197_v28  ;;  %v1216_v35 = vadd.f32 %v1197_v28, %v1132_v30  ;;  %v1049_v28 = vadd.f32 %v1039_v40, %v2341_v10  ;;  %v1285_v30 = vpop.permute.xlu0 %1284  ;;  %v602_v40 = vadd.f32 %v2666_v54, %v2307_v62 }
 0x1c3   : >> { %v1215_v37 = vadd.f32 %v1206_v32, %v1131_v33  ;;  %v1040_v32 = vsel %vm587_vm1, %v1035_v60, %v1037_v22  ;;  %v1052_v33 = vadd.f32 %v1037_v22, %v2374_v3  ;;  %v897_v3 = vadd.f32 %v2692_v43, %v2683_v16 }
 0x1c4   : >> { %v1051_v10 = vadd.f32 %v1040_v32, %v2362_v56  ;;  %v701_v19 = vadd.f32 %v2675_v20, %v602_v40  ;;  %v788_v56 = vsel %vm785_vm3, %v2694_v55, %v2680_v29  ;;  %v1124_v54 = vsel %vm686_vm10, %v1119_v21, %v2700_v9 }
 0x1c5   : >> { %v1281_v38 = vpop.permute.xlu1 %1280  ;;  %v887_v20 = vsel %vm884_vm4, %v2696_v8, %v2698_v4  ;;  %vm1519_vm1 = vcmask 900096  }
 0x1c6   : >> { %v1290_v39 = vsel %vm884_vm4, %v1279_v24, %v1281_v38  ;;  %v1300_v63 = vadd.f32 %v1281_v38, %v1216_v35  ;;  %v1134_v24 = vadd.f32 %v1117_v31, %v1050_v0  ;;  %v1133_v35 = vadd.f32 %v1123_v26, %v1049_v28  ;;  %v1205_v58 = vpop.permute.xlu0 %1204 }
 0x1c7   : >> { %v1299_v2 = vadd.f32 %v1290_v39, %v1215_v37  ;;  %v886_v39 = vsel %vm884_vm4, %v877_v53, %v2692_v43  ;;  %v1135_v60 = vadd.f32 %v1124_v54, %v1051_v10  ;;  %v800_v31 = vadd.f32 %v2680_v29, %v701_v19 }
 0x1c8   : >> { %v1306_v23 = vmax.f32 %v895_v13, %v1300_v63  ;;  %v896_v53 = vadd.f32 %v886_v39, %v2685_v17  ;;  %v799_v13 = vadd.f32 %v788_v56, %v2690_v57 }
 0x1c9   : >> { %v1305_v49 = vmax.f32 %v894_v7, %v1299_v2  ;;  %v1283_v25 = vpop.permute.xlu1 %1282 }
 0x1ca   : >> { %v1327_v27 = vadd.f32 %v2653_v15, %v1306_v23  ;;  %v1287_v63 = vpop.permute.xlu0 %1286 }
 0x1cb   : >> { %v1326_v18 = vadd.f32 %v2653_v15, %v1305_v49  ;;  %v1136_v15 = vadd.f32 %v2700_v9, %v1052_v33  ;;  %v899_v9 = vadd.f32 %v2698_v4, %v800_v31  ;;  %v898_v49 = vadd.f32 %v887_v20, %v799_v13 }
 0x1cc   : >> { %v1333_v34 = vmax.f32 %v1327_v27, 0.0 }
 0x1cd   : >> { %v1332_v37 = vmax.f32 %v1326_v18, 0.0  ;;  %v1201_v38 = vpop.permute.xlu1 %1200  ;;  %v1220_v17 = vadd.f32 %v1205_v58, %v1136_v15 }
 0x1ce   : >> { %v1207_v6 = vsel %vm785_vm3, %v1199_v36, %v1201_v38  ;;  %v1218_v1 = vadd.f32 %v1201_v38, %v1134_v24  ;;  %1733 = vmatprep.mubr.msk.f32.mxu0 %vm1338_vm0, %v1333_v34  ;;  %1764 = vmatprep.mubr.msk.f32.mxu1 %vm1338_vm0, %v1333_v34  ;;  %v1291_v36 = vsel %vm884_vm4, %v1283_v25, %v1285_v30 }
 0x1cf   : >> { %v1217_v22 = vadd.f32 %v1207_v6, %v1133_v35  ;;  %1416 = vmatmul.mubr.f32.vlgmr.msra.gmra.mxu0 %v1332_v37  ;;  %1499 = vmatmul.mubr.f32.vlgmr.msra.gmra.mxu1 %v1332_v37 }
 0x1d0   : >> { %v1302_v12 = vadd.f32 %v1285_v30, %v1218_v1 }
 0x1d1   : >> { %v1301_v59 = vadd.f32 %v1291_v36, %v1217_v22  ;;  %v1203_v62 = vpop.permute.xlu1 %1202 }
 0x1d2   : >> { %v1308_v16 = vmax.f32 %v897_v3, %v1302_v12  ;;  %v1208_v43 = vsel %vm785_vm3, %v1203_v62, %v1205_v58 }
 0x1d3   : >> { %v1307_v14 = vmax.f32 %v896_v53, %v1301_v59  ;;  %v1219_v55 = vadd.f32 %v1208_v43, %v1135_v60 }
 0x1d4   : >> { %v1329_v11 = vadd.f32 %v2661_v61, %v1308_v16 }
 0x1d5   : >> { %v1289_v7 = vpop.permute.xlu1 %1288  ;;  %v1328_v21 = vadd.f32 %v2661_v61, %v1307_v14 }
 0x1d6   : >> { %v1292_v2 = vsel %vm884_vm4, %v1287_v63, %v1289_v7  ;;  %v1304_v23 = vadd.f32 %v1289_v7, %v1220_v17  ;;  %v1335_v29 = vmax.f32 %v1329_v11, 0.0 }
 0x1d7   : >> { %v1303_v25 = vadd.f32 %v1292_v2, %v1219_v55  ;;  %v1334_v8 = vmax.f32 %v1328_v21, 0.0 }
 0x1d8   : >> { %v1310_v0 = vmax.f32 %v899_v9, %v1304_v23  ;;  %1734 = vmatprep.mubr.msk.f32.mxu0 %vm1338_vm0, %v1335_v29  ;;  %1765 = vmatprep.mubr.msk.f32.mxu1 %vm1338_vm0, %v1335_v29 }
 0x1d9   : >> { %v1309_v57 = vmax.f32 %v898_v49, %v1303_v25  ;;  %1421 = vmatmul.mubr.f32.gmra.mxu0 %v1334_v8  ;;  %1504 = vmatmul.mubr.f32.gmra.mxu1 %v1334_v8 }
 0x1da   : >> { %v1331_v61 = vadd.f32 %v2663_v5, %v1310_v0 }
 0x1db   : >> { %v1330_v4 = vadd.f32 %v2663_v5, %v1309_v57 }
 0x1dc   : >> { %v1337_v26 = vmax.f32 %v1331_v61, 0.0 }
 0x1dd   : >> { %v1336_v27 = vmax.f32 %v1330_v4, 0.0 }
 0x1de   : >> { %1735 = vmatprep.mubr.msk.f32.mxu0 %vm1338_vm0, %v1337_v26  ;;  %1766 = vmatprep.mubr.msk.f32.mxu1 %vm1338_vm0, %v1337_v26 }
 0x1df   : >> { %1426 = vmatmul.mubr.f32.gmra.mxu0 %v1336_v27  ;;  %1509 = vmatmul.mubr.f32.gmra.mxu1 %v1336_v27 }
 0x28f   : >> { %v1417_v28 = vpop.f32.mrf.mxu0  ;;  %v1500_v30 = vpop.f32.mrf.mxu1 }
 0x290   : >> { %v1514_v18 = vmax.f32 %v1417_v28, %v1500_v30 }
 0x291   : >> { %v1419_v24 = vpop.f32.mrf.mxu0  ;;  %v1502_v32 = vpop.f32.mrf.mxu1 }
 0x292   : >> { %1520 = vst.msk [vmem:[%s1518_s18] sm:$0xff] %vm1519_vm1, %v1514_v18 }
 0x299   : >> { %v1422_v33 = vpop.f32.mrf.mxu0  ;;  %v1505_v5 = vpop.f32.mrf.mxu1 }
 0x29a   : >> { %v1515_v34 = vmax.f32 %v1422_v33, %v1505_v5 }
 0x29b   : >> { %v1424_v35 = vpop.f32.mrf.mxu0  ;;  %v1507_v37 = vpop.f32.mrf.mxu1 }
 0x29c   : >> { %1521 = vst.msk [vmem:[%s1518_s18 + $0x8] sm:$0xff] %vm1519_vm1, %v1515_v34 }
 0x29e   : > { %399 = sbr.rel (!%p397_p4) target bundleno = 33 (0x21), region = 75 }
 0x29f   : >> { %v1427_v38 = vpop.f32.mrf.mxu0  ;;  %v1510_v39 = vpop.f32.mrf.mxu1 }
 0x2a0   : >> { %v1516_v6 = vmax.f32 %v1427_v38, %v1510_v39 }
 0x2a1   : >> { %v1429_v1 = vpop.f32.mrf.mxu0  ;;  %v1512_v40 = vpop.f32.mrf.mxu1 }
 0x2a2   : >> { %1522 = vst.msk [vmem:[%s1518_s18 + $0x10] sm:$0xff] %vm1519_vm1, %v1516_v6 }
 0x2a3 PF: > { %s13_s12 = sadd.s32 1, %s1808_s12  }
 0x2a4   : > { %p10_p5 = scmp.ge.s32.totalorder %s13_s12, 4  }
 0x2a6   :  { %12 = sbr.rel (!%p10_p5) target bundleno = 1 (0x1), region = 86 }

// kernel: cnn_forward.4
= control target key start
LH: loop header
LB: loop body
LE: loop exit
PB: predicated region body
PF: predicated region fallthrough
CT: control target
= control target key end

     0   :  { %s2573_s12 = smov 0   ;;  %s3668_s0 = inlined_call_operand.vmem [shape: f32[2,2640,110], index: 0, kind: input, shape index: {}]   ;;  %s3669_s1 = inlined_call_operand.vmem [shape: bf16[5,56,120], index: 1, kind: input, shape index: {}]   ;;  %s3670_s2 = inlined_call_operand.vmem [shape: f32[56,1], index: 2, kind: input, shape index: {}]   ;;  %s3671_s3 = inlined_call_operand.vmem [shape: f32[2,53,50,53], index: 3, kind: output, shape index: {}]  }
   0x1 LB: > { %s1822_s13 = sadd.s32 4294967295, %s2538_s12   ;;  %p1826_p0 = scmp.ge.s32.totalorder %s2538_s12, 1  ;;  %s2538_s12 = sphi %s2573_s12, %s13_s12  }
   0x2   : > { %p137_p1 = scmp.lt.s32.totalorder %s2538_s12, 3 }
   0x4   : > { %p138_p2 = pnand %p1826_p0, %p137_p1 }
   0x5   : > { %p161_p3 = scmp.lt.s32.totalorder (!%p138_p2), %s1822_s13, 1  ;;  %s2907_s5 = smov (!%p138_p2), 0  }
   0x6   : > { %141 = sbr.rel (%p138_p2) target bundleno = 768 (0x300), region = 32 }
   0xb   : > { %v172_v0 = vlaneseq  ;;  %v2584_v1 = vld [vmem:[%s3670_s2] sm:$0xff]  ;;  %v2589_v2 = vld [vmem:[%s3670_s2 + $0x8] sm:$0xff]  ;;  %v2594_v3 = vld [vmem:[%s3670_s2 + $0x10] sm:$0xff]  ;;  %s3834_s13 = smov (!%p161_p3, %s1822_s13), 1  ;;  %v2544_v46 = vmov 0.0  }
   0xc   : > { %3717 = vst [vmem:[#allocation2_spill] sm:$0xff] %v2584_v1  ;;  %3718 = vst [vmem:[#allocation3_spill] sm:$0xff] %v2589_v2  ;;  %v2599_v4 = vld [vmem:[%s3670_s2 + $0x18] sm:$0xff]  ;;  %v2604_v5 = vld [vmem:[%s3670_s2 + $0x20] sm:$0xff]  ;;  %s2499_s9 = smul.u32 2640, %s3834_s13 }
   0xd   : > { %3719 = vst [vmem:[#allocation4_spill] sm:$0xff] %v2594_v3  ;;  %3720 = vst [vmem:[#allocation5_spill] sm:$0xff] %v2599_v4  ;;  %v2609_v6 = vld [vmem:[%s3670_s2 + $0x28] sm:$0xff]  ;;  %v2611_v7 = vshrl.u32 %v172_v0, 7  ;;  %v188_v8 = vand.u32 127, %v172_v0  ;;  %v2616_v9 = vld [vmem:[%s3670_s2 + $0x30] sm:$0xff] }
   0xe   : > { %3721 = vst [vmem:[#allocation6_spill] sm:$0xff] %v2604_v5  ;;  %3722 = vst [vmem:[#allocation7_spill] sm:$0xff] %v2609_v6  ;;  %v2621_v10 = vld [vmem:[%s3669_s1] sm:$0xf]  ;;  %v2626_v11 = vld [vmem:[%s3669_s1 + $0x4] sm:$0xf]  ;;  %s2665_s15 = scalar_lea.vmem %s3668_s0, %s2499_s9 }
   0xf   : > { %3723 = vst [vmem:[#allocation8_spill] sm:$0xff] %v2611_v7  ;;  %3724 = vst [vmem:[#allocation9_spill] sm:$0xff] %v2616_v9  ;;  %v2631_v12 = vld [vmem:[%s3669_s1 + $0x8] sm:$0xf]  ;;  %v2636_v13 = vld [vmem:[%s3669_s1 + $0xc] sm:$0xf] }
  0x10   : > { %3725 = vst [vmem:[#allocation10_spill] sm:$0xff] %v2621_v10  ;;  %3726 = vst [vmem:[#allocation11_spill] sm:$0xff] %v2626_v11  ;;  %v2639_v14 = vadd.s32 8, %v2611_v7  ;;  %v2642_v15 = vadd.s32 16, %v2611_v7  ;;  %v2645_v16 = vadd.s32 24, %v2611_v7  ;;  %v2648_v17 = vadd.s32 32, %v2611_v7 }
  0x11   : > { %3727 = vst [vmem:[#allocation12_spill] sm:$0xff] %v2631_v12  ;;  %3728 = vst [vmem:[#allocation13_spill] sm:$0xff] %v2636_v13  ;;  %s2500_s10 = smul.u32 2968, %s3834_s13  ;;  %v2651_v18 = vadd.s32 40, %v2611_v7  ;;  %v2654_v19 = vadd.s32 48, %v2611_v7  ;;  %v2657_v20 = vadd.s32 56, %v2611_v7 }
  0x12   : > { %3729 = vst [vmem:[#allocation14_spill] sm:$0xff] %v2639_v14  ;;  %3730 = vst [vmem:[#allocation15_spill] sm:$0xff] %v2642_v15  ;;  %v2660_v21 = vadd.s32 64, %v2611_v7  ;;  %v2668_v22 = vadd.s32 72, %v2611_v7  ;;  %v2671_v23 = vadd.s32 80, %v2611_v7  ;;  %v2674_v24 = vadd.s32 88, %v2611_v7 }
  0x13   : > { %3731 = vst [vmem:[#allocation16_spill] sm:$0xff] %v2645_v16  ;;  %3732 = vst [vmem:[#allocation17_spill] sm:$0xff] %v2648_v17  ;;  %v2677_v25 = vadd.s32 96, %v2611_v7  ;;  %v2682_v26 = vld [vmem:[%s3669_s1 + $0x10] sm:$0xf]  ;;  %s2687_s19 = scalar_lea.vmem %s3671_s3, %s2500_s10  ;;  %v2690_v27 = vadd.s32 104, %v2611_v7 }
  0x14   : > { %3733 = vst [vmem:[#allocation18_spill] sm:$0xff] %v2651_v18  ;;  %3734 = vst [vmem:[#allocation19_spill] sm:$0xff] %v2654_v19  ;;  %v2692_v28 = vmul.u32 2, %v188_v8  ;;  %v2697_v29 = vld [vmem:[%s3669_s1 + $0x14] sm:$0xf] }
  0x15   : > { %3735 = vst [vmem:[#allocation20_spill] sm:$0xff] %v2657_v20  ;;  %3736 = vst [vmem:[#allocation21_spill] sm:$0xff] %v2660_v21  ;;  %v2702_v30 = vld [vmem:[%s3669_s1 + $0x18] sm:$0xf]  ;;  %v2707_v31 = vld [vmem:[%s3669_s1 + $0x1c] sm:$0xf] }
  0x16   : > { %3737 = vst [vmem:[#allocation22_spill] sm:$0xff] %v2668_v22  ;;  %3738 = vst [vmem:[#allocation23_spill] sm:$0xff] %v2671_v23  ;;  %v2712_v32 = vld [vmem:[%s3669_s1 + $0x20] sm:$0xf]  ;;  %v2717_v33 = vld [vmem:[%s3669_s1 + $0x24] sm:$0xf]  ;;  %vm196_vm6 = vcmp.eq.s32.totalorder %v2654_v19, %v2692_v28  ;;  %vm197_vm7 = vcmp.eq.s32.totalorder %v2657_v20, %v2692_v28  ;;  %vm198_vm8 = vcmp.eq.s32.totalorder %v2660_v21, %v2692_v28 }
  0x17   : > { %3739 = vst [vmem:[#allocation24_spill] sm:$0xff] %v2674_v24  ;;  %3740 = vst [vmem:[#allocation25_spill] sm:$0xff] %v2677_v25  ;;  %v2730_v34 = vld [vmem:[%s3669_s1 + $0x28] sm:$0xf]  ;;  %v2735_v35 = vld [vmem:[%s3669_s1 + $0x2c] sm:$0xf]  ;;  %vm199_vm9 = vcmp.eq.s32.totalorder %v2668_v22, %v2692_v28  ;;  %vm200_vm10 = vcmp.eq.s32.totalorder %v2671_v23, %v2692_v28  ;;  %vm201_vm11 = vcmp.eq.s32.totalorder %v2674_v24, %v2692_v28 }
  0x18   : > { %3741 = vst [vmem:[#allocation26_spill] sm:$0xff] %v2682_v26  ;;  %3742 = vst [vmem:[#allocation27_spill] sm:$0xff] %v2692_v28  ;;  %v2740_v36 = vld [vmem:[%s3669_s1 + $0x30] sm:$0xf]  ;;  %v2753_v37 = vld [vmem:[%s3669_s1 + $0x34] sm:$0xf]  ;;  %vm202_vm12 = vcmp.eq.s32.totalorder %v2677_v25, %v2692_v28  ;;  %vm203_vm13 = vcmp.eq.s32.totalorder %v2690_v27, %v2692_v28 }
  0x19   : > { %3743 = vst [vmem:[#allocation28_spill] sm:$0xff] %v2697_v29  ;;  %3744 = vst [vmem:[#allocation29_spill] sm:$0xff] %v2702_v30  ;;  %v2758_v38 = vld [vmem:[%s3669_s1 + $0x38] sm:$0xf]  ;;  %v2763_v39 = vld [vmem:[%s3669_s1 + $0x3c] sm:$0xf] }
  0x1a   : > { %3745 = vst [vmem:[#allocation30_spill] sm:$0xff] %v2707_v31  ;;  %3746 = vst [vmem:[#allocation31_spill] sm:$0xff] %v2712_v32  ;;  %v2776_v40 = vld [vmem:[%s3669_s1 + $0x40] sm:$0xf]  ;;  %v2781_v41 = vld [vmem:[%s3669_s1 + $0x44] sm:$0xf] }
  0x1b   : > { %3747 = vst [vmem:[#allocation32_spill] sm:$0xff] %v2717_v33  ;;  %3748 = vst [vmem:[#allocation33_spill] sm:$0xff] %v2730_v34  ;;  %v2786_v42 = vld [vmem:[%s3669_s1 + $0x48] sm:$0xf]  ;;  %v2793_v43 = vadd.s32 1, %v2692_v28  ;;  %v2805_v47 = vsel %vm203_vm13, 1.0, %v2544_v46 }
  0x1c   : > { %3749 = vst [vmem:[#allocation34_spill] sm:$0xff] %v2735_v35  ;;  %3750 = vst [vmem:[#allocation35_spill] sm:$0xff] %v2740_v36  ;;  %v2798_v44 = vld [vmem:[%s3669_s1 + $0x4c] sm:$0xf]  ;;  %v2803_v45 = vld [vmem:[%s3669_s1 + $0x50] sm:$0xf] }
  0x1d   : > { %3751 = vst [vmem:[#allocation36_spill] sm:$0xff] %v2753_v37  ;;  %3752 = vst [vmem:[#allocation37_spill] sm:$0xff] %v2758_v38  ;;  %v2810_v48 = vld [vmem:[%s3669_s1 + $0x54] sm:$0xf]  ;;  %v2815_v49 = vld [vmem:[%s3669_s1 + $0x58] sm:$0xf]  ;;  %vm239_vm1 = vcmp.eq.s32.totalorder %v2654_v19, %v2793_v43  ;;  %vm240_vm13 = vcmp.eq.s32.totalorder %v2657_v20, %v2793_v43  ;;  %vm241_vm2 = vcmp.eq.s32.totalorder %v2660_v21, %v2793_v43 }
  0x1e   : > { %3753 = vst [vmem:[#allocation38_spill] sm:$0xff] %v2763_v39  ;;  %3754 = vst [vmem:[#allocation39_spill] sm:$0xff] %v2776_v40  ;;  %v2828_v50 = vld [vmem:[%s3669_s1 + $0x5c] sm:$0xf]  ;;  %v2833_v51 = vld [vmem:[%s3669_s1 + $0x60] sm:$0xf]  ;;  %vm243_vm3 = vcmp.eq.s32.totalorder %v2671_v23, %v2793_v43  ;;  %vm244_vm14 = vcmp.eq.s32.totalorder %v2674_v24, %v2793_v43  ;;  %vm245_vm4 = vcmp.eq.s32.totalorder %v2677_v25, %v2793_v43 }
  0x1f   : > { %3755 = vst [vmem:[#allocation40_spill] sm:$0xff] %v2781_v41  ;;  %3756 = vst [vmem:[#allocation41_spill] sm:$0xff] %v2786_v42  ;;  %v2838_v52 = vld [vmem:[%s3669_s1 + $0x64] sm:$0xf]  ;;  %v2851_v53 = vld [vmem:[%s3669_s1 + $0x68] sm:$0xf]  ;;  %vm246_vm15 = vcmp.eq.s32.totalorder %v2690_v27, %v2793_v43 }
  0x20   : > { %3757 = vst [vmem:[#allocation42_spill] sm:$0xff] %v2793_v43  ;;  %3758 = vst [vmem:[#allocation43_spill] sm:$0xff] %v2798_v44  ;;  %v2856_v54 = vld [vmem:[%s3669_s1 + $0x6c] sm:$0xf]  ;;  %v2861_v55 = vld [vmem:[%s3669_s1 + $0x70] sm:$0xf] }
  0x21   : > { %3759 = vst [vmem:[#allocation44_spill] sm:$0xff] %v2803_v45  ;;  %3760 = vst [vmem:[#allocation45_spill] sm:$0xff] %v2805_v47  ;;  %v2874_v56 = vld [vmem:[%s3669_s1 + $0x74] sm:$0xf]  ;;  %v2879_v57 = vld [vmem:[%s3669_s1 + $0x78] sm:$0xf] }
  0x22   : > { %3761 = vst [vmem:[#allocation46_spill] sm:$0xff] %v2810_v48  ;;  %3762 = vst [vmem:[#allocation47_spill] sm:$0xff] %v2815_v49  ;;  %v2884_v58 = vld [vmem:[%s3669_s1 + $0x7c] sm:$0xf]  ;;  %v2893_v59 = vld [vmem:[%s3669_s1 + $0x80] sm:$0xf] }
  0x23   : > { %3763 = vst [vmem:[#allocation48_spill] sm:$0xff] %v2828_v50  ;;  %3764 = vst [vmem:[#allocation49_spill] sm:$0xff] %v2833_v51  ;;  %v2898_v60 = vld [vmem:[%s3669_s1 + $0x84] sm:$0xf]  ;;  %v2903_v61 = vld [vmem:[%s3669_s1 + $0x88] sm:$0xf] }
  0x24   : > { %3765 = vst [vmem:[#allocation50_spill] sm:$0xff] %v2838_v52  ;;  %3766 = vst [vmem:[#allocation51_spill] sm:$0xff] %v2851_v53  ;;  %v2905_v62 = vsel %vm246_vm15, 1.0, %v2544_v46 }
  0x25   : > { %3767 = vst [vmem:[#allocation52_spill] sm:$0xff] %v2856_v54 }
  0x26 LB: >> { %v3768_v28 = vld [vmem:[#allocation27_spill] sm:$0xff]  ;;  %v3771_v10 = vld [vmem:[#allocation10_spill] sm:$0xff]  ;;  %vm373_vm5 = vcmask 982016   ;;  %s327_s6 = smul.u32 48, %s2542_s5  ;;  %vm386_vm15 = vcmask 1043456   ;;  %v3774_v13 = vld [vmem:[#allocation13_spill] sm:$0xff]  ;;  %s2542_s5 = sphi %s2907_s5, %s326_s5  }
  0x27   : >> { %v3770_v11 = vld [vmem:[#allocation11_spill] sm:$0xff]  ;;  %v3773_v31 = vld [vmem:[#allocation30_spill] sm:$0xff]  ;;  %v3775_v12 = vld [vmem:[#allocation12_spill] sm:$0xff]  ;;  %s2546_s8 = smov 127   ;;  %s2547_s9 = smov 125  }
  0x28   : >> { %v2914_v63 = vcombine.low %v3771_v10, %v3770_v11  ;;  %v3772_v32 = vld [vmem:[#allocation31_spill] sm:$0xff]  ;;  %s2926_s7 = scalar_lea.vmem %s2665_s15, %s327_s6  ;;  %v3776_v34 = vld [vmem:[#allocation33_spill] sm:$0xff]  ;;  %v3777_v33 = vld [vmem:[#allocation32_spill] sm:$0xff]  ;;  %s2548_s10 = smov 126  }
  0x29   : >> { %v2918_v0 = vcombine.low %v3773_v31, %v3772_v32  ;;  %v332_v8 = vld [vmem:[%s2926_s7 + $0x18] sm:$0xff]  ;;  %v333_v27 = vld [vmem:[%s2926_s7 + $0x20] sm:$0xff]  ;;  %v334_v46 = vld [vmem:[%s2926_s7 + $0x28] sm:$0xff]  ;;  %s2549_s11 = smov 124   ;;  %s1747_s14 = smul.u32 56, %s2542_s5 }
  0x2a   : >> { %2167 = vmatprep.mubr.msk.bf16.mxu0 %vm373_vm5, %v2914_v63  ;;  %v335_v10 = vld [vmem:[%s2926_s7 + $0x30] sm:$0xff]  ;;  %v336_v11 = vld [vmem:[%s2926_s7 + $0x38] sm:$0xff]  ;;  %v2933_v31 = vpack.c.bf16 %v333_v27, %v332_v8  ;;  %v337_v32 = vld [vmem:[%s2926_s7 + $0x40] sm:$0xff]  ;;  %s326_s5 = sadd.s32 1, %s2542_s5  }
  0x2b   : >> { %2191 = vmatprep.mubr.msk.bf16.mxu1 %vm373_vm5, %v2918_v0  ;;  %v338_v9 = vld [vmem:[%s2926_s7 + $0x48] sm:$0xff]  ;;  %v339_v7 = vld [vmem:[%s2926_s7 + $0x50] sm:$0xff]  ;;  %v2938_v14 = vpack.c.bf16 %v335_v10, %v334_v46  ;;  %v340_v15 = vld [vmem:[%s2926_s7 + $0x58] sm:$0xff]  ;;  %v2943_v18 = vpack.c.bf16 %v337_v32, %v336_v11  ;;  %s3647_s13 = scalar_lea.vmem %s2687_s19, %s1747_s14  ;;  %p323_p4 = scmp.ge.s32.totalorder %s326_s5, 53  }
  0x2c   : >> { %v341_v16 = vld [vmem:[%s2926_s7 + $0x60] sm:$0xff]  ;;  %v342_v17 = vld [vmem:[%s2926_s7 + $0x68] sm:$0xff]  ;;  %v2945_v19 = vpack.c.bf16 %v339_v7, %v338_v9  ;;  %v343_v20 = vld [vmem:[%s2926_s7 + $0x70] sm:$0xff] }
  0x2d   : >> { %v2948_v21 = vpack.c.bf16 %v341_v16, %v340_v15  ;;  %v2950_v22 = vpack.c.bf16 %v342_v17, %v341_v16  ;;  %v2952_v23 = vpack.c.bf16 %v343_v20, %v343_v20  ;;  %v2954_v24 = vpack.c.bf16 %v343_v20, %v342_v17  ;;  %v330_v20 = vld [vmem:[%s2926_s7 + $0x8] sm:$0xff]  ;;  %v3779_v35 = vld [vmem:[#allocation34_spill] sm:$0xff]  ;;  %v3780_v29 = vld [vmem:[#allocation28_spill] sm:$0xff] }
  0x2e   : >> { %v2966_v16 = vpack.c.bf16 %v340_v15, %v339_v7  ;;  %v2972_v17 = vpack.c.bf16 %v338_v9, %v337_v32  ;;  %v2978_v7 = vpack.c.bf16 %v336_v11, %v335_v10  ;;  %v2984_v9 = vpack.c.bf16 %v334_v46, %v333_v27  ;;  %v331_v15 = vld [vmem:[%s2926_s7 + $0x10] sm:$0xff]  ;;  %v329_v11 = vld [vmem:[%s2926_s7] sm:$0xff]  ;;  %v3778_v36 = vld [vmem:[#allocation35_spill] sm:$0xff] }
  0x2f   : >> { %2489 = vmatprep.subr.msk.bf16.mxu0 %vm386_vm15, %v2952_v23  ;;  %2490 = vmatprep.subr.msk.bf16.mxu1 %vm386_vm15, %v2952_v23  ;;  %v2962_v43 = vsel %vm386_vm15, %v2952_v23, 0  ;;  %v2991_v10 = vpack.c.bf16 %v332_v8, %v331_v15  ;;  %v3001_v32 = vpack.c.bf16 %v330_v20, %v329_v11  ;;  %v3009_v8 = vcombine.low %v3775_v12, %v3774_v13  ;;  %v3781_v26 = vld [vmem:[#allocation26_spill] sm:$0xff]  ;;  %v3782_v37 = vld [vmem:[#allocation36_spill] sm:$0xff]  ;;  %v3783_v30 = vld [vmem:[#allocation29_spill] sm:$0xff] }
  0x30   : >> { %2152 = vmatpush3.bf16.msra.mxu0 %v2962_v43  ;;  %2176 = vmatpush3.bf16.msra.mxu1 %v2962_v43  ;;  %v3013_v27 = vcombine.low %v3777_v33, %v3776_v34  ;;  %v3023_v46 = vcombine.low %v3779_v35, %v3778_v36  ;;  %v3027_v15 = vcombine.low %v3781_v26, %v3780_v29  ;;  %v3784_v39 = vld [vmem:[#allocation38_spill] sm:$0xff]  ;;  %v3785_v38 = vld [vmem:[#allocation37_spill] sm:$0xff]  ;;  %v3786_v49 = vld [vmem:[#allocation47_spill] sm:$0xff]  ;;  %v2545_v26 = vmov 0  }
  0x31   : >> { %2153 = vmatprep.subr.bf16.mxu0 %v2950_v22  ;;  %2177 = vmatprep.subr.bf16.mxu1 %v2950_v22  ;;  %v3043_v11 = vcombine.low %v3782_v37, %v3782_v37  ;;  %v3047_v20 = vcombine.low %v3783_v30, %v3783_v30  ;;  %v3055_v12 = vcombine.low %v3785_v38, %v3784_v39  ;;  %v3787_v48 = vld [vmem:[#allocation46_spill] sm:$0xff]  ;;  %v3789_v3 = vld [vmem:[#allocation4_spill] sm:$0xff]  ;;  %v3790_v2 = vld [vmem:[#allocation3_spill] sm:$0xff] }
  0x32   : >> { %v3059_v13 = vcombine.low %v3787_v48, %v3786_v49  ;;  %2526 = vset.pattern.permute.xlu0 %v2545_v26  ;;  %2527 = vset.pattern.permute.xlu1 %v2545_v26  ;;  %v3788_v1 = vld [vmem:[#allocation2_spill] sm:$0xff]  ;;  %v346_v26 = vld [vmem:[%s2926_s7 + $0x88] sm:$0xff]  ;;  %v3792_v4 = vld [vmem:[#allocation5_spill] sm:$0xff] }
  0x33   : >> { %1464 = vperm.xlu0 %2526, %v3788_v1   ;;  %1474 = vperm.xlu1 %2527, %v3789_v3   ;;  %v3791_v5 = vld [vmem:[#allocation6_spill] sm:$0xff]  ;;  %v3095_v1 = vpack.c.bf16 %v346_v26, %v346_v26  ;;  %v3793_v6 = vld [vmem:[#allocation7_spill] sm:$0xff]  ;;  %v3794_v41 = vld [vmem:[#allocation40_spill] sm:$0xff] }
  0x34   : >> { %2154 = vmatpush3.bf16.msra.mxu0 %v2950_v22  ;;  %2178 = vmatpush3.bf16.msra.mxu1 %v2950_v22  ;;  %v345_v3 = vld [vmem:[%s2926_s7 + $0x80] sm:$0xff]  ;;  %v3795_v40 = vld [vmem:[#allocation39_spill] sm:$0xff]  ;;  %v3796_v51 = vld [vmem:[#allocation49_spill] sm:$0xff] }
  0x35   : >> { %2155 = vmatprep.subr.bf16.mxu0 %v2966_v16  ;;  %2179 = vmatprep.subr.bf16.mxu1 %v2966_v16  ;;  %v3797_v50 = vld [vmem:[#allocation48_spill] sm:$0xff]  ;;  %v3116_v26 = vsel %vm386_vm15, %v3095_v1, 0  ;;  %v3798_v44 = vld [vmem:[#allocation43_spill] sm:$0xff]  ;;  %v3799_v42 = vld [vmem:[#allocation41_spill] sm:$0xff] }
  0x36   : >> { %v3122_v29 = vcombine.low %v3799_v42, %v3798_v44  ;;  %v3800_v53 = vld [vmem:[#allocation51_spill] sm:$0xff]  ;;  %v3801_v52 = vld [vmem:[#allocation50_spill] sm:$0xff]  ;;  %v3802_v45 = vld [vmem:[#allocation44_spill] sm:$0xff] }
  0x37   : >> { %1469 = vperm.xlu0 %2526, %v3790_v2   ;;  %1484 = vperm.xlu1 %2527, %v3791_v5   ;;  %v344_v2 = vld [vmem:[%s2926_s7 + $0x78] sm:$0xff]  ;;  %v3102_v5 = vcombine.low %v3795_v40, %v3794_v41  ;;  %v3126_v30 = vcombine.low %v3801_v52, %v3800_v53  ;;  %v3803_v54 = vld [vmem:[#allocation52_spill] sm:$0xff]  ;;  %v3825_v36 = vld [vmem:[#allocation14_spill] sm:$0xff] }
  0x38   : >> { %2156 = vmatpush3.bf16.msra.mxu0 %v2966_v16  ;;  %2180 = vmatpush3.bf16.msra.mxu1 %v2966_v16  ;;  %v3804_v47 = vld [vmem:[#allocation45_spill] sm:$0xff]  ;;  %v3828_v39 = vld [vmem:[#allocation8_spill] sm:$0xff] }
  0x39   : >> { %2157 = vmatprep.subr.bf16.mxu0 %v2972_v17  ;;  %2181 = vmatprep.subr.bf16.mxu1 %v2972_v17 }
  0x3b   : >> { %1479 = vperm.xlu0 %2526, %v3792_v4   ;;  %v3106_v4 = vcombine.low %v3797_v50, %v3796_v51 }
  0x3c   : >> { %2158 = vmatpush3.bf16.msra.mxu0 %v2972_v17  ;;  %2182 = vmatpush3.bf16.msra.mxu1 %v2972_v17 }
  0x3d   : >> { %2159 = vmatprep.subr.bf16.mxu0 %v2978_v7  ;;  %2183 = vmatprep.subr.bf16.mxu1 %v2978_v7 }
  0x3f   : >> { %1489 = vperm.xlu0 %2526, %v3793_v6   ;;  %v3118_v6 = vpack.c.bf16 %v345_v3, %v344_v2  ;;  %v3142_v2 = vcombine.low %v3802_v45, %v3802_v45  ;;  %v3146_v3 = vcombine.low %v3803_v54, %v3803_v54 }
  0x40   : >> { %2160 = vmatpush3.bf16.msra.mxu0 %v2978_v7  ;;  %2184 = vmatpush3.bf16.msra.mxu1 %v2978_v7 }
  0x41   : >> { %2161 = vmatprep.subr.bf16.mxu0 %v2984_v9  ;;  %2185 = vmatprep.subr.bf16.mxu1 %v2984_v9 }
  0x44   : >> { %2162 = vmatpush3.bf16.msra.mxu0 %v2984_v9  ;;  %2186 = vmatpush3.bf16.msra.mxu1 %v2984_v9 }
  0x45   : >> { %2163 = vmatprep.subr.bf16.mxu0 %v2991_v10  ;;  %2187 = vmatprep.subr.bf16.mxu1 %v2991_v10 }
  0x48   : >> { %2164 = vmatpush3.bf16.msra.mxu0 %v2991_v10  ;;  %2188 = vmatpush3.bf16.msra.mxu1 %v2991_v10 }
  0x49   : >> { %2165 = vmatprep.subr.bf16.mxu0 %v3001_v32  ;;  %2189 = vmatprep.subr.bf16.mxu1 %v3001_v32 }
  0x4c   : >> { %2166 = vmatpush3.bf16.msra.mxu0 %v3001_v32  ;;  %2190 = vmatpush3.bf16.msra.mxu1 %v3001_v32 }
  0x4d   : >> { %2491 = vmatprep.subr.msk.bf16.mxu0 %vm386_vm15, %v2952_v23  ;;  %2492 = vmatprep.subr.msk.bf16.mxu1 %vm386_vm15, %v2952_v23 }
  0x4f   : >> { %2168 = vmatmul.mubr.msk.bf16.vlgmr.msra.gmra.mxu0 %vm373_vm5, %v3009_v8  ;;  %2192 = vmatmul.mubr.msk.bf16.vlgmr.msra.gmra.mxu1 %vm373_vm5, %v3013_v27 }
  0x50   : >> { %2200 = vmatpush3.bf16.msra.mxu0 %v2962_v43  ;;  %2224 = vmatpush3.bf16.msra.mxu1 %v2962_v43 }
  0x51   : >> { %2201 = vmatprep.subr.bf16.mxu0 %v2950_v22  ;;  %2225 = vmatprep.subr.bf16.mxu1 %v2950_v22 }
  0x52   : >> { %2195 = vmatprep.mubr.msk.bf16.mxu1 %vm373_vm5, %v3023_v46  ;;  %2171 = vmatprep.mubr.msk.bf16.mxu0 %vm373_vm5, %v3027_v15 }
  0x54   : >> { %2202 = vmatpush3.bf16.msra.mxu0 %v2950_v22  ;;  %2226 = vmatpush3.bf16.msra.mxu1 %v2950_v22 }
  0x55   : >> { %2203 = vmatprep.subr.bf16.mxu0 %v2966_v16  ;;  %2227 = vmatprep.subr.bf16.mxu1 %v2966_v16 }
  0x57   : >> { %2196 = vmatmul.mubr.msk.bf16.gmra.mxu1 %vm373_vm5, %v3043_v11  ;;  %2172 = vmatmul.mubr.msk.bf16.gmra.mxu0 %vm373_vm5, %v3047_v20 }
  0x58   : >> { %2204 = vmatpush3.bf16.msra.mxu0 %v2966_v16  ;;  %2228 = vmatpush3.bf16.msra.mxu1 %v2966_v16 }
  0x59   : >> { %2205 = vmatprep.subr.bf16.mxu0 %v2972_v17  ;;  %2229 = vmatprep.subr.bf16.mxu1 %v2972_v17 }
  0x5a   : >> { %2215 = vmatprep.mubr.msk.bf16.mxu0 %vm373_vm5, %v3055_v12  ;;  %2239 = vmatprep.mubr.msk.bf16.mxu1 %vm373_vm5, %v3059_v13 }
  0x5c   : >> { %2206 = vmatpush3.bf16.msra.mxu0 %v2972_v17  ;;  %2230 = vmatpush3.bf16.msra.mxu1 %v2972_v17 }
  0x5d   : >> { %2207 = vmatprep.subr.bf16.mxu0 %v2978_v7  ;;  %2231 = vmatprep.subr.bf16.mxu1 %v2978_v7 }
  0x60   : >> { %2208 = vmatpush3.bf16.msra.mxu0 %v2978_v7  ;;  %2232 = vmatpush3.bf16.msra.mxu1 %v2978_v7 }
  0x61   : >> { %2209 = vmatprep.subr.bf16.mxu0 %v2984_v9  ;;  %2233 = vmatprep.subr.bf16.mxu1 %v2984_v9 }
  0x64   : >> { %2210 = vmatpush3.bf16.msra.mxu0 %v2984_v9  ;;  %2234 = vmatpush3.bf16.msra.mxu1 %v2984_v9 }
  0x65   : >> { %2211 = vmatprep.subr.bf16.mxu0 %v2991_v10  ;;  %2235 = vmatprep.subr.bf16.mxu1 %v2991_v10 }
  0x68   : >> { %2212 = vmatpush3.bf16.msra.mxu0 %v2991_v10  ;;  %2236 = vmatpush3.bf16.msra.mxu1 %v2991_v10 }
  0x69   : >> { %2213 = vmatprep.subr.bf16.mxu0 %v3001_v32  ;;  %2237 = vmatprep.subr.bf16.mxu1 %v3001_v32 }
  0x6c   : >> { %2214 = vmatpush3.bf16.msra.mxu0 %v3001_v32  ;;  %2238 = vmatpush3.bf16.msra.mxu1 %v3001_v32 }
  0x6d   : >> { %2493 = vmatprep.subr.msk.bf16.mxu0 %vm386_vm15, %v2952_v23  ;;  %2494 = vmatprep.subr.msk.bf16.mxu1 %vm386_vm15, %v3095_v1  ;;  %v3154_v23 = vcombine.low %v2861_v55, %v2874_v56 }
  0x6f   : >> { %2216 = vmatmul.mubr.msk.bf16.vlgmr.msra.gmra.mxu0 %vm373_vm5, %v3102_v5  ;;  %2240 = vmatmul.mubr.msk.bf16.vlgmr.msra.gmra.mxu1 %vm373_vm5, %v3106_v4 }
  0x70   : >> { %2248 = vmatpush3.bf16.msra.mxu0 %v2962_v43  ;;  %2272 = vmatpush3.bf16.msra.mxu1 %v3116_v26  ;;  %v3196_v43 = vcombine.low %v2893_v59, %v2898_v60 }
  0x71   : >> { %2249 = vmatprep.subr.bf16.mxu0 %v2950_v22  ;;  %2273 = vmatprep.subr.bf16.mxu1 %v3118_v6 }
  0x72   : >> { %2219 = vmatprep.mubr.msk.bf16.mxu0 %vm373_vm5, %v3122_v29  ;;  %2243 = vmatprep.mubr.msk.bf16.mxu1 %vm373_vm5, %v3126_v30 }
  0x74   : >> { %2250 = vmatpush3.bf16.msra.mxu0 %v2950_v22  ;;  %2274 = vmatpush3.bf16.msra.mxu1 %v3118_v6  ;;  %v3186_v22 = vcombine.low %v2879_v57, %v2884_v58 }
  0x75   : >> { %2251 = vmatprep.subr.bf16.mxu0 %v2966_v16  ;;  %2275 = vmatprep.subr.bf16.mxu1 %v2954_v24 }
  0x77   : >> { %2220 = vmatmul.mubr.msk.bf16.gmra.mxu0 %vm373_vm5, %v3142_v2  ;;  %2244 = vmatmul.mubr.msk.bf16.gmra.mxu1 %vm373_vm5, %v3146_v3 }
  0x78   : >> { %2252 = vmatpush3.bf16.msra.mxu0 %v2966_v16  ;;  %2276 = vmatpush3.bf16.msra.mxu1 %v2954_v24 }
  0x79   : >> { %2253 = vmatprep.subr.bf16.mxu0 %v2972_v17  ;;  %2277 = vmatprep.subr.bf16.mxu1 %v2948_v21 }
  0x7a   : >> { %2263 = vmatprep.mubr.msk.bf16.mxu0 %vm373_vm5, %v3154_v23  ;;  %2287 = vmatprep.mubr.msk.bf16.mxu1 %vm373_vm5, %v2914_v63  ;;  %v3212_v63 = vcombine.low %v2903_v61, %v2903_v61 }
  0x7c   : >> { %2254 = vmatpush3.bf16.msra.mxu0 %v2972_v17  ;;  %2278 = vmatpush3.bf16.msra.mxu1 %v2948_v21 }
  0x7d   : >> { %2255 = vmatprep.subr.bf16.mxu0 %v2978_v7  ;;  %2279 = vmatprep.subr.bf16.mxu1 %v2945_v19 }
  0x80   : >> { %2256 = vmatpush3.bf16.msra.mxu0 %v2978_v7  ;;  %2280 = vmatpush3.bf16.msra.mxu1 %v2945_v19 }
  0x81   : >> { %2257 = vmatprep.subr.bf16.mxu0 %v2984_v9  ;;  %2281 = vmatprep.subr.bf16.mxu1 %v2943_v18 }
  0x84   : >> { %2258 = vmatpush3.bf16.msra.mxu0 %v2984_v9  ;;  %2282 = vmatpush3.bf16.msra.mxu1 %v2943_v18 }
  0x85   : >> { %2259 = vmatprep.subr.bf16.mxu0 %v2991_v10  ;;  %2283 = vmatprep.subr.bf16.mxu1 %v2938_v14 }
  0x88   : >> { %2260 = vmatpush3.bf16.msra.mxu0 %v2991_v10  ;;  %2284 = vmatpush3.bf16.msra.mxu1 %v2938_v14 }
  0x89   : >> { %2261 = vmatprep.subr.bf16.mxu0 %v3001_v32  ;;  %2285 = vmatprep.subr.bf16.mxu1 %v2933_v31 }
  0x8c   : >> { %2262 = vmatpush3.bf16.msra.mxu0 %v3001_v32  ;;  %2286 = vmatpush3.bf16.msra.mxu1 %v2933_v31 }
  0x8d   : >> { %2495 = vmatprep.subr.msk.bf16.mxu0 %vm386_vm15, %v3095_v1  ;;  %2496 = vmatprep.subr.msk.bf16.mxu1 %vm386_vm15, %v3095_v1 }
  0x8f   : >> { %2264 = vmatmul.mubr.msk.bf16.vlgmr.msra.gmra.mxu0 %vm373_vm5, %v3186_v22  ;;  %2288 = vmatmul.mubr.msk.bf16.vlgmr.msra.gmra.mxu1 %vm373_vm5, %v3009_v8 }
  0x90   : >> { %2296 = vmatpush3.bf16.msra.mxu0 %v3116_v26  ;;  %2320 = vmatpush3.bf16.msra.mxu1 %v3116_v26 }
  0x91   : >> { %2297 = vmatprep.subr.bf16.mxu0 %v3118_v6  ;;  %2321 = vmatprep.subr.bf16.mxu1 %v3118_v6 }
  0x92   : >> { %2267 = vmatprep.mubr.msk.bf16.mxu0 %vm373_vm5, %v3196_v43  ;;  %2291 = vmatprep.mubr.msk.bf16.mxu1 %vm373_vm5, %v3027_v15 }
  0x94   : >> { %2298 = vmatpush3.bf16.msra.mxu0 %v3118_v6  ;;  %2322 = vmatpush3.bf16.msra.mxu1 %v3118_v6 }
  0x95   : >> { %2299 = vmatprep.subr.bf16.mxu0 %v2954_v24  ;;  %2323 = vmatprep.subr.bf16.mxu1 %v2954_v24 }
  0x97   : >> { %2268 = vmatmul.mubr.msk.bf16.gmra.mxu0 %vm373_vm5, %v3212_v63  ;;  %2292 = vmatmul.mubr.msk.bf16.gmra.mxu1 %vm373_vm5, %v3047_v20 }
  0x98   : >> { %2300 = vmatpush3.bf16.msra.mxu0 %v2954_v24  ;;  %2324 = vmatpush3.bf16.msra.mxu1 %v2954_v24 }
  0x99   : >> { %2301 = vmatprep.subr.bf16.mxu0 %v2948_v21  ;;  %2325 = vmatprep.subr.bf16.mxu1 %v2948_v21 }
  0x9a   : >> { %2311 = vmatprep.mubr.msk.bf16.mxu0 %vm373_vm5, %v2918_v0  ;;  %2335 = vmatprep.mubr.msk.bf16.mxu1 %vm373_vm5, %v3055_v12 }
  0x9c   : >> { %2302 = vmatpush3.bf16.msra.mxu0 %v2948_v21  ;;  %2326 = vmatpush3.bf16.msra.mxu1 %v2948_v21 }
  0x9d   : >> { %2303 = vmatprep.subr.bf16.mxu0 %v2945_v19  ;;  %2327 = vmatprep.subr.bf16.mxu1 %v2945_v19 }
  0xa0   : >> { %2304 = vmatpush3.bf16.msra.mxu0 %v2945_v19  ;;  %2328 = vmatpush3.bf16.msra.mxu1 %v2945_v19 }
  0xa1   : >> { %2305 = vmatprep.subr.bf16.mxu0 %v2943_v18  ;;  %2329 = vmatprep.subr.bf16.mxu1 %v2943_v18 }
  0xa4   : >> { %2306 = vmatpush3.bf16.msra.mxu0 %v2943_v18  ;;  %2330 = vmatpush3.bf16.msra.mxu1 %v2943_v18 }
  0xa5   : >> { %2307 = vmatprep.subr.bf16.mxu0 %v2938_v14  ;;  %2331 = vmatprep.subr.bf16.mxu1 %v2938_v14 }
  0xa8   : >> { %2308 = vmatpush3.bf16.msra.mxu0 %v2938_v14  ;;  %2332 = vmatpush3.bf16.msra.mxu1 %v2938_v14 }
  0xa9   : >> { %2309 = vmatprep.subr.bf16.mxu0 %v2933_v31  ;;  %2333 = vmatprep.subr.bf16.mxu1 %v2933_v31 }
  0xac   : >> { %2310 = vmatpush3.bf16.msra.mxu0 %v2933_v31  ;;  %2334 = vmatpush3.bf16.msra.mxu1 %v2933_v31 }
  0xad   : >> { %2497 = vmatprep.subr.msk.bf16.mxu0 %vm386_vm15, %v3095_v1  ;;  %2498 = vmatprep.subr.msk.bf16.mxu1 %vm386_vm15, %v3095_v1 }
  0xaf   : >> { %2312 = vmatmul.mubr.msk.bf16.vlgmr.msra.gmra.mxu0 %vm373_vm5, %v3013_v27  ;;  %2336 = vmatmul.mubr.msk.bf16.vlgmr.msra.gmra.mxu1 %vm373_vm5, %v3102_v5 }
  0xb0   : >> { %2344 = vmatpush3.bf16.msra.mxu0 %v3116_v26  ;;  %2368 = vmatpush3.bf16.msra.mxu1 %v3116_v26 }
  0xb1   : >> { %2345 = vmatprep.subr.bf16.mxu0 %v3118_v6  ;;  %2369 = vmatprep.subr.bf16.mxu1 %v3118_v6 }
  0xb2   : >> { %2315 = vmatprep.mubr.msk.bf16.mxu0 %vm373_vm5, %v3023_v46  ;;  %2339 = vmatprep.mubr.msk.bf16.mxu1 %vm373_vm5, %v3122_v29 }
  0xb4   : >> { %2346 = vmatpush3.bf16.msra.mxu0 %v3118_v6  ;;  %2370 = vmatpush3.bf16.msra.mxu1 %v3118_v6 }
  0xb5   : >> { %2347 = vmatprep.subr.bf16.mxu0 %v2954_v24  ;;  %2371 = vmatprep.subr.bf16.mxu1 %v2954_v24 }
  0xb7   : >> { %2316 = vmatmul.mubr.msk.bf16.gmra.mxu0 %vm373_vm5, %v3043_v11  ;;  %2340 = vmatmul.mubr.msk.bf16.gmra.mxu1 %vm373_vm5, %v3142_v2 }
  0xb8   : >> { %2348 = vmatpush3.bf16.msra.mxu0 %v2954_v24  ;;  %2372 = vmatpush3.bf16.msra.mxu1 %v2954_v24 }
  0xb9   : >> { %2349 = vmatprep.subr.bf16.mxu0 %v2948_v21  ;;  %2373 = vmatprep.subr.bf16.mxu1 %v2948_v21 }
  0xba   : >> { %2359 = vmatprep.mubr.msk.bf16.mxu0 %vm373_vm5, %v3059_v13  ;;  %2383 = vmatprep.mubr.msk.bf16.mxu1 %vm373_vm5, %v3154_v23 }
  0xbc   : >> { %2350 = vmatpush3.bf16.msra.mxu0 %v2948_v21  ;;  %2374 = vmatpush3.bf16.msra.mxu1 %v2948_v21 }
  0xbd   : >> { %2351 = vmatprep.subr.bf16.mxu0 %v2945_v19  ;;  %2375 = vmatprep.subr.bf16.mxu1 %v2945_v19 }
  0xc0   : >> { %2352 = vmatpush3.bf16.msra.mxu0 %v2945_v19  ;;  %2376 = vmatpush3.bf16.msra.mxu1 %v2945_v19 }
  0xc1   : >> { %2353 = vmatprep.subr.bf16.mxu0 %v2943_v18  ;;  %2377 = vmatprep.subr.bf16.mxu1 %v2943_v18 }
  0xc4   : >> { %2354 = vmatpush3.bf16.msra.mxu0 %v2943_v18  ;;  %2378 = vmatpush3.bf16.msra.mxu1 %v2943_v18 }
  0xc5   : >> { %2355 = vmatprep.subr.bf16.mxu0 %v2938_v14  ;;  %2379 = vmatprep.subr.bf16.mxu1 %v2938_v14 }
  0xc8   : >> { %2356 = vmatpush3.bf16.msra.mxu0 %v2938_v14  ;;  %2380 = vmatpush3.bf16.msra.mxu1 %v2938_v14 }
  0xc9   : >> { %2357 = vmatprep.subr.bf16.mxu0 %v2933_v31  ;;  %2381 = vmatprep.subr.bf16.mxu1 %v2933_v31 }
  0xcc   : >> { %2358 = vmatpush3.bf16.msra.mxu0 %v2933_v31  ;;  %2382 = vmatpush3.bf16.msra.mxu1 %v2933_v31 }
  0xcf   : >> { %2360 = vmatmul.mubr.msk.bf16.vlgmr.msra.gmra.mxu0 %vm373_vm5, %v3106_v4  ;;  %2384 = vmatmul.mubr.msk.bf16.vlgmr.msra.gmra.mxu1 %vm373_vm5, %v3186_v22 }
  0xd0   : >> { %2363 = vmatprep.mubr.msk.bf16.mxu0 %vm373_vm5, %v3126_v30  ;;  %2387 = vmatprep.mubr.msk.bf16.mxu1 %vm373_vm5, %v3196_v43 }
  0xd7   : >> { %2364 = vmatmul.mubr.msk.bf16.gmra.mxu0 %vm373_vm5, %v3146_v3  ;;  %2388 = vmatmul.mubr.msk.bf16.gmra.mxu1 %vm373_vm5, %v3212_v63  ;;  %vm1533_vm5 = vcmask 1041408  }
 0x10f   : >> { %v3310_v1 = vpop.f32.mrf.mxu0  ;;  %v2193_v5 = vpop.f32.mrf.mxu1 }
 0x110   : >> { %566 = vrot.lane.b32.xlu0 %v2193_v5, %s2546_s8 }
 0x111   : >> { %v3313_v4 = vpop.f32.mrf.mxu0  ;;  %v525_v6 = vpop.f32.mrf.mxu1 }
 0x113   : >> { %v3315_v12 = vpop.f32.mrf.mxu0  ;;  %v2194_v13 = vpop.f32.mrf.mxu1 }
 0x114   : >> { %562 = vrot.lane.b32.xlu0 %v525_v6, %s2546_s8  ;;  %568 = vrot.lane.b32.xlu1 %v2194_v13, %s2546_s8 }
 0x115   : >> { %v3319_v14 = vpop.f32.mrf.mxu0  ;;  %v528_v18 = vpop.f32.mrf.mxu1 }
 0x117   : >> { %v2197_v19 = vpop.f32.mrf.mxu1  ;;  %v3321_v21 = vpop.f32.mrf.mxu0 }
 0x118   : >> { %564 = vrot.lane.b32.xlu0 %v528_v18, %s2546_s8 }
 0x119   : >> { %v541_v24 = vpop.f32.mrf.mxu1  ;;  %v3324_v29 = vpop.f32.mrf.mxu0 }
 0x11b   : >> { %v2198_v30 = vpop.f32.mrf.mxu1  ;;  %v2174_v31 = vpop.f32.mrf.mxu0 }
 0x11c   : >> { %574 = vrot.lane.b32.xlu0 %v2197_v19, %s2546_s8 }
 0x11d   : >> { %v544_v0 = vpop.f32.mrf.mxu1  ;;  %v3329_v16 = vpop.f32.mrf.mxu0 }
 0x11e   : >> { %572 = vrot.lane.b32.xlu1 %v544_v0, %s2546_s8 }
 0x120   : >> { %570 = vrot.lane.b32.xlu0 %v541_v24, %s2546_s8 }
 0x12f   : >> { %v2217_v17 = vpop.f32.mrf.mxu0  ;;  %v2241_v7 = vpop.f32.mrf.mxu1 }
 0x130   : >> { %824 = vrot.lane.b32.xlu0 %v2241_v7, %s2547_s9  ;;  %695 = vrot.lane.b32.xlu1 %v2217_v17, %s2548_s10 }
 0x131   : >> { %v654_v9 = vpop.f32.mrf.mxu0  ;;  %v783_v10 = vpop.f32.mrf.mxu1 }
 0x133   : >> { %v2218_v32 = vpop.f32.mrf.mxu0  ;;  %v2242_v8 = vpop.f32.mrf.mxu1 }
 0x134   : >> { %691 = vrot.lane.b32.xlu1 %v654_v9, %s2548_s10  ;;  %697 = vrot.lane.b32.xlu0 %v2218_v32, %s2548_s10 }
 0x135   : >> { %v657_v27 = vpop.f32.mrf.mxu0  ;;  %v786_v46 = vpop.f32.mrf.mxu1 }
 0x137   : >> { %v2221_v15 = vpop.f32.mrf.mxu0  ;;  %v3335_v11 = vpop.f32.mrf.mxu1 }
 0x138   : >> { %820 = vrot.lane.b32.xlu1 %v783_v10, %s2547_s9 }
 0x139   : >> { %v670_v20 = vpop.f32.mrf.mxu0  ;;  %v799_v26 = vpop.f32.mrf.mxu1 }
 0x13a   : >> { %828 = vrot.lane.b32.xlu0 %v799_v26, %s2547_s9 }
 0x13b   : >> { %v2222_v2 = vpop.f32.mrf.mxu0  ;;  %v2246_v3 = vpop.f32.mrf.mxu1 }
 0x13c   : >> { %826 = vrot.lane.b32.xlu1 %v2242_v8, %s2547_s9  ;;  %v3369_v8 = vpop.permute.xlu0 %1464 }
 0x13d   : >> { %v673_v23 = vpop.f32.mrf.mxu0  ;;  %v802_v22 = vpop.f32.mrf.mxu1 }
 0x13e   : >> { %701 = vrot.lane.b32.xlu0 %v673_v23, %s2548_s10 }
 0x140   : >> { %693 = vrot.lane.b32.xlu1 %v657_v27, %s2548_s10  ;;  %v3375_v3 = vpop.permute.xlu0 %1469 }
 0x144   : >> { %822 = vrot.lane.b32.xlu1 %v786_v46, %s2547_s9 }
 0x148   : >> { %703 = vrot.lane.b32.xlu1 %v2221_v15, %s2548_s10 }
 0x14c   : >> { %699 = vrot.lane.b32.xlu1 %v670_v20, %s2548_s10 }
 0x14f   : >> { %v2265_v43 = vpop.f32.mrf.mxu0  ;;  %v3345_v63 = vpop.f32.mrf.mxu1 }
 0x150   : >> { %830 = vrot.lane.b32.xlu1 %v802_v22, %s2547_s9 }
 0x151   : >> { %v912_v5 = vpop.f32.mrf.mxu0  ;;  %v3348_v6 = vpop.f32.mrf.mxu1 }
 0x153   : >> { %v2266_v13 = vpop.f32.mrf.mxu0  ;;  %v3350_v18 = vpop.f32.mrf.mxu1 }
 0x154   : >> { %953 = vrot.lane.b32.xlu1 %v2265_v43, %s2549_s11  ;;  %955 = vrot.lane.b32.xlu0 %v2266_v13, %s2549_s11  ;;  %v3713_v13 = vmov 0.0  }
 0x155   : >> { %v915_v19 = vpop.f32.mrf.mxu0  ;;  %v3354_v24 = vpop.f32.mrf.mxu1  ;;  %2391 = vmatprep.subr.mxu0 %v3713_v13  ;;  %2440 = vmatprep.subr.mxu1 %v3713_v13 }
 0x156   : >> { %2392 = vmatpush3.msk.msra.mxu0 %vm1533_vm5, %v3804_v47  ;;  %2441 = vmatpush3.msk.msra.mxu1 %vm1533_vm5, %v2905_v62 }
 0x157   : >> { %v3356_v30 = vpop.f32.mrf.mxu0  ;;  %v3358_v31 = vpop.f32.mrf.mxu1  ;;  %2393 = vmatprep.subr.mxu0 %v3713_v13  ;;  %2442 = vmatprep.subr.mxu1 %v3713_v13 }
 0x158   : >> { %949 = vrot.lane.b32.xlu1 %v912_v5, %s2549_s11  ;;  %951 = vrot.lane.b32.xlu0 %v915_v19, %s2549_s11 }
 0x159   : >> { %v928_v0 = vpop.f32.mrf.mxu0  ;;  %v3362_v17 = vpop.f32.mrf.mxu1 }
 0x15b   : >> { %v2294_v7 = vpop.f32.mrf.mxu1  ;;  %v2270_v9 = vpop.f32.mrf.mxu0 }
 0x15c   : >> { %957 = vrot.lane.b32.xlu1 %v928_v0, %s2549_s11  ;;  %v3385_v7 = vpop.permute.xlu0 %1479 }
 0x15d   : >> { %v3365_v10 = vpop.f32.mrf.mxu1  ;;  %v3367_v32 = vpop.f32.mrf.mxu0 }
 0x16f   : >> { %v2313_v27 = vpop.f32.mrf.mxu0  ;;  %v2337_v46 = vpop.f32.mrf.mxu1 }
 0x170   : >> { %1233 = vrot.lane.b32.xlu1 %v2337_v46, %s2548_s10  ;;  %1134 = vrot.lane.b32.xlu0 %v2313_v27, %s2546_s8  ;;  %v2551_v46 = vmov 1.0  }
 0x171   : >> { %v1093_v15 = vpop.f32.mrf.mxu0  ;;  %v1192_v20 = vpop.f32.mrf.mxu1  ;;  %2394 = vmatpush3.msk.msra.mxu0 %vm202_vm12, %v2551_v46  ;;  %2443 = vmatpush3.msk.msra.mxu1 %vm245_vm4, %v2551_v46 }
 0x172   : >> { %2395 = vmatprep.subr.mxu0 %v3713_v13  ;;  %2444 = vmatprep.subr.mxu1 %v3713_v13 }
 0x173   : >> { %v2314_v26 = vpop.f32.mrf.mxu0  ;;  %v2338_v2 = vpop.f32.mrf.mxu1  ;;  %2396 = vmatpush3.msk.msra.mxu0 %vm201_vm11, %v2551_v46  ;;  %2445 = vmatpush3.msk.msra.mxu1 %vm244_vm14, %v2551_v46 }
 0x174   : >> { %1229 = vrot.lane.b32.xlu1 %v1192_v20, %s2548_s10  ;;  %1130 = vrot.lane.b32.xlu0 %v1093_v15, %s2546_s8  ;;  %v3805_v15 = vld [vmem:[#allocation42_spill] sm:$0xff] }
 0x175   : >> { %v1096_v23 = vpop.f32.mrf.mxu0  ;;  %v1195_v22 = vpop.f32.mrf.mxu1  ;;  %2397 = vmatprep.subr.mxu0 %v3713_v13  ;;  %2446 = vmatprep.subr.mxu1 %v3713_v13 }
 0x176   : >> { %2398 = vmatpush3.msk.msra.mxu0 %vm200_vm10, %v2551_v46  ;;  %2447 = vmatpush3.msk.msra.mxu1 %vm243_vm3, %v2551_v46 }
 0x177   : >> { %v2317_v43 = vpop.f32.mrf.mxu0  ;;  %v3377_v5 = vpop.f32.mrf.mxu1  ;;  %2399 = vmatprep.subr.mxu0 %v3713_v13  ;;  %2448 = vmatprep.subr.mxu1 %v3713_v13 }
 0x178   : >> { %1235 = vrot.lane.b32.xlu0 %v2338_v2, %s2548_s10  ;;  %1136 = vrot.lane.b32.xlu1 %v2314_v26, %s2546_s8  ;;  %v3411_v2 = vpop.permute.xlu0 %1489 }
 0x179   : >> { %v1109_v19 = vpop.f32.mrf.mxu0  ;;  %v1208_v0 = vpop.f32.mrf.mxu1  ;;  %2400 = vmatpush3.msk.msra.mxu0 %vm199_vm9, %v2551_v46 }
 0x17a   : >> { %2401 = vmatprep.subr.mxu0 %v3713_v13 }
 0x17b   : >> { %v2318_v9 = vpop.f32.mrf.mxu0  ;;  %v2342_v27 = vpop.f32.mrf.mxu1  ;;  %2402 = vmatpush3.msk.msra.mxu0 %vm198_vm8, %v2551_v46 }
 0x17c   : >> { %1237 = vrot.lane.b32.xlu1 %v1208_v0, %s2548_s10  ;;  %1132 = vrot.lane.b32.xlu0 %v1096_v23, %s2546_s8  ;;  %v3808_v0 = vld [vmem:[#allocation22_spill] sm:$0xff]  ;;  %v3816_v23 = vld [vmem:[#allocation17_spill] sm:$0xff]  ;;  %v3819_v27 = vld [vmem:[#allocation16_spill] sm:$0xff] }
 0x17d   : >> { %v1112_v20 = vpop.f32.mrf.mxu0  ;;  %vm3809_vm0 = vcmp.eq.s32.totalorder %v3808_v0, %v3805_v15  ;;  %2403 = vmatprep.subr.mxu0 %v3713_v13  ;;  %v3813_v0 = vld [vmem:[#allocation18_spill] sm:$0xff] }
 0x17e   : >> { %2449 = vmatpush3.msk.msra.mxu1 %vm3809_vm0, %v2551_v46  ;;  %2404 = vmatpush3.msk.msra.mxu0 %vm197_vm7, %v2551_v46  ;;  %vm3814_vm15 = vcmp.eq.s32.totalorder %v3813_v0, %v3768_v28  ;;  %vm3815_vm5 = vcmp.eq.s32.totalorder %v3813_v0, %v3805_v15  ;;  %vm3817_vm0 = vcmp.eq.s32.totalorder %v3816_v23, %v3768_v28 }
 0x17f   : >> { %2450 = vmatprep.subr.mxu1 %v3713_v13  ;;  %2405 = vmatprep.subr.mxu0 %v3713_v13 }
 0x180   : >> { %1231 = vrot.lane.b32.xlu0 %v1195_v22, %s2548_s10  ;;  %1140 = vrot.lane.b32.xlu1 %v1112_v20, %s2546_s8  ;;  %v3481_v22 = vpop.permute.xlu1 %1474 }
 0x181   : >> { %2451 = vmatpush3.msk.msra.mxu1 %vm241_vm2, %v2551_v46  ;;  %2406 = vmatpush3.msk.msra.mxu0 %vm196_vm6, %v2551_v46 }
 0x182   : >> { %v3440_v9 = vpop.permute.xlu0 %566  ;;  %2452 = vmatprep.subr.mxu1 %v3713_v13  ;;  %2407 = vmatprep.subr.mxu0 %v3713_v13 }
 0x183   : >> { %2453 = vmatpush3.msk.msra.mxu1 %vm240_vm13, %v2551_v46  ;;  %2408 = vmatpush3.msk.msra.mxu0 %vm3814_vm15, %v2551_v46  ;;  %vm3818_vm15 = vcmp.eq.s32.totalorder %v3816_v23, %v3805_v15  ;;  %v3822_v23 = vld [vmem:[#allocation15_spill] sm:$0xff] }
 0x184   : >> { %1142 = vrot.lane.b32.xlu0 %v2317_v43, %s2546_s8  ;;  %2454 = vmatprep.subr.mxu1 %v3713_v13  ;;  %v3512_v34 = vpop.permute.xlu1 %1484 }
 0x185   : >> { %2455 = vmatpush3.msk.msra.mxu1 %vm239_vm1, %v2551_v46  ;;  %2409 = vmatprep.subr.mxu0 %v3713_v13 }
 0x186   : >> { %2456 = vmatprep.subr.mxu1 %v3713_v13  ;;  %v3469_v20 = vpop.permute.xlu0 %562  ;;  %2410 = vmatpush3.msk.msra.mxu0 %vm3817_vm0, %v2551_v46  ;;  %vm3820_vm0 = vcmp.eq.s32.totalorder %v3819_v27, %v3768_v28 }
 0x187   : >> { %2457 = vmatpush3.msk.msra.mxu1 %vm3815_vm5, %v2551_v46  ;;  %2411 = vmatprep.subr.mxu0 %v3713_v13  ;;  %vm3821_vm5 = vcmp.eq.s32.totalorder %v3819_v27, %v3805_v15 }
 0x188   : >> { %1138 = vrot.lane.b32.xlu0 %v1109_v19, %s2546_s8  ;;  %v1211_v19 = vpop.f32.mrf.mxu1  ;;  %2458 = vmatprep.subr.mxu1 %v3713_v13  ;;  %v569_v40 = vpop.permute.xlu1 %568 }
 0x189   : >> { %2459 = vmatpush3.msk.msra.mxu1 %vm3818_vm15, %v2551_v46  ;;  %2412 = vmatpush3.msk.msra.mxu0 %vm3820_vm0, %v2551_v46  ;;  %vm3823_vm15 = vcmp.eq.s32.totalorder %v3822_v23, %v3768_v28  ;;  %vm3824_vm0 = vcmp.eq.s32.totalorder %v3822_v23, %v3805_v15 }
 0x18a   : >> { %2460 = vmatprep.subr.mxu1 %v3713_v13  ;;  %v3500_v33 = vpop.permute.xlu0 %564  ;;  %2413 = vmatprep.subr.mxu0 %v3713_v13 }
 0x18b   : >> { %2461 = vmatpush3.msk.msra.mxu1 %vm3821_vm5, %v2551_v46  ;;  %2414 = vmatpush3.msk.msra.mxu0 %vm3823_vm15, %v2551_v46  ;;  %vm3826_vm5 = vcmp.eq.s32.totalorder %v3825_v36, %v3768_v28  ;;  %vm3827_vm15 = vcmp.eq.s32.totalorder %v3825_v36, %v3805_v15 }
 0x18c   : >> { %1239 = vrot.lane.b32.xlu0 %v1211_v19, %s2548_s10  ;;  %2462 = vmatprep.subr.mxu1 %v3713_v13 }
 0x18d   : >> { %2463 = vmatpush3.msk.msra.mxu1 %vm3824_vm0, %v2551_v46  ;;  %2415 = vmatprep.subr.mxu0 %v3713_v13  ;;  %vm3829_vm0 = vcmp.eq.s32.totalorder %v3828_v39, %v3768_v28 }
 0x18e   : >> { %2464 = vmatprep.subr.mxu1 %v3713_v13  ;;  %2416 = vmatpush3.msk.msra.mxu0 %vm3826_vm5, %v2551_v46  ;;  %vm2552_vm5 = vmmov 0  }
 0x18f   : >> { %v2361_v19 = vpop.f32.mrf.mxu0  ;;  %v2385_v25 = vpop.f32.mrf.mxu1  ;;  %2465 = vmatpush3.msk.msra.mxu1 %vm3827_vm15, %v2551_v46  ;;  %2417 = vmatprep.subr.mxu0 %v3713_v13  ;;  %vm3830_vm15 = vcmp.eq.s32.totalorder %v3828_v39, %v3805_v15  ;;  %v585_v15 = vadd.f32 %v3310_v1, %v3440_v9 }
 0x190   : >> { %1431 = vrot.lane.b32.xlu1 %v2385_v25, %s2549_s11  ;;  %1332 = vrot.lane.b32.xlu0 %v2361_v19, %s2547_s9  ;;  %v573_v28 = vpop.permute.xlu1 %572 }
 0x191   : >> { %v1291_v0 = vpop.f32.mrf.mxu0  ;;  %v1390_v26 = vpop.f32.mrf.mxu1  ;;  %2466 = vmatprep.subr.mxu1 %v3713_v13  ;;  %2418 = vmatpush3.msk.msra.mxu0 %vm3829_vm0, %v2551_v46  ;;  %vm1511_vm0 = vcmask 867328  }
 0x192   : >> { %2419 = vmatprep.mubr.msk.f32.mxu0 %vm2552_vm5, %v3713_v13  ;;  %2467 = vmatpush3.msk.msra.mxu1 %vm3830_vm15, %v2551_v46  ;;  %vm1756_vm15 = vcmask 427008  }
 0x193   : >> { %v2362_v25 = vpop.f32.mrf.mxu0  ;;  %v2386_v19 = vpop.f32.mrf.mxu1  ;;  %2468 = vmatprep.mubr.msk.f32.mxu1 %vm2552_vm5, %v3713_v13 }
 0x194   : >> { %1433 = vrot.lane.b32.xlu0 %v2386_v19, %s2549_s11  ;;  %1328 = vrot.lane.b32.xlu1 %v1291_v0, %s2547_s9  ;;  %v575_v0 = vpop.permute.xlu0 %574 }
 0x195   : >> { %v1294_v35 = vpop.f32.mrf.mxu0  ;;  %v1393_v27 = vpop.f32.mrf.mxu1 }
 0x197   : >> { %v2365_v37 = vpop.f32.mrf.mxu0  ;;  %v2389_v19 = vpop.f32.mrf.mxu1 }
 0x198   : >> { %1429 = vrot.lane.b32.xlu0 %v1393_v27, %s2549_s11  ;;  %1427 = vrot.lane.b32.xlu1 %v1390_v26, %s2549_s11  ;;  %v571_v36 = vpop.permute.xlu0 %570 }
 0x199   : >> { %v1307_v23 = vpop.f32.mrf.mxu0  ;;  %v1406_v38 = vpop.f32.mrf.mxu1 }
 0x19b   : >> { %v2390_v26 = vpop.f32.mrf.mxu1  ;;  %v2366_v27 = vpop.f32.mrf.mxu0 }
 0x19c   : >> { %959 = vrot.lane.b32.xlu0 %v3367_v32, %s2549_s11  ;;  %1334 = vrot.lane.b32.xlu1 %v2362_v25, %s2547_s9  ;;  %v583_v32 = vadd.f32 %v3469_v20, %v3313_v4  ;;  %v586_v25 = vadd.f32 %v3315_v12, %v569_v40  ;;  %v588_v4 = vadd.f32 %v573_v28, %v3329_v16 }
 0x19d   : >> { %v1409_v13 = vpop.f32.mrf.mxu1  ;;  %v1310_v12 = vpop.f32.mrf.mxu0  ;;  %v589_v28 = vadd.f32 %v3321_v21, %v575_v0 }
 0x1a0   : >> { %1330 = vrot.lane.b32.xlu1 %v1294_v35, %s2547_s9  ;;  %1336 = vrot.lane.b32.xlu0 %v1307_v23, %s2547_s9 }
 0x1a2   : >> { %v825_v46 = vpop.permute.xlu0 %824  ;;  %v696_v26 = vpop.permute.xlu1 %695 }
 0x1a3   : >> { %v714_v27 = vadd.f32 %v696_v26, %v585_v15 }
 0x1a4   : >> { %1241 = vrot.lane.b32.xlu1 %v3377_v5, %s2548_s10  ;;  %1340 = vrot.lane.b32.xlu0 %v2365_v37, %s2547_s9 }
 0x1a5   : >> { %v3559_v35 = vadd.f32 %v825_v46, %v714_v27  ;;  %v3831_v46 = vld [vmem:[#allocation9_spill] sm:$0xff]  ;;  %v587_v27 = vadd.f32 %v571_v36, %v3324_v29 }
 0x1a6   : >> { %v692_v23 = vpop.permute.xlu1 %691  ;;  %v698_v39 = vpop.permute.xlu0 %697 }
 0x1a7   : >> { %v712_v41 = vadd.f32 %v692_v23, %v583_v32  ;;  %v715_v1 = vadd.f32 %v698_v39, %v586_v25 }
 0x1a8   : >> { %832 = vrot.lane.b32.xlu1 %v3335_v11, %s2547_s9  ;;  %1437 = vrot.lane.b32.xlu0 %v1409_v13, %s2549_s11  ;;  %v584_v11 = vadd.f32 %v3500_v33, %v3319_v14 }
 0x1aa   : >> { %v821_v5 = vpop.permute.xlu1 %820 }
 0x1ab   : >> { %v841_v15 = vadd.f32 %v821_v5, %v712_v41 }
 0x1ac   : >> { %v829_v37 = vpop.permute.xlu0 %828  ;;  %1435 = vrot.lane.b32.xlu1 %v1406_v38, %s2549_s11  ;;  %961 = vrot.lane.b32.xlu0 %v3356_v30, %s2549_s11 }
 0x1ae   : >> { %v827_v40 = vpop.permute.xlu1 %826 }
 0x1af   : >> { %v3568_v9 = vadd.f32 %v827_v40, %v715_v1 }
 0x1b0   : >> { %v702_v39 = vpop.permute.xlu0 %701  ;;  %1338 = vrot.lane.b32.xlu1 %v1310_v12, %s2547_s9 }
 0x1b1   : >> { %v717_v13 = vadd.f32 %v702_v39, %v588_v4 }
 0x1b2   : >> { %v694_v41 = vpop.permute.xlu1 %693 }
 0x1b3   : >> { %v713_v20 = vadd.f32 %v694_v41, %v584_v11 }
 0x1b4   : >> { %1494 = vperm.xlu1 %2527, %v3831_v46  }
 0x1b6   : >> { %v823_v38 = vpop.permute.xlu1 %822 }
 0x1b7   : >> { %v842_v26 = vadd.f32 %v823_v38, %v713_v20 }
 0x1b8   : >> { %1439 = vrot.lane.b32.xlu1 %v2389_v19, %s2549_s11 }
 0x1ba   : >> { %v704_v16 = vpop.permute.xlu1 %703 }
 0x1bb   : >> { %v3576_v30 = vadd.f32 %v704_v16, %v589_v28 }
 0x1be   : >> { %v700_v32 = vpop.permute.xlu1 %699 }
 0x1bf   : >> { %v716_v25 = vadd.f32 %v700_v32, %v587_v27 }
 0x1c1   : >> { %v3579_v23 = vadd.f32 %v829_v37, %v716_v25 }
 0x1c2   : >> { %v831_v33 = vpop.permute.xlu1 %830 }
 0x1c3   : >> { %v3581_v14 = vadd.f32 %v831_v33, %v717_v13 }
 0x1c6   : >> { %v954_v1 = vpop.permute.xlu1 %953  ;;  %v956_v5 = vpop.permute.xlu0 %955 }
 0x1ca   : >> { %v950_v40 = vpop.permute.xlu1 %949  ;;  %v952_v4 = vpop.permute.xlu0 %951 }
 0x1cb   : >> { %v970_v45 = vadd.f32 %v950_v40, %v841_v15 }
 0x1ce   : >> { %v3583_v12 = vpop.permute.xlu1 %957 }
 0x1e2   : >> { %v1135_v19 = vpop.permute.xlu0 %1134  ;;  %v1234_v21 = vpop.permute.xlu1 %1233 }
 0x1e3   : >> { %v1153_v42 = vadd.f32 %v3345_v63, %v1135_v19 }
 0x1e5   : >> { %v1252_v50 = vadd.f32 %v1234_v21, %v1153_v42  ;;  %v3832_v42 = vmov 0.0  }
 0x1e6   : >> { %v1131_v0 = vpop.permute.xlu0 %1130  ;;  %v1230_v11 = vpop.permute.xlu1 %1229 }
 0x1e7   : >> { %v1151_v27 = vadd.f32 %v1131_v0, %v3348_v6 }
 0x1e9   : >> { %v1250_v33 = vadd.f32 %v1230_v11, %v1151_v27 }
 0x1ea   : >> { %v1236_v39 = vpop.permute.xlu0 %1235  ;;  %v1137_v36 = vpop.permute.xlu1 %1136 }
 0x1eb   : >> { %v1154_v49 = vadd.f32 %v3350_v18, %v1137_v36 }
 0x1ed   : >> { %v1253_v27 = vadd.f32 %v1236_v39, %v1154_v49 }
 0x1ee   : >> { %v1133_v41 = vpop.permute.xlu0 %1132  ;;  %v1238_v37 = vpop.permute.xlu1 %1237 }
 0x1ef   : >> { %v1152_v53 = vadd.f32 %v1133_v41, %v3354_v24  ;;  %v973_v24 = vadd.f32 %v956_v5, %v3568_v9 }
 0x1f2   : >> { %v1232_v29 = vpop.permute.xlu0 %1231  ;;  %v1141_v13 = vpop.permute.xlu1 %1140 }
 0x1f3   : >> { %v1251_v0 = vadd.f32 %v1232_v29, %v1152_v53 }
 0x1f6   : >> { %v3585_v20 = vpop.permute.xlu0 %1142 }
 0x1fa   : >> { %v1139_v46 = vpop.permute.xlu0 %1138 }
 0x1fe   : >> { %v1240_v38 = vpop.permute.xlu0 %1239 }
 0x202   : >> { %v1432_v28 = vpop.permute.xlu1 %1431  ;;  %v1333_v16 = vpop.permute.xlu0 %1332 }
 0x203   : >> { %v1351_v54 = vadd.f32 %v1333_v16, %v1252_v50 }
 0x206   : >> { %v1434_v32 = vpop.permute.xlu0 %1433  ;;  %v1329_v25 = vpop.permute.xlu1 %1328 }
 0x207   : >> { %v1349_v43 = vadd.f32 %v1329_v25, %v1250_v33  ;;  %v1450_v25 = vadd.f32 %v1432_v28, %v1351_v54 }
 0x20a   : >> { %v1428_v44 = vpop.permute.xlu1 %1427  ;;  %v1430_v48 = vpop.permute.xlu0 %1429 }
 0x20b   : >> { %v1448_v47 = vadd.f32 %v1428_v44, %v1349_v43 }
 0x20d   : >> { %v1455_v51 = vmax.f32 %v970_v45, %v1448_v47  ;;  %v972_v45 = vadd.f32 %v954_v1, %v3559_v35  ;;  %v971_v47 = vadd.f32 %v952_v4, %v842_v26 }
 0x20e   : >> { %v1335_v52 = vpop.permute.xlu1 %1334  ;;  %v960_v63 = vpop.permute.xlu0 %959 }
 0x20f   : >> { %v1497_v6 = vadd.f32 %v3369_v8, %v1455_v51  ;;  %v1352_v15 = vadd.f32 %v1335_v52, %v1253_v27  ;;  %v1155_v51 = vadd.f32 %v1139_v46, %v3362_v17  ;;  %v1457_v53 = vmax.f32 %v972_v45, %v1450_v25 }
 0x211   : >> { %v1504_v11 = vmax.f32 %v1497_v6, 0.0  ;;  %v1451_v52 = vadd.f32 %v1434_v32, %v1352_v15  ;;  %v1499_v40 = vadd.f32 %v3481_v22, %v1457_v53  ;;  %v1254_v41 = vadd.f32 %v1238_v37, %v1155_v51 }
 0x212   : >> { %v1331_v19 = vpop.permute.xlu1 %1330  ;;  %v1337_v18 = vpop.permute.xlu0 %1336 }
 0x213   : >> { %v1350_v44 = vadd.f32 %v1331_v19, %v1251_v0  ;;  %2420 = vmatmul.mubr.msk.f32.vlgmr.msra.gmra.mxu0 %vm1511_vm0, %v1504_v11  ;;  %2469 = vmatmul.mubr.msk.f32.vlgmr.msra.gmra.mxu1 %vm1511_vm0, %v1504_v11  ;;  %v1458_v21 = vmax.f32 %v973_v24, %v1451_v52  ;;  %v1353_v35 = vadd.f32 %v1337_v18, %v1254_v41  ;;  %v1506_v22 = vmax.f32 %v1499_v40, 0.0 }
 0x214   : >> { %2422 = vmatprep.mubr.msk.f32.mxu0 %vm2552_vm5, %v3832_v42  ;;  %2471 = vmatprep.mubr.msk.f32.mxu1 %vm2552_vm5, %v3832_v42 }
 0x215   : >> { %v1449_v50 = vadd.f32 %v1430_v48, %v1350_v44  ;;  %v974_v48 = vadd.f32 %v3583_v12, %v3579_v23  ;;  %v1500_v9 = vadd.f32 %v3385_v7, %v1458_v21  ;;  %v975_v7 = vadd.f32 %v960_v63, %v3581_v14 }
 0x216   : >> { %v1242_v49 = vpop.permute.xlu1 %1241  ;;  %v1341_v17 = vpop.permute.xlu0 %1340  ;;  %v1157_v14 = vadd.f32 %v3358_v31, %v3585_v20 }
 0x217   : >> { %v1456_v54 = vmax.f32 %v971_v47, %v1449_v50  ;;  %v1507_v12 = vmax.f32 %v1500_v9, 0.0 }
 0x219   : >> { %v1498_v8 = vadd.f32 %v3375_v3, %v1456_v54  ;;  %v1156_v3 = vadd.f32 %v1141_v13, %v3365_v10 }
 0x21a   : >> { %v833_v43 = vpop.permute.xlu1 %832  ;;  %v1438_v29 = vpop.permute.xlu0 %1437 }
 0x21b   : >> { %v1505_v39 = vmax.f32 %v1498_v8, 0.0  ;;  %v1255_v5 = vadd.f32 %v1240_v38, %v1156_v3  ;;  %v847_v33 = vadd.f32 %v833_v43, %v3576_v30 }
 0x21d   : >> { %2423 = vmatmul.mubr.msk.f32.gmra.mxu0 %vm1511_vm0, %v1505_v39  ;;  %2472 = vmatmul.mubr.msk.f32.gmra.mxu1 %vm1511_vm0, %v1505_v39 }
 0x21e   : >> { %v1436_v26 = vpop.permute.xlu1 %1435  ;;  %2425 = vmatprep.mubr.msk.f32.mxu0 %vm2552_vm5, %v3832_v42  ;;  %2474 = vmatprep.mubr.msk.f32.mxu1 %vm2552_vm5, %v3832_v42  ;;  %v962_v16 = vpop.permute.xlu0 %961 }
 0x21f   : >> { %v1452_v1 = vadd.f32 %v1436_v26, %v1353_v35  ;;  %v976_v31 = vadd.f32 %v962_v16, %v847_v33 }
 0x221   : >> { %v1459_v4 = vmax.f32 %v974_v48, %v1452_v1  ;;  %2426 = vmatmul.mubr.msk.f32.gmra.mxu0 %vm1511_vm0, %v1506_v22  ;;  %2475 = vmatmul.mubr.msk.f32.gmra.mxu1 %vm1511_vm0, %v1506_v22 }
 0x222   : >> { %v1339_v23 = vpop.permute.xlu1 %1338  ;;  %2428 = vmatprep.mubr.msk.f32.mxu0 %vm2552_vm5, %v3832_v42  ;;  %2477 = vmatprep.mubr.msk.f32.mxu1 %vm2552_vm5, %v3832_v42 }
 0x223   : >> { %v1501_v10 = vadd.f32 %v3512_v34, %v1459_v4  ;;  %v1354_v36 = vadd.f32 %v1339_v23, %v1255_v5 }
 0x225   : >> { %v1453_v37 = vadd.f32 %v1438_v29, %v1354_v36  ;;  %2429 = vmatmul.mubr.msk.f32.gmra.mxu0 %vm1511_vm0, %v1507_v12  ;;  %2478 = vmatmul.mubr.msk.f32.gmra.mxu1 %vm1511_vm0, %v1507_v12  ;;  %v1508_v46 = vmax.f32 %v1501_v10, 0.0 }
 0x226   : >> { %2431 = vmatprep.mubr.msk.f32.mxu0 %vm2552_vm5, %v3832_v42  ;;  %2480 = vmatprep.mubr.msk.f32.mxu1 %vm2552_vm5, %v3832_v42 }
 0x227   : >> { %v1460_v13 = vmax.f32 %v975_v7, %v1453_v37 }
 0x229   : >> { %v1502_v38 = vadd.f32 %v3411_v2, %v1460_v13  ;;  %2432 = vmatmul.mubr.msk.f32.gmra.mxu0 %vm1511_vm0, %v1508_v46  ;;  %2481 = vmatmul.mubr.msk.f32.gmra.mxu1 %vm1511_vm0, %v1508_v46  ;;  %v1256_v2 = vadd.f32 %v1242_v49, %v1157_v14 }
 0x22a   : >> { %2434 = vmatprep.mubr.msk.f32.mxu0 %vm2552_vm5, %v3832_v42  ;;  %2483 = vmatprep.mubr.msk.f32.mxu1 %vm2552_vm5, %v3832_v42 }
 0x22b   : >> { %v1509_v34 = vmax.f32 %v1502_v38, 0.0  ;;  %v1355_v32 = vadd.f32 %v1341_v17, %v1256_v2 }
 0x22d   : >> { %2435 = vmatmul.mubr.msk.f32.gmra.mxu0 %vm1511_vm0, %v1509_v34  ;;  %2484 = vmatmul.mubr.msk.f32.gmra.mxu1 %vm1511_vm0, %v1509_v34 }
 0x22e   : >> { %2437 = vmatprep.mubr.msk.f32.mxu0 %vm2552_vm5, %v3832_v42  ;;  %2486 = vmatprep.mubr.msk.f32.mxu1 %vm2552_vm5, %v3832_v42  ;;  %vm1749_vm5 = vcmask 433152  }
 0x22f   : >> { %v1495_v28 = vpop.permute.xlu1 %1494 }
 0x233   : >> { %v1440_v6 = vpop.permute.xlu1 %1439 }
 0x234   : >> { %v1454_v20 = vadd.f32 %v1440_v6, %v1355_v32 }
 0x236   : >> { %v1461_v0 = vmax.f32 %v976_v31, %v1454_v20 }
 0x238   : >> { %v1503_v11 = vadd.f32 %v1495_v28, %v1461_v0 }
 0x23a   : >> { %v1510_v27 = vmax.f32 %v1503_v11, 0.0 }
 0x23c   : >> { %2438 = vmatmul.mubr.msk.f32.gmra.mxu0 %vm1511_vm0, %v1510_v27  ;;  %2487 = vmatmul.mubr.msk.f32.gmra.mxu1 %vm1511_vm0, %v1510_v27 }
 0x2d3   : >> { %v1603_v63 = vpop.f32.mrf.mxu0  ;;  %v1706_v19 = vpop.f32.mrf.mxu1 }
 0x2d4   : >> { %v1740_v30 = vmax.f32 %v1603_v63, %v1706_v19 }
 0x2d5   : >> { %v2421_v25 = vpop.f32.mrf.mxu0  ;;  %v2470_v15 = vpop.f32.mrf.mxu1 }
 0x2d6   : >> { %1750 = vst.msk [vmem:[%s3647_s13] sm:$0xff] %vm1749_vm5, %v1740_v30 }
 0x2dd   : >> { %v1608_v44 = vpop.f32.mrf.mxu0  ;;  %v1711_v42 = vpop.f32.mrf.mxu1 }
 0x2de   : >> { %v1741_v45 = vmax.f32 %v1608_v44, %v1711_v42 }
 0x2df   : >> { %v2424_v47 = vpop.f32.mrf.mxu0  ;;  %v2473_v50 = vpop.f32.mrf.mxu1 }
 0x2e0   : >> { %1751 = vst.msk [vmem:[%s3647_s13 + $0x8] sm:$0xff] %vm1749_vm5, %v1741_v45 }
 0x2e1   : >> { %v1613_v49 = vpop.f32.mrf.mxu0  ;;  %v1716_v51 = vpop.f32.mrf.mxu1 }
 0x2e2   : >> { %v1742_v53 = vmax.f32 %v1613_v49, %v1716_v51 }
 0x2e3   : >> { %v2427_v52 = vpop.f32.mrf.mxu0  ;;  %v2476_v54 = vpop.f32.mrf.mxu1 }
 0x2e4   : >> { %1752 = vst.msk [vmem:[%s3647_s13 + $0x10] sm:$0xff] %vm1749_vm5, %v1742_v53 }
 0x2e5   : >> { %v1618_v18 = vpop.f32.mrf.mxu0  ;;  %v1721_v24 = vpop.f32.mrf.mxu1 }
 0x2e6   : >> { %v1743_v8 = vmax.f32 %v1618_v18, %v1721_v24 }
 0x2e7   : >> { %v2430_v43 = vpop.f32.mrf.mxu0  ;;  %v2479_v40 = vpop.f32.mrf.mxu1 }
 0x2e8   : >> { %1753 = vst.msk [vmem:[%s3647_s13 + $0x18] sm:$0xff] %vm1749_vm5, %v1743_v8 }
 0x2e9   : >> { %v1623_v21 = vpop.f32.mrf.mxu0  ;;  %v1726_v39 = vpop.f32.mrf.mxu1 }
 0x2ea   : >> { %v1744_v41 = vmax.f32 %v1623_v21, %v1726_v39 }
 0x2eb   : >> { %v2433_v35 = vpop.f32.mrf.mxu0  ;;  %v2482_v48 = vpop.f32.mrf.mxu1 }
 0x2ec   : >> { %1754 = vst.msk [vmem:[%s3647_s13 + $0x20] sm:$0xff] %vm1749_vm5, %v1744_v41 }
 0x2ed   : >> { %v1628_v17 = vpop.f32.mrf.mxu0  ;;  %v1731_v26 = vpop.f32.mrf.mxu1 }
 0x2ee   : >> { %v1745_v3 = vmax.f32 %v1628_v17, %v1731_v26 }
 0x2ef   : >> { %v2436_v22 = vpop.f32.mrf.mxu0  ;;  %v2485_v9 = vpop.f32.mrf.mxu1 }
 0x2f0   : >> { %1755 = vst.msk [vmem:[%s3647_s13 + $0x28] sm:$0xff] %vm1749_vm5, %v1745_v3 }
 0x2fb   : > { %325 = sbr.rel (!%p323_p4) target bundleno = 38 (0x26), region = 75 }
 0x2fc   : >> { %v1633_v1 = vpop.f32.mrf.mxu0  ;;  %v1736_v5 = vpop.f32.mrf.mxu1 }
 0x2fd   : >> { %v1746_v4 = vmax.f32 %v1633_v1, %v1736_v5 }
 0x2fe   : >> { %v2439_v23 = vpop.f32.mrf.mxu0  ;;  %v2488_v12 = vpop.f32.mrf.mxu1 }
 0x2ff   : >> { %1757 = vst.msk [vmem:[%s3647_s13 + $0x30] sm:$0x3] %vm1756_vm15, %v1746_v4 }
 0x300 PF: > { %s13_s12 = sadd.s32 1, %s2538_s12  }
 0x301   : > { %p10_p5 = scmp.ge.s32.totalorder %s13_s12, 4  }
 0x303   :  { %12 = sbr.rel (!%p10_p5) target bundleno = 1 (0x1), region = 86 }

// kernel: cnn_forward.5
= control target key start
LH: loop header
LB: loop body
LE: loop exit
PB: predicated region body
PF: predicated region fallthrough
CT: control target
= control target key end

     0   :  { %10 = vsyncpa [#allocation4], 0  ;;  %s9096_s0 = inlined_call_operand.vmem [shape: bf16[2,147456], index: 0, kind: input, shape index: {}]   ;;  %s9097_s1 = inlined_call_operand.hbm [shape: bf16[147456,128], index: 1, kind: input, shape index: {}]   ;;  %s9098_s2 = inlined_call_operand.vmem [shape: f32[1,128], index: 2, kind: input, shape index: {}]   ;;  %s9099_s3 = inlined_call_operand.vmem [shape: f32[128,10], index: 3, kind: input, shape index: {}]   ;;  %s9100_s4 = inlined_call_operand.vmem [shape: f32[1,10], index: 4, kind: input, shape index: {}]   ;;  %s9101_s5 = inlined_call_operand.hbm [shape: f32[2,10], index: 5, kind: output, shape index: {}]  }
   0x1   :  { %12 = vsyncpa [#allocation4 + $0x1], 0 }
   0x2   :  { %13 = vsyncpa [#allocation5], 0  ;;  %s8287_s18 = smov 0   ;;  %s8289_s19 = smov 0  }
   0x3   :  { %s8291_s20 = smov 0   ;;  %s8293_s21 = smov 0  }
   0x4 LB: > { %s8306_s22 = sadd.s32 4294967295, %s8247_s21   ;;  %s8309_s23 = sadd.s32 1, %s8247_s21   ;;  %s8247_s21 = sphi %s8293_s21, %s9110_s21   ;;  %s8243_s20 = sphi %s8291_s20, %s9109_s20   ;;  %s8239_s19 = sphi %s8289_s19, %s9108_s19   ;;  %s8235_s18 = sphi %s8287_s18, %s9107_s18  }
   0x5   : > { %s49_s24 = ssub.s32 %s8247_s21, %s8309_s23  ;;  %s52_s25 = sadd.s32 1, %s8243_s20 }
   0x6   : > { %p50_p0 = scmp.eq.s32.totalorder %s49_s24, 0  ;;  %p59_p1 = scmp.ne.s32.totalorder %s8243_s20, %s8239_s19 }
   0x7   : > { %p60_p2 = scmp.eq.s32.totalorder %s8247_s21, 0  ;;  %p65_p3 = scmp.ne.s32.totalorder %s8239_s19, %s8235_s18 }
   0x8   : > { %s8319_s26 = scalar_select %p50_p0, %s8243_s20, %s52_s25  }
   0x9   : > { %p61_p4 = por %p60_p2, %p59_p1  ;;  %p66_p5 = scmp.eq.s32.totalorder %s8306_s22, 0 }
   0xa   : > { %p7591_p6 = scmp.lt.s32.totalorder %s8247_s21, 18  ;;  %s190_s28 = sand.u32 1, %s8243_s20  }
   0xb   : > { %p8323_p7 = por %p66_p5, %p65_p3  ;;  %s6298_s29 = sshll.u32 %s190_s28, 12 }
   0xc   : > { %s6824_s30 = sshll.u32 %s8247_s21, 16  ;;  %s194_s9 = scalar_lea.vmem [#allocation3], %s6298_s29 }
   0xd   : > { %s9103_s27 = scalar_select %p8323_p7, 1, 0 }
   0xe   : > { %s8332_s8 = scalar_lea.hbm %s9097_s1, %s6824_s30  ;;  %s201_s10 = sshll.u32 %s194_s9, 4  ;;  %s8334_s10 = int_to_ptr.vmem [resolvable:$true] %s201_s10 }
   0xf   : > { %p8336_p8 = pnand %p7591_p6, %p61_p4  ;;  %s8341_s12 = scalar_lea.sflag [#allocation4], %s190_s28 }
  0x10   : > { %s8157_s13 = scalar_lea.hbm %s8332_s8, 65536  ;;  %s8162_s16 = scalar_lea.hbm %s9097_s1, 1179648 }
  0x11   : > { %p8158_p10 = scmp.ne.s32.totalorder %s8332_s8, %s8157_s13  ;;  %p8159_p11 = pneg %p8336_p8 }
  0x12   : > { %p8163_p0 = scmp.lt.s32.totalorder %s8332_s8, %s9097_s1  ;;  %p8164_p1 = scmp.lt.s32.totalorder %s8162_s16, %s8157_s13 }
  0x13   : > { %p8160_p12 = pnand %p8159_p11, %p8158_p10 }
  0x14   : > { %p8165_p2 = por %p8164_p1, %p8163_p0 }
  0x15   : > { %p8161_p13 = pneg %p8160_p12 }
  0x17   : > { %p8166_p3 = pnand %p8165_p2, %p8161_p13 }
  0x19   : > { %8169 = shalt.err (!%p8166_p3)
}
  0x1a   : > { %s8170_s24 = scalar_lea.vmem %s8334_s10, 65536  ;;  %s8249_s25 = smov [#allocation3]  }
  0x1b   : > { %p8171_p4 = scmp.ne.s32.totalorder %s8334_s10, %s8170_s24  ;;  %s8175_s28 = sshll.u32 %s8249_s25, 4  ;;  %s8176_s28 = int_to_ptr.vmem [resolvable:$false] %s8175_s28 }
  0x1c   : > { %s8177_s29 = scalar_lea.vmem %s8176_s28, 131072  ;;  %p8178_p10 = scmp.lt.s32.totalorder %s8334_s10, %s8176_s28 }
  0x1d   : > { %p8173_p5 = pnand %p8171_p4, %p8159_p11  ;;  %p8179_p12 = scmp.lt.s32.totalorder %s8177_s29, %s8170_s24 }
  0x1f   : > { %p8174_p6 = pneg %p8173_p5  ;;  %p8180_p9 = por %p8179_p12, %p8178_p10 }
  0x21   : > { %p8181_p7 = pnand %p8180_p9, %p8174_p6 }
  0x23   : > { %8184 = shalt.err (!%p8181_p7)
}
  0x24   : > { %s8250_s30 = smov 64   ;;  %s8251_s6 = smov 4  }
  0x25   : > { %7590 = dma.hbm_to_vmem [thread:$0]  (!%p8336_p8), %s8332_s8, 65536, %s8334_s10, %s8341_s12, %s8250_s30, %s8250_s30, %s8251_s6  }
  0x26   : > { %p209_p11 = scmp.lt.s32.totalorder %s8247_s21, 19  ;;  %p9105_p13 = scmp.ge.s32.totalorder %s8247_s21, 1 }
  0x28   : > { %p210_p0 = pnand %p9105_p13, %p209_p11 }
  0x29   : > { %s215_s7 = sand.u32 (!%p210_p0), 1, %s8239_s19   ;;  %p9106_p7 = scmp.ne.s32.totalorder (!%p210_p0), %s9103_s27, 0 }
  0x2a   : > { %213 = sbr.rel (%p210_p0) target bundleno = 1333 (0x535), region = 40  ;;  %s6302_s9 = sshll.u32 (!%p210_p0), %s215_s7, 12 }
  0x2b   : > { %s216_s13 = scalar_lea.sflag (!%p210_p0), [#allocation4], %s215_s7  ;;  %s8366_s14 = scalar_lea.vmem (!%p210_p0), [#allocation3], %s6302_s9 }
  0x2f   : > { %8226 = dma.done.wait (%p9106_p7), %s216_s13, 65536  }
  0x30   : > { %8228 = vsyncadd (%p9106_p7), %s216_s13, 4294901760  ;;  %s6303_s15 = sshll.u32 %s8306_s22, 6  ;;  %p6304_p8 = scmp.ne.s32.totalorder %s8306_s22, 0 }
  0x31   : > { %p246_p9 = scmp.lt.s32.totalorder %s6303_s15, 1151 }
  0x32   : > { %255 = sbr.rel (%p6304_p8) target bundleno = 57 (0x39), region = 48 }
  0x33   : > { %s9112_s15 = smov (!%p246_p9, %s6303_s15), 1151 }
  0x34   : > { %s8376_s10 = scalar_lea.vmem %s9096_s0, %s9112_s15 }
  0x37   : > { %v8252_v0 = vmov 0.0  }
  0x38   : > { %256 = vst [vmem:[#allocation2] sm:$0x3] %v8252_v0 }
  0x39 PF: > { %v7633_v1 = vld [vmem:[%s8366_s14 + $0x78] sm:$0xff]   ;;  %v7637_v5 = vld [vmem:[%s8366_s14 + $0x70] sm:$0xff]   ;;  %v7641_v9 = vld [vmem:[%s8366_s14 + $0x68] sm:$0xff]   ;;  %v1302_v29 = vlaneseq  ;;  %v8253_v37 = vmov 1966171168   ;;  %p6817_p1 = scmp.ne.s32.totalorder %s8306_s22, 17 }
  0x3a   : > { %v7634_v2 = vld [vmem:[%s8366_s14 + $0xf8] sm:$0xff]   ;;  %6825 = vmatprep.subr.bf16.mxu0 %v7633_v1  ;;  %v7638_v6 = vld [vmem:[%s8366_s14 + $0xf0] sm:$0xff]   ;;  %v7642_v10 = vld [vmem:[%s8366_s14 + $0xe8] sm:$0xff]   ;;  %v1300_v38 = vunpack.c.l.s4 %v8253_v37 }
  0x3b   : > { %v7635_v3 = vld [vmem:[%s8366_s14 + $0x38] sm:$0xff]   ;;  %6847 = vmatprep.subr.bf16.mxu1 %v7634_v2  ;;  %v7639_v7 = vld [vmem:[%s8366_s14 + $0x30] sm:$0xff]   ;;  %v7643_v11 = vld [vmem:[%s8366_s14 + $0x28] sm:$0xff]   ;;  %v1303_v34 = vshrl.u32 %v1302_v29, 7 }
  0x3c   : > { %v7636_v4 = vld [vmem:[%s8366_s14 + $0xb8] sm:$0xff]   ;;  %6826 = vmatpush3.bf16.msra.mxu0 %v7635_v3  ;;  %v7640_v8 = vld [vmem:[%s8366_s14 + $0xb0] sm:$0xff]   ;;  %v7644_v12 = vld [vmem:[%s8366_s14 + $0xa8] sm:$0xff]   ;;  %v1301_v41 = vunpack.c.0.s8 %v1300_v38 }
  0x3d   : > { %6848 = vmatpush3.bf16.msra.mxu1 %v7636_v4  ;;  %6827 = vmatprep.subr.bf16.mxu0 %v7637_v5  ;;  %v7645_v13 = vld [vmem:[%s8366_s14 + $0x60] sm:$0xff]   ;;  %v7649_v17 = vld [vmem:[%s8366_s14 + $0x58] sm:$0xff]   ;;  %v7653_v21 = vld [vmem:[%s8366_s14 + $0x50] sm:$0xff]  }
  0x3e   : > { %6849 = vmatprep.subr.bf16.mxu1 %v7638_v6  ;;  %v7646_v14 = vld [vmem:[%s8366_s14 + $0xe0] sm:$0xff]   ;;  %v7650_v18 = vld [vmem:[%s8366_s14 + $0xd8] sm:$0xff]   ;;  %v7654_v22 = vld [vmem:[%s8366_s14 + $0xd0] sm:$0xff]   ;;  %v8414_v42 = vsub.s32 %v1301_v41, %v1303_v34 }
  0x3f   : > { %v7647_v15 = vld [vmem:[%s8366_s14 + $0x20] sm:$0xff]   ;;  %v7651_v19 = vld [vmem:[%s8366_s14 + $0x18] sm:$0xff]   ;;  %v7655_v23 = vld [vmem:[%s8366_s14 + $0x10] sm:$0xff]  }
  0x40   : > { %6828 = vmatpush3.bf16.msra.mxu0 %v7639_v7  ;;  %v7648_v16 = vld [vmem:[%s8366_s14 + $0xa0] sm:$0xff]   ;;  %v7652_v20 = vld [vmem:[%s8366_s14 + $0x98] sm:$0xff]   ;;  %v7656_v24 = vld [vmem:[%s8366_s14 + $0x90] sm:$0xff]  }
  0x41   : > { %6850 = vmatpush3.bf16.msra.mxu1 %v7640_v8  ;;  %6829 = vmatprep.subr.bf16.mxu0 %v7641_v9  ;;  %v7657_v25 = vld [vmem:[%s8366_s14 + $0x48] sm:$0xff]   ;;  %v7661_v30 = vld [vmem:[%s8366_s14 + $0x40] sm:$0xff]   ;;  %v7666_v36 = vld [vmem:[%s8366_s14 + $0x178] sm:$0xff]  }
  0x42   : > { %6851 = vmatprep.subr.bf16.mxu1 %v7642_v10  ;;  %v7658_v26 = vld [vmem:[%s8366_s14 + $0xc8] sm:$0xff]   ;;  %v7662_v31 = vld [vmem:[%s8366_s14 + $0xc0] sm:$0xff]   ;;  %v7667_v39 = vld [vmem:[%s8366_s14 + $0x1f8] sm:$0xff]  }
  0x43   : > { %v7659_v27 = vld [vmem:[%s8366_s14 + $0x8] sm:$0xff]   ;;  %v7663_v32 = vld [vmem:[%s8366_s14] sm:$0xff]   ;;  %v7668_v48 = vld [vmem:[%s8366_s14 + $0x138] sm:$0xff]  }
  0x44   : > { %6830 = vmatpush3.bf16.msra.mxu0 %v7643_v11  ;;  %v7660_v28 = vld [vmem:[%s8366_s14 + $0x88] sm:$0xff]   ;;  %v7664_v33 = vld [vmem:[%s8366_s14 + $0x80] sm:$0xff]   ;;  %v7669_v50 = vld [vmem:[%s8366_s14 + $0x1b8] sm:$0xff]  }
  0x45   : > { %6852 = vmatpush3.bf16.msra.mxu1 %v7644_v12  ;;  %6831 = vmatprep.subr.bf16.mxu0 %v7645_v13  ;;  %v258_v35 = vld [vmem:[%s8376_s10] sm:$0xff]  ;;  %v7670_v53 = vld [vmem:[%s8366_s14 + $0x170] sm:$0xff]   ;;  %v7674_v59 = vld [vmem:[%s8366_s14 + $0x168] sm:$0xff]  }
  0x46   : > { %6853 = vmatprep.subr.bf16.mxu1 %v7646_v14  ;;  %v1298_v40 = vcombine.high %v258_v35, %v258_v35  ;;  %v1305_v43 = vrot.slane %v258_v35, %v8414_v42  ;;  %v7671_v55 = vld [vmem:[%s8366_s14 + $0x1f0] sm:$0xff]   ;;  %v7675_v60 = vld [vmem:[%s8366_s14 + $0x1e8] sm:$0xff]   ;;  %v7678_v63 = vld [vmem:[%s8366_s14 + $0x160] sm:$0xff]  }
  0x47   : > { %v7672_v56 = vld [vmem:[%s8366_s14 + $0x130] sm:$0xff]   ;;  %v7676_v61 = vld [vmem:[%s8366_s14 + $0x128] sm:$0xff]   ;;  %v7679_v0 = vld [vmem:[%s8366_s14 + $0x1e0] sm:$0xff]  }
  0x48   : > { %6832 = vmatpush3.bf16.msra.mxu0 %v7647_v15  ;;  %v8418_v44 = vrot.slane %v1298_v40, %v8414_v42  ;;  %v1313_v45 = vcombine.high %v1305_v43, %v1305_v43  ;;  %v1321_v46 = vrot.slane %v1305_v43, %v8414_v42  ;;  %v7673_v58 = vld [vmem:[%s8366_s14 + $0x1b0] sm:$0xff]   ;;  %v7677_v62 = vld [vmem:[%s8366_s14 + $0x1a8] sm:$0xff]   ;;  %v7680_v1 = vld [vmem:[%s8366_s14 + $0x120] sm:$0xff]  }
  0x49   : > { %6854 = vmatpush3.bf16.msra.mxu1 %v7648_v16  ;;  %6833 = vmatprep.subr.bf16.mxu0 %v7649_v17  ;;  %v7681_v2 = vld [vmem:[%s8366_s14 + $0x1a0] sm:$0xff]   ;;  %v7682_v3 = vld [vmem:[%s8366_s14 + $0x158] sm:$0xff]   ;;  %v7686_v7 = vld [vmem:[%s8366_s14 + $0x150] sm:$0xff]  }
  0x4a   : > { %6855 = vmatprep.subr.bf16.mxu1 %v7650_v18  ;;  %v1314_v47 = vcombine.high %v8418_v44, %v8418_v44  ;;  %v1335_v49 = vrot.slane %v1313_v45, %v8414_v42  ;;  %v1343_v52 = vcombine.high %v1321_v46, %v1321_v46  ;;  %v7683_v4 = vld [vmem:[%s8366_s14 + $0x1d8] sm:$0xff]   ;;  %v7687_v8 = vld [vmem:[%s8366_s14 + $0x1d0] sm:$0xff]   ;;  %v7690_v11 = vld [vmem:[%s8366_s14 + $0x148] sm:$0xff]  }
  0x4b   : > { %v7684_v5 = vld [vmem:[%s8366_s14 + $0x118] sm:$0xff]   ;;  %v7688_v9 = vld [vmem:[%s8366_s14 + $0x110] sm:$0xff]   ;;  %v7691_v12 = vld [vmem:[%s8366_s14 + $0x1c8] sm:$0xff]  }
  0x4c   : > { %6834 = vmatpush3.bf16.msra.mxu0 %v7651_v19  ;;  %v1342_v51 = vrot.slane %v1314_v47, %v8414_v42  ;;  %4858 = vmatprep.mubr.bf16.mxu0 %v1335_v49  ;;  %v1345_v54 = vcombine.high %v1335_v49, %v1335_v49  ;;  %v7685_v6 = vld [vmem:[%s8366_s14 + $0x198] sm:$0xff]   ;;  %v7689_v10 = vld [vmem:[%s8366_s14 + $0x190] sm:$0xff]   ;;  %v7692_v13 = vld [vmem:[%s8366_s14 + $0x108] sm:$0xff]   ;;  %v1328_v19 = vrot.slane %v8418_v44, %v8414_v42 }
  0x4d   : > { %6856 = vmatpush3.bf16.msra.mxu1 %v7652_v20  ;;  %6835 = vmatprep.subr.bf16.mxu0 %v7653_v21  ;;  %v7693_v14 = vld [vmem:[%s8366_s14 + $0x188] sm:$0xff]   ;;  %v7694_v15 = vld [vmem:[%s8366_s14 + $0x140] sm:$0xff]   ;;  %v7698_v20 = vld [vmem:[%s8366_s14 + $0x278] sm:$0xff]  }
  0x4e   : > { %6857 = vmatprep.subr.bf16.mxu1 %v7654_v22  ;;  %v1346_v57 = vcombine.high %v1342_v51, %v1342_v51  ;;  %4898 = vmatprep.mubr.bf16.mxu1 %v1345_v54  ;;  %v7695_v16 = vld [vmem:[%s8366_s14 + $0x1c0] sm:$0xff]   ;;  %v7699_v21 = vld [vmem:[%s8366_s14 + $0x2f8] sm:$0xff]   ;;  %v7706_v29 = vld [vmem:[%s8366_s14 + $0x268] sm:$0xff]  }
  0x4f   : > { %v7696_v17 = vld [vmem:[%s8366_s14 + $0x100] sm:$0xff]   ;;  %v7700_v22 = vld [vmem:[%s8366_s14 + $0x238] sm:$0xff]   ;;  %v7718_v41 = vld [vmem:[%s8366_s14 + $0x250] sm:$0xff]  }
  0x50   : > { %6836 = vmatpush3.bf16.msra.mxu0 %v7655_v23  ;;  %v7697_v18 = vld [vmem:[%s8366_s14 + $0x180] sm:$0xff]   ;;  %v7701_v23 = vld [vmem:[%s8366_s14 + $0x2b8] sm:$0xff]   ;;  %v7719_v43 = vld [vmem:[%s8366_s14 + $0x2d0] sm:$0xff]  }
  0x51   : > { %6858 = vmatpush3.bf16.msra.mxu1 %v7656_v24  ;;  %6837 = vmatprep.subr.bf16.mxu0 %v7657_v25  ;;  %v1344_v24 = vcombine.high %v1328_v19, %v1328_v19  ;;  %v7702_v25 = vld [vmem:[%s8366_s14 + $0x270] sm:$0xff]   ;;  %v7711_v34 = vld [vmem:[%s8366_s14 + $0x2e0] sm:$0xff]   ;;  %v7714_v37 = vld [vmem:[%s8366_s14 + $0x258] sm:$0xff]  }
  0x52   : > { %6859 = vmatprep.subr.bf16.mxu1 %v7658_v26  ;;  %v7703_v26 = vld [vmem:[%s8366_s14 + $0x2f0] sm:$0xff]   ;;  %v7712_v35 = vld [vmem:[%s8366_s14 + $0x220] sm:$0xff]   ;;  %v7715_v38 = vld [vmem:[%s8366_s14 + $0x2d8] sm:$0xff]  }
  0x53   : > { %v7717_v40 = vld [vmem:[%s8366_s14 + $0x298] sm:$0xff]   ;;  %v7720_v44 = vld [vmem:[%s8366_s14 + $0x210] sm:$0xff]   ;;  %v259_v47 = vld [vmem:[%s8376_s10 + $0x8] sm:$0xff] }
  0x54   : > { %6838 = vmatpush3.bf16.msra.mxu0 %v7659_v27  ;;  %v7704_v27 = vld [vmem:[%s8366_s14 + $0x230] sm:$0xff]   ;;  %v1354_v49 = vrot.slane %v259_v47, %v8414_v42 }
  0x55   : > { %6860 = vmatpush3.bf16.msra.mxu1 %v7660_v28  ;;  %6839 = vmatprep.subr.bf16.mxu0 %v7661_v30  ;;  %v7705_v28 = vld [vmem:[%s8366_s14 + $0x2b0] sm:$0xff]   ;;  %v7707_v30 = vld [vmem:[%s8366_s14 + $0x2e8] sm:$0xff]  }
  0x56   : > { %6861 = vmatprep.subr.bf16.mxu1 %v7662_v31  ;;  %v7708_v31 = vld [vmem:[%s8366_s14 + $0x228] sm:$0xff]   ;;  %v7721_v45 = vld [vmem:[%s8366_s14 + $0x290] sm:$0xff]  }
  0x58   : > { %6840 = vmatpush3.bf16.msra.mxu0 %v7663_v32  ;;  %v7709_v32 = vld [vmem:[%s8366_s14 + $0x2a8] sm:$0xff]  }
  0x59   : > { %6862 = vmatpush3.bf16.msra.mxu1 %v7664_v33  ;;  %6869 = vmatprep.subr.bf16.mxu0 %v7666_v36  ;;  %v7710_v33 = vld [vmem:[%s8366_s14 + $0x260] sm:$0xff]  }
  0x5a   : > { %6891 = vmatprep.subr.bf16.mxu1 %v7667_v39  ;;  %v7713_v36 = vld [vmem:[%s8366_s14 + $0x2a0] sm:$0xff]   ;;  %v7716_v39 = vld [vmem:[%s8366_s14 + $0x218] sm:$0xff]  }
  0x5b   : > { %4859 = vmatmul.mubr.bf16.vlgmr.msra.gmra.mxu0 %v1321_v46  ;;  %v7722_v46 = vld [vmem:[%s8366_s14 + $0x248] sm:$0xff]  }
  0x5c   : > { %6870 = vmatpush3.bf16.msra.mxu0 %v7668_v48  ;;  %4899 = vmatmul.mubr.bf16.vlgmr.msra.gmra.mxu1 %v1343_v52  ;;  %v7723_v48 = vld [vmem:[%s8366_s14 + $0x2c8] sm:$0xff]  }
  0x5d   : > { %6871 = vmatprep.subr.bf16.mxu0 %v7670_v53  ;;  %6892 = vmatpush3.bf16.msra.mxu1 %v7669_v50  ;;  %v1347_v50 = vcombine.high %v259_v47, %v259_v47  ;;  %v7725_v52 = vld [vmem:[%s8366_s14 + $0x288] sm:$0xff]   ;;  %v1362_v53 = vcombine.high %v1354_v49, %v1354_v49 }
  0x5e   : > { %4938 = vmatprep.mubr.bf16.mxu0 %v1342_v51  ;;  %6893 = vmatprep.subr.bf16.mxu1 %v7671_v55  ;;  %v7724_v51 = vld [vmem:[%s8366_s14 + $0x208] sm:$0xff]   ;;  %v7726_v55 = vld [vmem:[%s8366_s14 + $0x240] sm:$0xff]  }
  0x5f   : > { %4978 = vmatprep.mubr.bf16.mxu1 %v1346_v57  ;;  %v8488_v54 = vrot.slane %v1347_v50, %v8414_v42  ;;  %v1384_v57 = vrot.slane %v1362_v53, %v8414_v42  ;;  %v7773_v47 = vld [vmem:[%s8366_s14 + $0x428] sm:$0xff]   ;;  %v7776_v50 = vld [vmem:[%s8366_s14 + $0x4e0] sm:$0xff]   ;;  %v7779_v53 = vld [vmem:[%s8366_s14 + $0x458] sm:$0xff]  }
  0x60   : > { %6872 = vmatpush3.bf16.msra.mxu0 %v7672_v56  ;;  %v7727_v56 = vld [vmem:[%s8366_s14 + $0x2c0] sm:$0xff]  }
  0x61   : > { %6873 = vmatprep.subr.bf16.mxu0 %v7674_v59  ;;  %6894 = vmatpush3.bf16.msra.mxu1 %v7673_v58  ;;  %v1363_v58 = vcombine.high %v8488_v54, %v8488_v54  ;;  %v7728_v59 = vld [vmem:[%s8366_s14 + $0x200] sm:$0xff]  }
  0x62   : > { %6895 = vmatprep.subr.bf16.mxu1 %v7675_v60  ;;  %v7729_v60 = vld [vmem:[%s8366_s14 + $0x280] sm:$0xff]  }
  0x64   : > { %6874 = vmatpush3.bf16.msra.mxu0 %v7676_v61  ;;  %v1394_v61 = vcombine.high %v1384_v57, %v1384_v57 }
  0x65   : > { %6875 = vmatprep.subr.bf16.mxu0 %v7678_v63  ;;  %6896 = vmatpush3.bf16.msra.mxu1 %v7677_v62  ;;  %v1370_v62 = vrot.slane %v1354_v49, %v8414_v42  ;;  %v7730_v63 = vld [vmem:[%s8366_s14 + $0x378] sm:$0xff]   ;;  %v7775_v49 = vld [vmem:[%s8366_s14 + $0x460] sm:$0xff]  }
  0x66   : > { %6897 = vmatprep.subr.bf16.mxu1 %v7679_v0  ;;  %v7731_v0 = vld [vmem:[%s8366_s14 + $0x3f8] sm:$0xff]  }
  0x68   : > { %6876 = vmatpush3.bf16.msra.mxu0 %v7680_v1  ;;  %v1391_v1 = vrot.slane %v1363_v58, %v8414_v42  ;;  %v7784_v58 = vld [vmem:[%s8366_s14 + $0x4d0] sm:$0xff]  }
  0x69   : > { %6877 = vmatprep.subr.bf16.mxu0 %v7682_v3  ;;  %6898 = vmatpush3.bf16.msra.mxu1 %v7681_v2  ;;  %v7732_v2 = vld [vmem:[%s8366_s14 + $0x338] sm:$0xff]  }
  0x6a   : > { %6899 = vmatprep.subr.bf16.mxu1 %v7683_v4  ;;  %v7733_v3 = vld [vmem:[%s8366_s14 + $0x3b8] sm:$0xff]   ;;  %v1392_v4 = vcombine.high %v1370_v62, %v1370_v62 }
  0x6c   : > { %6878 = vmatpush3.bf16.msra.mxu0 %v7684_v5  ;;  %v7734_v5 = vld [vmem:[%s8366_s14 + $0x370] sm:$0xff]  }
  0x6d   : > { %6879 = vmatprep.subr.bf16.mxu0 %v7686_v7  ;;  %6900 = vmatpush3.bf16.msra.mxu1 %v7685_v6  ;;  %v7735_v6 = vld [vmem:[%s8366_s14 + $0x3f0] sm:$0xff]   ;;  %v1395_v7 = vcombine.high %v1391_v1, %v1391_v1 }
  0x6e   : > { %6901 = vmatprep.subr.bf16.mxu1 %v7687_v8  ;;  %v7736_v8 = vld [vmem:[%s8366_s14 + $0x330] sm:$0xff]  }
  0x70   : > { %6880 = vmatpush3.bf16.msra.mxu0 %v7688_v9  ;;  %v7737_v9 = vld [vmem:[%s8366_s14 + $0x3b0] sm:$0xff]  }
  0x71   : > { %6881 = vmatprep.subr.bf16.mxu0 %v7690_v11  ;;  %6902 = vmatpush3.bf16.msra.mxu1 %v7689_v10  ;;  %v7738_v10 = vld [vmem:[%s8366_s14 + $0x368] sm:$0xff]  }
  0x72   : > { %6903 = vmatprep.subr.bf16.mxu1 %v7691_v12  ;;  %v7739_v11 = vld [vmem:[%s8366_s14 + $0x3e8] sm:$0xff]  }
  0x73   : > { %v7740_v12 = vld [vmem:[%s8366_s14 + $0x328] sm:$0xff]  }
  0x74   : > { %6882 = vmatpush3.bf16.msra.mxu0 %v7692_v13  ;;  %v7741_v13 = vld [vmem:[%s8366_s14 + $0x3a8] sm:$0xff]  }
  0x75   : > { %6883 = vmatprep.subr.bf16.mxu0 %v7694_v15  ;;  %6904 = vmatpush3.bf16.msra.mxu1 %v7693_v14  ;;  %v7742_v14 = vld [vmem:[%s8366_s14 + $0x360] sm:$0xff]  }
  0x76   : > { %6905 = vmatprep.subr.bf16.mxu1 %v7695_v16  ;;  %v7743_v15 = vld [vmem:[%s8366_s14 + $0x3e0] sm:$0xff]  }
  0x77   : > { %v7744_v16 = vld [vmem:[%s8366_s14 + $0x320] sm:$0xff]  }
  0x78   : > { %6884 = vmatpush3.bf16.msra.mxu0 %v7696_v17  ;;  %v7745_v17 = vld [vmem:[%s8366_s14 + $0x3a0] sm:$0xff]  }
  0x79   : > { %6913 = vmatprep.subr.bf16.mxu0 %v7698_v20  ;;  %6906 = vmatpush3.bf16.msra.mxu1 %v7697_v18  ;;  %v7746_v18 = vld [vmem:[%s8366_s14 + $0x358] sm:$0xff]  }
  0x7a   : > { %6935 = vmatprep.subr.bf16.mxu1 %v7699_v21  ;;  %v7748_v20 = vld [vmem:[%s8366_s14 + $0x318] sm:$0xff]  }
  0x7b   : > { %4939 = vmatmul.mubr.bf16.vlgmr.msra.gmra.mxu0 %v1328_v19  ;;  %v7747_v19 = vld [vmem:[%s8366_s14 + $0x3d8] sm:$0xff]  }
  0x7c   : > { %6914 = vmatpush3.bf16.msra.mxu0 %v7700_v22  ;;  %4979 = vmatmul.mubr.bf16.vlgmr.msra.gmra.mxu1 %v1344_v24  ;;  %v7749_v21 = vld [vmem:[%s8366_s14 + $0x398] sm:$0xff]   ;;  %v7750_v22 = vld [vmem:[%s8366_s14 + $0x350] sm:$0xff]  }
  0x7d   : > { %6915 = vmatprep.subr.bf16.mxu0 %v7702_v25  ;;  %6936 = vmatpush3.bf16.msra.mxu1 %v7701_v23  ;;  %v7751_v23 = vld [vmem:[%s8366_s14 + $0x3d0] sm:$0xff]  }
  0x7e   : > { %6937 = vmatprep.subr.bf16.mxu1 %v7703_v26  ;;  %5018 = vmatprep.mubr.bf16.mxu0 %v1384_v57  ;;  %v7752_v24 = vld [vmem:[%s8366_s14 + $0x310] sm:$0xff]   ;;  %v7754_v26 = vld [vmem:[%s8366_s14 + $0x348] sm:$0xff]  }
  0x7f   : > { %5058 = vmatprep.mubr.bf16.mxu1 %v1394_v61  ;;  %v7753_v25 = vld [vmem:[%s8366_s14 + $0x390] sm:$0xff]   ;;  %v7787_v61 = vld [vmem:[%s8366_s14 + $0x448] sm:$0xff]  }
  0x80   : > { %6916 = vmatpush3.bf16.msra.mxu0 %v7704_v27  ;;  %v7755_v27 = vld [vmem:[%s8366_s14 + $0x3c8] sm:$0xff]   ;;  %v7783_v57 = vld [vmem:[%s8366_s14 + $0x450] sm:$0xff]  }
  0x81   : > { %6917 = vmatprep.subr.bf16.mxu0 %v7706_v29  ;;  %6938 = vmatpush3.bf16.msra.mxu1 %v7705_v28  ;;  %v7756_v28 = vld [vmem:[%s8366_s14 + $0x308] sm:$0xff]  }
  0x82   : > { %6939 = vmatprep.subr.bf16.mxu1 %v7707_v30  ;;  %v7757_v29 = vld [vmem:[%s8366_s14 + $0x388] sm:$0xff]   ;;  %v7758_v30 = vld [vmem:[%s8366_s14 + $0x340] sm:$0xff]  }
  0x84   : > { %6918 = vmatpush3.bf16.msra.mxu0 %v7708_v31  ;;  %v7759_v31 = vld [vmem:[%s8366_s14 + $0x3c0] sm:$0xff]  }
  0x85   : > { %6919 = vmatprep.subr.bf16.mxu0 %v7710_v33  ;;  %6940 = vmatpush3.bf16.msra.mxu1 %v7709_v32  ;;  %v7760_v32 = vld [vmem:[%s8366_s14 + $0x300] sm:$0xff]  }
  0x86   : > { %6941 = vmatprep.subr.bf16.mxu1 %v7711_v34  ;;  %v7761_v33 = vld [vmem:[%s8366_s14 + $0x380] sm:$0xff]   ;;  %v1377_v34 = vrot.slane %v8488_v54, %v8414_v42  ;;  %v7780_v54 = vld [vmem:[%s8366_s14 + $0x4d8] sm:$0xff]  }
  0x88   : > { %6920 = vmatpush3.bf16.msra.mxu0 %v7712_v35  ;;  %v7763_v35 = vld [vmem:[%s8366_s14 + $0x478] sm:$0xff]  }
  0x89   : > { %6921 = vmatprep.subr.bf16.mxu0 %v7714_v37  ;;  %6942 = vmatpush3.bf16.msra.mxu1 %v7713_v36  ;;  %v7764_v36 = vld [vmem:[%s8366_s14 + $0x4f8] sm:$0xff]  }
  0x8a   : > { %6943 = vmatprep.subr.bf16.mxu1 %v7715_v38  ;;  %v7765_v37 = vld [vmem:[%s8366_s14 + $0x438] sm:$0xff]  }
  0x8b   : > { %v7766_v38 = vld [vmem:[%s8366_s14 + $0x4b8] sm:$0xff]  }
  0x8c   : > { %6922 = vmatpush3.bf16.msra.mxu0 %v7716_v39  ;;  %v1393_v39 = vcombine.high %v1377_v34, %v1377_v34 }
  0x8d   : > { %6923 = vmatprep.subr.bf16.mxu0 %v7718_v41  ;;  %6944 = vmatpush3.bf16.msra.mxu1 %v7717_v40  ;;  %v7767_v40 = vld [vmem:[%s8366_s14 + $0x470] sm:$0xff]  }
  0x8e   : > { %6945 = vmatprep.subr.bf16.mxu1 %v7719_v43  ;;  %v7768_v41 = vld [vmem:[%s8366_s14 + $0x4f0] sm:$0xff]  }
  0x8f   : > { %v7769_v43 = vld [vmem:[%s8366_s14 + $0x430] sm:$0xff]  }
  0x90   : > { %6924 = vmatpush3.bf16.msra.mxu0 %v7720_v44  ;;  %v7770_v44 = vld [vmem:[%s8366_s14 + $0x4b0] sm:$0xff]  }
  0x91   : > { %6925 = vmatprep.subr.bf16.mxu0 %v7722_v46  ;;  %6946 = vmatpush3.bf16.msra.mxu1 %v7721_v45  ;;  %v7771_v45 = vld [vmem:[%s8366_s14 + $0x468] sm:$0xff]  }
  0x92   : > { %6947 = vmatprep.subr.bf16.mxu1 %v7723_v48  ;;  %v7772_v46 = vld [vmem:[%s8366_s14 + $0x4e8] sm:$0xff]  }
  0x93   : > { %v7774_v48 = vld [vmem:[%s8366_s14 + $0x4a8] sm:$0xff]  }
  0x94   : > { %6926 = vmatpush3.bf16.msra.mxu0 %v7724_v51  ;;  %v7777_v51 = vld [vmem:[%s8366_s14 + $0x420] sm:$0xff]  }
  0x95   : > { %6927 = vmatprep.subr.bf16.mxu0 %v7726_v55  ;;  %6948 = vmatpush3.bf16.msra.mxu1 %v7725_v52  ;;  %v7778_v52 = vld [vmem:[%s8366_s14 + $0x4a0] sm:$0xff]   ;;  %v7781_v55 = vld [vmem:[%s8366_s14 + $0x418] sm:$0xff]  }
  0x96   : > { %6949 = vmatprep.subr.bf16.mxu1 %v7727_v56  ;;  %v7782_v56 = vld [vmem:[%s8366_s14 + $0x498] sm:$0xff]  }
  0x98   : > { %6928 = vmatpush3.bf16.msra.mxu0 %v7728_v59  ;;  %v7785_v59 = vld [vmem:[%s8366_s14 + $0x410] sm:$0xff]  }
  0x99   : > { %6957 = vmatprep.subr.bf16.mxu0 %v7730_v63  ;;  %6950 = vmatpush3.bf16.msra.mxu1 %v7729_v60  ;;  %v7786_v60 = vld [vmem:[%s8366_s14 + $0x490] sm:$0xff]   ;;  %v7788_v63 = vld [vmem:[%s8366_s14 + $0x4c8] sm:$0xff]  }
  0x9a   : > { %6979 = vmatprep.subr.bf16.mxu1 %v7731_v0 }
  0x9b   : > { %5019 = vmatmul.mubr.bf16.vlgmr.msra.gmra.mxu0 %v1370_v62  ;;  %v260_v62 = vld [vmem:[%s8376_s10 + $0x10] sm:$0xff] }
  0x9c   : > { %6958 = vmatpush3.bf16.msra.mxu0 %v7732_v2  ;;  %5098 = vmatprep.mubr.bf16.mxu0 %v1391_v1  ;;  %v1403_v0 = vrot.slane %v260_v62, %v8414_v42  ;;  %v1396_v1 = vcombine.high %v260_v62, %v260_v62  ;;  %v7789_v2 = vld [vmem:[%s8366_s14 + $0x408] sm:$0xff]  }
  0x9d   : > { %5059 = vmatmul.mubr.bf16.vlgmr.msra.gmra.mxu1 %v1392_v4  ;;  %6959 = vmatprep.subr.bf16.mxu0 %v7734_v5  ;;  %v7838_v62 = vld [vmem:[%s8366_s14 + $0x628] sm:$0xff]  }
  0x9e   : > { %6980 = vmatpush3.bf16.msra.mxu1 %v7733_v3  ;;  %5138 = vmatprep.mubr.bf16.mxu1 %v1395_v7  ;;  %v7790_v3 = vld [vmem:[%s8366_s14 + $0x488] sm:$0xff]   ;;  %v1411_v4 = vcombine.high %v1403_v0, %v1403_v0  ;;  %v8564_v5 = vrot.slane %v1396_v1, %v8414_v42  ;;  %v7792_v7 = vld [vmem:[%s8366_s14 + $0x4c0] sm:$0xff]  }
  0x9f   : > { %6981 = vmatprep.subr.bf16.mxu1 %v7735_v6  ;;  %v7791_v6 = vld [vmem:[%s8366_s14 + $0x440] sm:$0xff]  }
  0xa0   : > { %6960 = vmatpush3.bf16.msra.mxu0 %v7736_v8  ;;  %v1433_v8 = vrot.slane %v1411_v4, %v8414_v42  ;;  %v7841_v1 = vld [vmem:[%s8366_s14 + $0x6e0] sm:$0xff]   ;;  %v7844_v4 = vld [vmem:[%s8366_s14 + $0x658] sm:$0xff]  }
  0xa1   : > { %6961 = vmatprep.subr.bf16.mxu0 %v7738_v10  ;;  %v7793_v10 = vld [vmem:[%s8366_s14 + $0x400] sm:$0xff]  }
  0xa2   : > { %6982 = vmatpush3.bf16.msra.mxu1 %v7737_v9  ;;  %v1412_v9 = vcombine.high %v8564_v5, %v8564_v5 }
  0xa3   : > { %6983 = vmatprep.subr.bf16.mxu1 %v7739_v11  ;;  %v7794_v11 = vld [vmem:[%s8366_s14 + $0x480] sm:$0xff]  }
  0xa4   : > { %6962 = vmatpush3.bf16.msra.mxu0 %v7740_v12  ;;  %v1443_v12 = vcombine.high %v1433_v8, %v1433_v8 }
  0xa5   : > { %6963 = vmatprep.subr.bf16.mxu0 %v7742_v14  ;;  %v7795_v14 = vld [vmem:[%s8366_s14 + $0x578] sm:$0xff]  }
  0xa6   : > { %6984 = vmatpush3.bf16.msra.mxu1 %v7741_v13  ;;  %v1419_v13 = vrot.slane %v1403_v0, %v8414_v42  ;;  %v7840_v0 = vld [vmem:[%s8366_s14 + $0x660] sm:$0xff]  }
  0xa7   : > { %6985 = vmatprep.subr.bf16.mxu1 %v7743_v15  ;;  %v7796_v15 = vld [vmem:[%s8366_s14 + $0x5f8] sm:$0xff]  }
  0xa8   : > { %6964 = vmatpush3.bf16.msra.mxu0 %v7744_v16  ;;  %v1440_v16 = vrot.slane %v1412_v9, %v8414_v42  ;;  %v7849_v9 = vld [vmem:[%s8366_s14 + $0x6d0] sm:$0xff]  }
  0xa9   : > { %6965 = vmatprep.subr.bf16.mxu0 %v7746_v18  ;;  %v7798_v18 = vld [vmem:[%s8366_s14 + $0x5b8] sm:$0xff]  }
  0xaa   : > { %6986 = vmatpush3.bf16.msra.mxu1 %v7745_v17  ;;  %v7797_v17 = vld [vmem:[%s8366_s14 + $0x538] sm:$0xff]  }
  0xab   : > { %6987 = vmatprep.subr.bf16.mxu1 %v7747_v19  ;;  %v1441_v19 = vcombine.high %v1419_v13, %v1419_v13 }
  0xac   : > { %6966 = vmatpush3.bf16.msra.mxu0 %v7748_v20  ;;  %v7799_v20 = vld [vmem:[%s8366_s14 + $0x570] sm:$0xff]  }
  0xad   : > { %6967 = vmatprep.subr.bf16.mxu0 %v7750_v22  ;;  %v1444_v22 = vcombine.high %v1440_v16, %v1440_v16 }
  0xae   : > { %6988 = vmatpush3.bf16.msra.mxu1 %v7749_v21  ;;  %v7800_v21 = vld [vmem:[%s8366_s14 + $0x5f0] sm:$0xff]  }
  0xaf   : > { %6989 = vmatprep.subr.bf16.mxu1 %v7751_v23  ;;  %v7801_v23 = vld [vmem:[%s8366_s14 + $0x530] sm:$0xff]  }
  0xb0   : > { %6968 = vmatpush3.bf16.msra.mxu0 %v7752_v24  ;;  %v7802_v24 = vld [vmem:[%s8366_s14 + $0x5b0] sm:$0xff]  }
  0xb1   : > { %6969 = vmatprep.subr.bf16.mxu0 %v7754_v26  ;;  %v7804_v26 = vld [vmem:[%s8366_s14 + $0x5e8] sm:$0xff]  }
  0xb2   : > { %6990 = vmatpush3.bf16.msra.mxu1 %v7753_v25  ;;  %v7803_v25 = vld [vmem:[%s8366_s14 + $0x568] sm:$0xff]  }
  0xb3   : > { %6991 = vmatprep.subr.bf16.mxu1 %v7755_v27  ;;  %v7805_v27 = vld [vmem:[%s8366_s14 + $0x528] sm:$0xff]  }
  0xb4   : > { %6970 = vmatpush3.bf16.msra.mxu0 %v7756_v28  ;;  %v7806_v28 = vld [vmem:[%s8366_s14 + $0x5a8] sm:$0xff]  }
  0xb5   : > { %6971 = vmatprep.subr.bf16.mxu0 %v7758_v30  ;;  %v7808_v30 = vld [vmem:[%s8366_s14 + $0x5e0] sm:$0xff]  }
  0xb6   : > { %6992 = vmatpush3.bf16.msra.mxu1 %v7757_v29  ;;  %v7807_v29 = vld [vmem:[%s8366_s14 + $0x560] sm:$0xff]  }
  0xb7   : > { %6993 = vmatprep.subr.bf16.mxu1 %v7759_v31  ;;  %v7809_v31 = vld [vmem:[%s8366_s14 + $0x520] sm:$0xff]  }
  0xb8   : > { %6972 = vmatpush3.bf16.msra.mxu0 %v7760_v32  ;;  %v7810_v32 = vld [vmem:[%s8366_s14 + $0x5a0] sm:$0xff]  }
  0xb9   : > { %7001 = vmatprep.subr.bf16.mxu0 %v7763_v35  ;;  %v7813_v35 = vld [vmem:[%s8366_s14 + $0x518] sm:$0xff]  }
  0xba   : > { %6994 = vmatpush3.bf16.msra.mxu1 %v7761_v33  ;;  %v7811_v33 = vld [vmem:[%s8366_s14 + $0x558] sm:$0xff]  }
  0xbb   : > { %5099 = vmatmul.mubr.bf16.vlgmr.msra.gmra.mxu0 %v1377_v34  ;;  %7023 = vmatprep.subr.bf16.mxu1 %v7764_v36  ;;  %v7812_v34 = vld [vmem:[%s8366_s14 + $0x5d8] sm:$0xff]  }
  0xbc   : > { %7002 = vmatpush3.bf16.msra.mxu0 %v7765_v37  ;;  %5178 = vmatprep.mubr.bf16.mxu0 %v1433_v8  ;;  %v7814_v36 = vld [vmem:[%s8366_s14 + $0x598] sm:$0xff]   ;;  %v7815_v37 = vld [vmem:[%s8366_s14 + $0x550] sm:$0xff]  }
  0xbd   : > { %5139 = vmatmul.mubr.bf16.vlgmr.msra.gmra.mxu1 %v1393_v39  ;;  %7003 = vmatprep.subr.bf16.mxu0 %v7767_v40  ;;  %v7817_v39 = vld [vmem:[%s8366_s14 + $0x510] sm:$0xff]  }
  0xbe   : > { %7024 = vmatpush3.bf16.msra.mxu1 %v7766_v38  ;;  %5218 = vmatprep.mubr.bf16.mxu1 %v1443_v12  ;;  %v7816_v38 = vld [vmem:[%s8366_s14 + $0x5d0] sm:$0xff]   ;;  %v7852_v12 = vld [vmem:[%s8366_s14 + $0x648] sm:$0xff]  }
  0xbf   : > { %7025 = vmatprep.subr.bf16.mxu1 %v7768_v41  ;;  %v7818_v40 = vld [vmem:[%s8366_s14 + $0x590] sm:$0xff]   ;;  %v7819_v41 = vld [vmem:[%s8366_s14 + $0x548] sm:$0xff]  }
  0xc0   : > { %7004 = vmatpush3.bf16.msra.mxu0 %v7769_v43  ;;  %v7820_v43 = vld [vmem:[%s8366_s14 + $0x5c8] sm:$0xff]   ;;  %v7848_v8 = vld [vmem:[%s8366_s14 + $0x650] sm:$0xff]  }
  0xc1   : > { %7005 = vmatprep.subr.bf16.mxu0 %v7771_v45  ;;  %v7822_v45 = vld [vmem:[%s8366_s14 + $0x588] sm:$0xff]  }
  0xc2   : > { %7026 = vmatpush3.bf16.msra.mxu1 %v7770_v44  ;;  %v7821_v44 = vld [vmem:[%s8366_s14 + $0x508] sm:$0xff]  }
  0xc3   : > { %7027 = vmatprep.subr.bf16.mxu1 %v7772_v46  ;;  %v7823_v46 = vld [vmem:[%s8366_s14 + $0x540] sm:$0xff]  }
  0xc4   : > { %7006 = vmatpush3.bf16.msra.mxu0 %v7773_v47  ;;  %v7824_v47 = vld [vmem:[%s8366_s14 + $0x5c0] sm:$0xff]  }
  0xc5   : > { %7007 = vmatprep.subr.bf16.mxu0 %v7775_v49  ;;  %v7826_v49 = vld [vmem:[%s8366_s14 + $0x580] sm:$0xff]  }
  0xc6   : > { %7028 = vmatpush3.bf16.msra.mxu1 %v7774_v48  ;;  %v7825_v48 = vld [vmem:[%s8366_s14 + $0x500] sm:$0xff]  }
  0xc7   : > { %7029 = vmatprep.subr.bf16.mxu1 %v7776_v50  ;;  %v1426_v50 = vrot.slane %v8564_v5, %v8414_v42  ;;  %v7845_v5 = vld [vmem:[%s8366_s14 + $0x6d8] sm:$0xff]  }
  0xc8   : > { %7008 = vmatpush3.bf16.msra.mxu0 %v7777_v51  ;;  %v7828_v51 = vld [vmem:[%s8366_s14 + $0x678] sm:$0xff]  }
  0xc9   : > { %7009 = vmatprep.subr.bf16.mxu0 %v7779_v53  ;;  %v7830_v53 = vld [vmem:[%s8366_s14 + $0x638] sm:$0xff]  }
  0xca   : > { %7030 = vmatpush3.bf16.msra.mxu1 %v7778_v52  ;;  %v7829_v52 = vld [vmem:[%s8366_s14 + $0x6f8] sm:$0xff]  }
  0xcb   : > { %7031 = vmatprep.subr.bf16.mxu1 %v7780_v54  ;;  %v7831_v54 = vld [vmem:[%s8366_s14 + $0x6b8] sm:$0xff]  }
  0xcc   : > { %7010 = vmatpush3.bf16.msra.mxu0 %v7781_v55  ;;  %v1442_v55 = vcombine.high %v1426_v50, %v1426_v50 }
  0xcd   : > { %7011 = vmatprep.subr.bf16.mxu0 %v7783_v57  ;;  %v7833_v57 = vld [vmem:[%s8366_s14 + $0x6f0] sm:$0xff]  }
  0xce   : > { %7032 = vmatpush3.bf16.msra.mxu1 %v7782_v56  ;;  %v7832_v56 = vld [vmem:[%s8366_s14 + $0x670] sm:$0xff]  }
  0xcf   : > { %7033 = vmatprep.subr.bf16.mxu1 %v7784_v58  ;;  %v7834_v58 = vld [vmem:[%s8366_s14 + $0x630] sm:$0xff]  }
  0xd0   : > { %7012 = vmatpush3.bf16.msra.mxu0 %v7785_v59  ;;  %v7835_v59 = vld [vmem:[%s8366_s14 + $0x6b0] sm:$0xff]  }
  0xd1   : > { %7013 = vmatprep.subr.bf16.mxu0 %v7787_v61  ;;  %v7837_v61 = vld [vmem:[%s8366_s14 + $0x6e8] sm:$0xff]  }
  0xd2   : > { %7034 = vmatpush3.bf16.msra.mxu1 %v7786_v60  ;;  %v7836_v60 = vld [vmem:[%s8366_s14 + $0x668] sm:$0xff]  }
  0xd3   : > { %7035 = vmatprep.subr.bf16.mxu1 %v7788_v63  ;;  %v7839_v63 = vld [vmem:[%s8366_s14 + $0x6a8] sm:$0xff]  }
  0xd4   : > { %7014 = vmatpush3.bf16.msra.mxu0 %v7789_v2  ;;  %v7842_v2 = vld [vmem:[%s8366_s14 + $0x620] sm:$0xff]  }
  0xd5   : > { %7015 = vmatprep.subr.bf16.mxu0 %v7791_v6  ;;  %v7846_v6 = vld [vmem:[%s8366_s14 + $0x618] sm:$0xff]  }
  0xd6   : > { %7036 = vmatpush3.bf16.msra.mxu1 %v7790_v3  ;;  %v7843_v3 = vld [vmem:[%s8366_s14 + $0x6a0] sm:$0xff]  }
  0xd7   : > { %7037 = vmatprep.subr.bf16.mxu1 %v7792_v7  ;;  %v7847_v7 = vld [vmem:[%s8366_s14 + $0x698] sm:$0xff]  }
  0xd8   : > { %7016 = vmatpush3.bf16.msra.mxu0 %v7793_v10  ;;  %v7850_v10 = vld [vmem:[%s8366_s14 + $0x610] sm:$0xff]  }
  0xd9   : > { %7045 = vmatprep.subr.bf16.mxu0 %v7795_v14  ;;  %v261_v14 = vld [vmem:[%s8376_s10 + $0x18] sm:$0xff] }
  0xda   : > { %7038 = vmatpush3.bf16.msra.mxu1 %v7794_v11  ;;  %v7851_v11 = vld [vmem:[%s8366_s14 + $0x690] sm:$0xff]  }
  0xdb   : > { %5179 = vmatmul.mubr.bf16.vlgmr.msra.gmra.mxu0 %v1419_v13  ;;  %7067 = vmatprep.subr.bf16.mxu1 %v7796_v15  ;;  %v7853_v13 = vld [vmem:[%s8366_s14 + $0x6c8] sm:$0xff]  }
  0xdc   : > { %7046 = vmatpush3.bf16.msra.mxu0 %v7797_v17  ;;  %5258 = vmatprep.mubr.bf16.mxu0 %v1440_v16  ;;  %v7854_v15 = vld [vmem:[%s8366_s14 + $0x608] sm:$0xff]   ;;  %v1452_v16 = vrot.slane %v261_v14, %v8414_v42  ;;  %v1445_v17 = vcombine.high %v261_v14, %v261_v14  ;;  %v7894_v14 = vld [vmem:[%s8366_s14 + $0x8f8] sm:$0xff]  }
  0xdd   : > { %5219 = vmatmul.mubr.bf16.vlgmr.msra.gmra.mxu1 %v1441_v19  ;;  %7047 = vmatprep.subr.bf16.mxu0 %v7799_v20  ;;  %v7856_v19 = vld [vmem:[%s8366_s14 + $0x640] sm:$0xff]  }
  0xde   : > { %7068 = vmatpush3.bf16.msra.mxu1 %v7798_v18  ;;  %5298 = vmatprep.mubr.bf16.mxu1 %v1444_v22  ;;  %v7855_v18 = vld [vmem:[%s8366_s14 + $0x688] sm:$0xff]   ;;  %v1460_v20 = vcombine.high %v1452_v16, %v1452_v16  ;;  %v7857_v22 = vld [vmem:[%s8366_s14 + $0x6c0] sm:$0xff]  }
  0xdf   : > { %7069 = vmatprep.subr.bf16.mxu1 %v7800_v21  ;;  %v8641_v21 = vrot.slane %v1445_v17, %v8414_v42 }
  0xe0   : > { %7048 = vmatpush3.bf16.msra.mxu0 %v7801_v23  ;;  %v7858_v23 = vld [vmem:[%s8366_s14 + $0x600] sm:$0xff]  }
  0xe1   : > { %7049 = vmatprep.subr.bf16.mxu0 %v7803_v25  ;;  %v1461_v25 = vcombine.high %v8641_v21, %v8641_v21 }
  0xe2   : > { %7070 = vmatpush3.bf16.msra.mxu1 %v7802_v24  ;;  %v1482_v24 = vrot.slane %v1460_v20, %v8414_v42 }
  0xe3   : > { %7071 = vmatprep.subr.bf16.mxu1 %v7804_v26  ;;  %v7859_v26 = vld [vmem:[%s8366_s14 + $0x680] sm:$0xff]  }
  0xe4   : > { %7050 = vmatpush3.bf16.msra.mxu0 %v7805_v27  ;;  %v1492_v27 = vcombine.high %v1482_v24, %v1482_v24 }
  0xe5   : > { %7051 = vmatprep.subr.bf16.mxu0 %v7807_v29  ;;  %v7860_v29 = vld [vmem:[%s8366_s14 + $0x778] sm:$0xff]  }
  0xe6   : > { %7072 = vmatpush3.bf16.msra.mxu1 %v7806_v28  ;;  %v1468_v28 = vrot.slane %v1452_v16, %v8414_v42  ;;  %v7896_v16 = vld [vmem:[%s8366_s14 + $0x8b8] sm:$0xff]  }
  0xe7   : > { %7073 = vmatprep.subr.bf16.mxu1 %v7808_v30  ;;  %v7861_v30 = vld [vmem:[%s8366_s14 + $0x7f8] sm:$0xff]  }
  0xe8   : > { %7052 = vmatpush3.bf16.msra.mxu0 %v7809_v31  ;;  %v1489_v31 = vrot.slane %v1461_v25, %v8414_v42  ;;  %v7901_v25 = vld [vmem:[%s8366_s14 + $0x868] sm:$0xff]  }
  0xe9   : > { %7053 = vmatprep.subr.bf16.mxu0 %v7811_v33  ;;  %v7863_v33 = vld [vmem:[%s8366_s14 + $0x7b8] sm:$0xff]  }
  0xea   : > { %7074 = vmatpush3.bf16.msra.mxu1 %v7810_v32  ;;  %v7862_v32 = vld [vmem:[%s8366_s14 + $0x738] sm:$0xff]  }
  0xeb   : > { %7075 = vmatprep.subr.bf16.mxu1 %v7812_v34  ;;  %v1490_v34 = vcombine.high %v1468_v28, %v1468_v28 }
  0xec   : > { %7054 = vmatpush3.bf16.msra.mxu0 %v7813_v35  ;;  %v7864_v35 = vld [vmem:[%s8366_s14 + $0x770] sm:$0xff]  }
  0xed   : > { %7055 = vmatprep.subr.bf16.mxu0 %v7815_v37  ;;  %v1493_v37 = vcombine.high %v1489_v31, %v1489_v31 }
  0xee   : > { %7076 = vmatpush3.bf16.msra.mxu1 %v7814_v36  ;;  %v7865_v36 = vld [vmem:[%s8366_s14 + $0x7f0] sm:$0xff]  }
  0xef   : > { %7077 = vmatprep.subr.bf16.mxu1 %v7816_v38 }
  0xf0   : > { %7056 = vmatpush3.bf16.msra.mxu0 %v7817_v39  ;;  %v7866_v39 = vld [vmem:[%s8366_s14 + $0x730] sm:$0xff]  }
  0xf1   : > { %7057 = vmatprep.subr.bf16.mxu0 %v7819_v41 }
  0xf2   : > { %7078 = vmatpush3.bf16.msra.mxu1 %v7818_v40  ;;  %v7867_v40 = vld [vmem:[%s8366_s14 + $0x7b0] sm:$0xff]  }
  0xf3   : > { %7079 = vmatprep.subr.bf16.mxu1 %v7820_v43 }
  0xf4   : > { %7058 = vmatpush3.bf16.msra.mxu0 %v7821_v44  ;;  %v7868_v44 = vld [vmem:[%s8366_s14 + $0x768] sm:$0xff]  }
  0xf5   : > { %7059 = vmatprep.subr.bf16.mxu0 %v7823_v46  ;;  %v7869_v46 = vld [vmem:[%s8366_s14 + $0x7e8] sm:$0xff]  }
  0xf6   : > { %7080 = vmatpush3.bf16.msra.mxu1 %v7822_v45 }
  0xf7   : > { %7081 = vmatprep.subr.bf16.mxu1 %v7824_v47 }
  0xf8   : > { %7060 = vmatpush3.bf16.msra.mxu0 %v7825_v48 }
  0xf9   : > { %7089 = vmatprep.subr.bf16.mxu0 %v7828_v51  ;;  %v7871_v51 = vld [vmem:[%s8366_s14 + $0x7a8] sm:$0xff]  }
  0xfa   : > { %7082 = vmatpush3.bf16.msra.mxu1 %v7826_v49  ;;  %v7870_v49 = vld [vmem:[%s8366_s14 + $0x728] sm:$0xff]  }
  0xfb   : > { %5259 = vmatmul.mubr.bf16.vlgmr.msra.gmra.mxu0 %v1426_v50  ;;  %7111 = vmatprep.subr.bf16.mxu1 %v7829_v52 }
  0xfc   : > { %7090 = vmatpush3.bf16.msra.mxu0 %v7830_v53  ;;  %5338 = vmatprep.mubr.bf16.mxu0 %v1482_v24 }
  0xfd   : > { %5299 = vmatmul.mubr.bf16.vlgmr.msra.gmra.mxu1 %v1442_v55  ;;  %7091 = vmatprep.subr.bf16.mxu0 %v7832_v56  ;;  %v7873_v56 = vld [vmem:[%s8366_s14 + $0x7e0] sm:$0xff]  }
  0xfe   : > { %7112 = vmatpush3.bf16.msra.mxu1 %v7831_v54  ;;  %5378 = vmatprep.mubr.bf16.mxu1 %v1492_v27  ;;  %v7872_v54 = vld [vmem:[%s8366_s14 + $0x760] sm:$0xff]   ;;  %v7902_v27 = vld [vmem:[%s8366_s14 + $0x8e8] sm:$0xff]  }
  0xff   : > { %7113 = vmatprep.subr.bf16.mxu1 %v7833_v57 }
 0x100   : > { %7092 = vmatpush3.bf16.msra.mxu0 %v7834_v58  ;;  %v7874_v58 = vld [vmem:[%s8366_s14 + $0x720] sm:$0xff]  }
 0x101   : > { %7093 = vmatprep.subr.bf16.mxu0 %v7836_v60  ;;  %v7876_v60 = vld [vmem:[%s8366_s14 + $0x758] sm:$0xff]  }
 0x102   : > { %7114 = vmatpush3.bf16.msra.mxu1 %v7835_v59  ;;  %v7875_v59 = vld [vmem:[%s8366_s14 + $0x7a0] sm:$0xff]  }
 0x103   : > { %7115 = vmatprep.subr.bf16.mxu1 %v7837_v61  ;;  %v7877_v61 = vld [vmem:[%s8366_s14 + $0x7d8] sm:$0xff]  }
 0x104   : > { %7094 = vmatpush3.bf16.msra.mxu0 %v7838_v62  ;;  %v7878_v62 = vld [vmem:[%s8366_s14 + $0x718] sm:$0xff]  }
 0x105   : > { %7095 = vmatprep.subr.bf16.mxu0 %v7840_v0  ;;  %v7880_v0 = vld [vmem:[%s8366_s14 + $0x750] sm:$0xff]  }
 0x106   : > { %7116 = vmatpush3.bf16.msra.mxu1 %v7839_v63  ;;  %v7879_v63 = vld [vmem:[%s8366_s14 + $0x798] sm:$0xff]  }
 0x107   : > { %7117 = vmatprep.subr.bf16.mxu1 %v7841_v1  ;;  %v7881_v1 = vld [vmem:[%s8366_s14 + $0x7d0] sm:$0xff]  }
 0x108   : > { %7096 = vmatpush3.bf16.msra.mxu0 %v7842_v2  ;;  %v7882_v2 = vld [vmem:[%s8366_s14 + $0x710] sm:$0xff]  }
 0x109   : > { %7097 = vmatprep.subr.bf16.mxu0 %v7844_v4  ;;  %v7884_v4 = vld [vmem:[%s8366_s14 + $0x748] sm:$0xff]  }
 0x10a   : > { %7118 = vmatpush3.bf16.msra.mxu1 %v7843_v3  ;;  %v7883_v3 = vld [vmem:[%s8366_s14 + $0x790] sm:$0xff]  }
 0x10b   : > { %7119 = vmatprep.subr.bf16.mxu1 %v7845_v5  ;;  %v7885_v5 = vld [vmem:[%s8366_s14 + $0x7c8] sm:$0xff]  }
 0x10c   : > { %7098 = vmatpush3.bf16.msra.mxu0 %v7846_v6  ;;  %v7886_v6 = vld [vmem:[%s8366_s14 + $0x708] sm:$0xff]  }
 0x10d   : > { %7099 = vmatprep.subr.bf16.mxu0 %v7848_v8  ;;  %v7888_v8 = vld [vmem:[%s8366_s14 + $0x740] sm:$0xff]  }
 0x10e   : > { %7120 = vmatpush3.bf16.msra.mxu1 %v7847_v7  ;;  %v7887_v7 = vld [vmem:[%s8366_s14 + $0x788] sm:$0xff]  }
 0x10f   : > { %7121 = vmatprep.subr.bf16.mxu1 %v7849_v9  ;;  %v7889_v9 = vld [vmem:[%s8366_s14 + $0x7c0] sm:$0xff]  }
 0x110   : > { %7100 = vmatpush3.bf16.msra.mxu0 %v7850_v10  ;;  %v7890_v10 = vld [vmem:[%s8366_s14 + $0x700] sm:$0xff]  }
 0x111   : > { %7101 = vmatprep.subr.bf16.mxu0 %v7852_v12  ;;  %v1475_v12 = vrot.slane %v8641_v21, %v8414_v42  ;;  %v7899_v21 = vld [vmem:[%s8366_s14 + $0x830] sm:$0xff]  }
 0x112   : > { %7122 = vmatpush3.bf16.msra.mxu1 %v7851_v11  ;;  %v7891_v11 = vld [vmem:[%s8366_s14 + $0x780] sm:$0xff]  }
 0x113   : > { %7123 = vmatprep.subr.bf16.mxu1 %v7853_v13  ;;  %v7893_v13 = vld [vmem:[%s8366_s14 + $0x878] sm:$0xff]   ;;  %v1491_v17 = vcombine.high %v1475_v12, %v1475_v12 }
 0x114   : > { %7102 = vmatpush3.bf16.msra.mxu0 %v7854_v15  ;;  %v7895_v15 = vld [vmem:[%s8366_s14 + $0x838] sm:$0xff]  }
 0x115   : > { %7103 = vmatprep.subr.bf16.mxu0 %v7856_v19  ;;  %v7898_v19 = vld [vmem:[%s8366_s14 + $0x8f0] sm:$0xff]  }
 0x116   : > { %7124 = vmatpush3.bf16.msra.mxu1 %v7855_v18  ;;  %v7897_v18 = vld [vmem:[%s8366_s14 + $0x870] sm:$0xff]  }
 0x117   : > { %7125 = vmatprep.subr.bf16.mxu1 %v7857_v22  ;;  %v7900_v22 = vld [vmem:[%s8366_s14 + $0x8b0] sm:$0xff]  }
 0x118   : > { %7104 = vmatpush3.bf16.msra.mxu0 %v7858_v23 }
 0x119   : > { %7133 = vmatprep.subr.bf16.mxu0 %v7860_v29 }
 0x11a   : > { %7126 = vmatpush3.bf16.msra.mxu1 %v7859_v26 }
 0x11b   : > { %v6841_v38 = vpop.f32.mrf.mxu0  ;;  %5339 = vmatmul.mubr.bf16.vlgmr.msra.gmra.mxu0 %v1468_v28  ;;  %7155 = vmatprep.subr.bf16.mxu1 %v7861_v30  ;;  %v7903_v30 = vld [vmem:[%s8366_s14 + $0x828] sm:$0xff]  }
 0x11c   : > { %7134 = vmatpush3.bf16.msra.mxu0 %v7862_v32  ;;  %5418 = vmatprep.mubr.bf16.mxu0 %v1489_v31  ;;  %v6863_v41 = vpop.f32.mrf.mxu1 }
 0x11d   : > { %5379 = vmatmul.mubr.bf16.vlgmr.msra.gmra.mxu1 %v1490_v34  ;;  %v6842_v43 = vpop.f32.mrf.mxu0  ;;  %7135 = vmatprep.subr.bf16.mxu0 %v7864_v35 }
 0x11e   : > { %7156 = vmatpush3.bf16.msra.mxu1 %v7863_v33  ;;  %v6843_v45 = vadd.f32 %v6842_v43, %v6841_v38  ;;  %5458 = vmatprep.mubr.bf16.mxu1 %v1493_v37  ;;  %v6864_v47 = vpop.f32.mrf.mxu1  ;;  %v7904_v33 = vld [vmem:[%s8366_s14 + $0x8a8] sm:$0xff]   ;;  %v7906_v38 = vld [vmem:[%s8366_s14 + $0x8e0] sm:$0xff]   ;;  %v7909_v43 = vld [vmem:[%s8366_s14 + $0x858] sm:$0xff]  }
 0x11f   : > { %v6844_v48 = vpop.f32.mrf.mxu0  ;;  %7157 = vmatprep.subr.bf16.mxu1 %v7865_v36  ;;  %v6865_v50 = vadd.f32 %v6864_v47, %v6863_v41  ;;  %v7905_v36 = vld [vmem:[%s8366_s14 + $0x860] sm:$0xff]   ;;  %v7913_v47 = vld [vmem:[%s8366_s14 + $0x850] sm:$0xff]  }
 0x120   : > { %7136 = vmatpush3.bf16.msra.mxu0 %v7866_v39  ;;  %v6866_v52 = vpop.f32.mrf.mxu1  ;;  %v7908_v41 = vld [vmem:[%s8366_s14 + $0x8a0] sm:$0xff]   ;;  %v7914_v48 = vld [vmem:[%s8366_s14 + $0x8d0] sm:$0xff]  }
 0x121   : > { %v6845_v53 = vpop.f32.mrf.mxu0  ;;  %7137 = vmatprep.subr.bf16.mxu0 %v7868_v44  ;;  %v8664_v55 = vadd.f32 %v6865_v50, %v6843_v45  ;;  %v7910_v44 = vld [vmem:[%s8366_s14 + $0x8d8] sm:$0xff]   ;;  %v7916_v50 = vld [vmem:[%s8366_s14 + $0x890] sm:$0xff]   ;;  %v7918_v52 = vld [vmem:[%s8366_s14 + $0x8c8] sm:$0xff]  }
 0x122   : > { %7158 = vmatpush3.bf16.msra.mxu1 %v7867_v40  ;;  %v6867_v57 = vpop.f32.mrf.mxu1  ;;  %v7907_v40 = vld [vmem:[%s8366_s14 + $0x820] sm:$0xff]   ;;  %v7911_v45 = vld [vmem:[%s8366_s14 + $0x818] sm:$0xff]  }
 0x123   : > { %7159 = vmatprep.subr.bf16.mxu1 %v7869_v46  ;;  %v7912_v46 = vld [vmem:[%s8366_s14 + $0x898] sm:$0xff]   ;;  %v7920_v57 = vld [vmem:[%s8366_s14 + $0x888] sm:$0xff]  }
 0x124   : > { %7138 = vmatpush3.bf16.msra.mxu0 %v7870_v49  ;;  %v7915_v49 = vld [vmem:[%s8366_s14 + $0x810] sm:$0xff]   ;;  %v262_v53 = vld [vmem:[%s8376_s10 + $0x20] sm:$0xff] }
 0x125   : > { %7139 = vmatprep.subr.bf16.mxu0 %v7872_v54  ;;  %v7919_v54 = vld [vmem:[%s8366_s14 + $0x808] sm:$0xff]  }
 0x126   : > { %7160 = vmatpush3.bf16.msra.mxu1 %v7871_v51  ;;  %v7917_v51 = vld [vmem:[%s8366_s14 + $0x848] sm:$0xff]  }
 0x127   : > { %7161 = vmatprep.subr.bf16.mxu1 %v7873_v56  ;;  %v1494_v56 = vcombine.high %v262_v53, %v262_v53 }
 0x128   : > { %7140 = vmatpush3.bf16.msra.mxu0 %v7874_v58  ;;  %v7921_v58 = vld [vmem:[%s8366_s14 + $0x840] sm:$0xff]  }
 0x129   : > { %7141 = vmatprep.subr.bf16.mxu0 %v7876_v60  ;;  %v8722_v60 = vrot.slane %v1494_v56, %v8414_v42  ;;  %v7961_v56 = vld [vmem:[%s8366_s14 + $0xab8] sm:$0xff]  }
 0x12a   : > { %7162 = vmatpush3.bf16.msra.mxu1 %v7875_v59 }
 0x12b   : > { %7163 = vmatprep.subr.bf16.mxu1 %v7877_v61  ;;  %v7922_v61 = vld [vmem:[%s8366_s14 + $0x8c0] sm:$0xff]  }
 0x12c   : > { %7142 = vmatpush3.bf16.msra.mxu0 %v7878_v62  ;;  %v7923_v62 = vld [vmem:[%s8366_s14 + $0x800] sm:$0xff]  }
 0x12d   : > { %7143 = vmatprep.subr.bf16.mxu0 %v7880_v0  ;;  %v1510_v0 = vcombine.high %v8722_v60, %v8722_v60 }
 0x12e   : > { %7164 = vmatpush3.bf16.msra.mxu1 %v7879_v63 }
 0x12f   : > { %7165 = vmatprep.subr.bf16.mxu1 %v7881_v1  ;;  %v7924_v1 = vld [vmem:[%s8366_s14 + $0x880] sm:$0xff]  }
 0x130   : > { %7144 = vmatpush3.bf16.msra.mxu0 %v7882_v2 }
 0x131   : > { %7145 = vmatprep.subr.bf16.mxu0 %v7884_v4  ;;  %v7925_v4 = vld [vmem:[%s8366_s14 + $0x978] sm:$0xff]  }
 0x132   : > { %7166 = vmatpush3.bf16.msra.mxu1 %v7883_v3 }
 0x133   : > { %7167 = vmatprep.subr.bf16.mxu1 %v7885_v5  ;;  %v7926_v5 = vld [vmem:[%s8366_s14 + $0x9f8] sm:$0xff]  }
 0x134   : > { %7146 = vmatpush3.bf16.msra.mxu0 %v7886_v6  ;;  %v1538_v6 = vrot.slane %v1510_v0, %v8414_v42 }
 0x135   : > { %7147 = vmatprep.subr.bf16.mxu0 %v7888_v8  ;;  %v7928_v8 = vld [vmem:[%s8366_s14 + $0x9b8] sm:$0xff]  }
 0x136   : > { %7168 = vmatpush3.bf16.msra.mxu1 %v7887_v7  ;;  %v7927_v7 = vld [vmem:[%s8366_s14 + $0x938] sm:$0xff]  }
 0x137   : > { %7169 = vmatprep.subr.bf16.mxu1 %v7889_v9 }
 0x138   : > { %7148 = vmatpush3.bf16.msra.mxu0 %v7890_v10  ;;  %v7929_v10 = vld [vmem:[%s8366_s14 + $0x970] sm:$0xff]  }
 0x139   : > { %7177 = vmatprep.subr.bf16.mxu0 %v7893_v13 }
 0x13a   : > { %7170 = vmatpush3.bf16.msra.mxu1 %v7891_v11  ;;  %v7930_v11 = vld [vmem:[%s8366_s14 + $0x9f0] sm:$0xff]  }
 0x13b   : > { %v6885_v20 = vpop.f32.mrf.mxu0  ;;  %5419 = vmatmul.mubr.bf16.vlgmr.msra.gmra.mxu0 %v1475_v12  ;;  %7199 = vmatprep.subr.bf16.mxu1 %v7894_v14  ;;  %v1542_v12 = vcombine.high %v1538_v6, %v1538_v6  ;;  %v7931_v14 = vld [vmem:[%s8366_s14 + $0x930] sm:$0xff]  }
 0x13c   : > { %7178 = vmatpush3.bf16.msra.mxu0 %v7895_v15  ;;  %v6907_v23 = vpop.f32.mrf.mxu1  ;;  %v7932_v15 = vld [vmem:[%s8366_s14 + $0x9b0] sm:$0xff]  }
 0x13d   : > { %5459 = vmatmul.mubr.bf16.vlgmr.msra.gmra.mxu1 %v1491_v17  ;;  %v6886_v24 = vpop.f32.mrf.mxu0  ;;  %7179 = vmatprep.subr.bf16.mxu0 %v7897_v18  ;;  %v7933_v18 = vld [vmem:[%s8366_s14 + $0x968] sm:$0xff]  }
 0x13e   : > { %7200 = vmatpush3.bf16.msra.mxu1 %v7896_v16  ;;  %v6887_v26 = vadd.f32 %v6886_v24, %v6885_v20  ;;  %v6908_v28 = vpop.f32.mrf.mxu1  ;;  %v7934_v20 = vld [vmem:[%s8366_s14 + $0x9e8] sm:$0xff]  }
 0x13f   : > { %v6888_v29 = vpop.f32.mrf.mxu0  ;;  %7201 = vmatprep.subr.bf16.mxu1 %v7898_v19  ;;  %v6909_v32 = vadd.f32 %v6908_v28, %v6907_v23  ;;  %v7935_v23 = vld [vmem:[%s8366_s14 + $0x928] sm:$0xff]  }
 0x140   : > { %v4941_v31 = vadd.f32 %v6887_v26, %v8664_v55  ;;  %7180 = vmatpush3.bf16.msra.mxu0 %v7899_v21  ;;  %v6910_v34 = vpop.f32.mrf.mxu1  ;;  %v1501_v55 = vrot.slane %v262_v53, %v8414_v42  ;;  %v7936_v26 = vld [vmem:[%s8366_s14 + $0x9a8] sm:$0xff]   ;;  %v7937_v29 = vld [vmem:[%s8366_s14 + $0x960] sm:$0xff]   ;;  %v7958_v53 = vld [vmem:[%s8366_s14 + $0xa78] sm:$0xff]  }
 0x141   : > { %v6889_v35 = vpop.f32.mrf.mxu0  ;;  %7181 = vmatprep.subr.bf16.mxu0 %v7901_v25  ;;  %v7940_v34 = vld [vmem:[%s8366_s14 + $0x9a0] sm:$0xff]  }
 0x142   : > { %v8701_v37 = vadd.f32 %v6909_v32, %v4941_v31  ;;  %7202 = vmatpush3.bf16.msra.mxu1 %v7900_v22  ;;  %v6911_v39 = vpop.f32.mrf.mxu1  ;;  %v1509_v59 = vcombine.high %v1501_v55, %v1501_v55  ;;  %v1517_v3 = vrot.slane %v1501_v55, %v8414_v42  ;;  %v7938_v31 = vld [vmem:[%s8366_s14 + $0x9e0] sm:$0xff]   ;;  %v7941_v35 = vld [vmem:[%s8366_s14 + $0x958] sm:$0xff]  }
 0x143   : > { %7203 = vmatprep.subr.bf16.mxu1 %v7902_v27  ;;  %v7945_v39 = vld [vmem:[%s8366_s14 + $0x950] sm:$0xff]   ;;  %v7960_v55 = vld [vmem:[%s8366_s14 + $0xa38] sm:$0xff]  }
 0x144   : > { %7182 = vmatpush3.bf16.msra.mxu0 %v7903_v30  ;;  %v1531_v63 = vrot.slane %v1509_v59, %v8414_v42  ;;  %v1539_v9 = vcombine.high %v1517_v3, %v1517_v3  ;;  %v7963_v59 = vld [vmem:[%s8366_s14 + $0xaf0] sm:$0xff]  }
 0x145   : > { %7183 = vmatprep.subr.bf16.mxu0 %v7905_v36  ;;  %v7942_v36 = vld [vmem:[%s8366_s14 + $0x9d8] sm:$0xff]  }
 0x146   : > { %7204 = vmatpush3.bf16.msra.mxu1 %v7904_v33  ;;  %5498 = vmatprep.mubr.bf16.mxu0 %v1531_v63  ;;  %v1541_v2 = vcombine.high %v1531_v63, %v1531_v63  ;;  %v7939_v33 = vld [vmem:[%s8366_s14 + $0x920] sm:$0xff]  }
 0x147   : > { %7205 = vmatprep.subr.bf16.mxu1 %v7906_v38  ;;  %v7944_v38 = vld [vmem:[%s8366_s14 + $0x998] sm:$0xff]  }
 0x148   : > { %7184 = vmatpush3.bf16.msra.mxu0 %v7907_v40  ;;  %5538 = vmatprep.mubr.bf16.mxu1 %v1541_v2  ;;  %v7946_v40 = vld [vmem:[%s8366_s14 + $0x9d0] sm:$0xff]  }
 0x149   : > { %7185 = vmatprep.subr.bf16.mxu0 %v7909_v43  ;;  %v7948_v43 = vld [vmem:[%s8366_s14 + $0x990] sm:$0xff]  }
 0x14a   : > { %7206 = vmatpush3.bf16.msra.mxu1 %v7908_v41  ;;  %v7947_v41 = vld [vmem:[%s8366_s14 + $0x910] sm:$0xff]  }
 0x14b   : > { %7207 = vmatprep.subr.bf16.mxu1 %v7910_v44  ;;  %v7949_v44 = vld [vmem:[%s8366_s14 + $0x948] sm:$0xff]  }
 0x14c   : > { %7186 = vmatpush3.bf16.msra.mxu0 %v7911_v45  ;;  %v7950_v45 = vld [vmem:[%s8366_s14 + $0x9c8] sm:$0xff]  }
 0x14d   : > { %7187 = vmatprep.subr.bf16.mxu0 %v7913_v47  ;;  %v7952_v47 = vld [vmem:[%s8366_s14 + $0x988] sm:$0xff]  }
 0x14e   : > { %7208 = vmatpush3.bf16.msra.mxu1 %v7912_v46  ;;  %v7951_v46 = vld [vmem:[%s8366_s14 + $0x908] sm:$0xff]  }
 0x14f   : > { %7209 = vmatprep.subr.bf16.mxu1 %v7914_v48  ;;  %v7953_v48 = vld [vmem:[%s8366_s14 + $0x940] sm:$0xff]  }
 0x150   : > { %7188 = vmatpush3.bf16.msra.mxu0 %v7915_v49  ;;  %v7954_v49 = vld [vmem:[%s8366_s14 + $0x9c0] sm:$0xff]  }
 0x151   : > { %7189 = vmatprep.subr.bf16.mxu0 %v7917_v51  ;;  %v7956_v51 = vld [vmem:[%s8366_s14 + $0x980] sm:$0xff]  }
 0x152   : > { %7210 = vmatpush3.bf16.msra.mxu1 %v7916_v50  ;;  %v7955_v50 = vld [vmem:[%s8366_s14 + $0x900] sm:$0xff]  }
 0x153   : > { %7211 = vmatprep.subr.bf16.mxu1 %v7918_v52  ;;  %v1524_v52 = vrot.slane %v8722_v60, %v8414_v42  ;;  %v7964_v60 = vld [vmem:[%s8366_s14 + $0xa30] sm:$0xff]  }
 0x154   : > { %7190 = vmatpush3.bf16.msra.mxu0 %v7919_v54  ;;  %v7959_v54 = vld [vmem:[%s8366_s14 + $0xaf8] sm:$0xff]  }
 0x155   : > { %7191 = vmatprep.subr.bf16.mxu0 %v7921_v58  ;;  %v7962_v58 = vld [vmem:[%s8366_s14 + $0xa70] sm:$0xff]  }
 0x156   : > { %7212 = vmatpush3.bf16.msra.mxu1 %v7920_v57  ;;  %v1540_v57 = vcombine.high %v1524_v52, %v1524_v52 }
 0x157   : > { %7213 = vmatprep.subr.bf16.mxu1 %v7922_v61 }
 0x158   : > { %7192 = vmatpush3.bf16.msra.mxu0 %v7923_v62  ;;  %v7965_v62 = vld [vmem:[%s8366_s14 + $0xab0] sm:$0xff]  }
 0x159   : > { %7221 = vmatprep.subr.bf16.mxu0 %v7925_v4 }
 0x15a   : > { %7214 = vmatpush3.bf16.msra.mxu1 %v7924_v1  ;;  %v7966_v1 = vld [vmem:[%s8366_s14 + $0xa68] sm:$0xff]  }
 0x15b   : > { %v6929_v13 = vpop.f32.mrf.mxu0  ;;  %5499 = vmatmul.mubr.bf16.vlgmr.msra.gmra.mxu0 %v1517_v3  ;;  %7243 = vmatprep.subr.bf16.mxu1 %v7926_v5  ;;  %v7967_v3 = vld [vmem:[%s8366_s14 + $0xae8] sm:$0xff]  }
 0x15c   : > { %7222 = vmatpush3.bf16.msra.mxu0 %v7927_v7  ;;  %5578 = vmatprep.mubr.bf16.mxu0 %v1538_v6  ;;  %v7968_v6 = vld [vmem:[%s8366_s14 + $0xa28] sm:$0xff]  }
 0x15d   : > { %v6951_v16 = vpop.f32.mrf.mxu1  ;;  %5539 = vmatmul.mubr.bf16.vlgmr.msra.gmra.mxu1 %v1539_v9  ;;  %v6930_v17 = vpop.f32.mrf.mxu0  ;;  %7223 = vmatprep.subr.bf16.mxu0 %v7929_v10  ;;  %v7969_v9 = vld [vmem:[%s8366_s14 + $0xaa8] sm:$0xff]  }
 0x15e   : > { %7244 = vmatpush3.bf16.msra.mxu1 %v7928_v8  ;;  %v6931_v19 = vadd.f32 %v6930_v17, %v6929_v13  ;;  %5618 = vmatprep.mubr.bf16.mxu1 %v1542_v12  ;;  %v7970_v12 = vld [vmem:[%s8366_s14 + $0xa60] sm:$0xff]  }
 0x15f   : > { %v6952_v21 = vpop.f32.mrf.mxu1  ;;  %v6932_v22 = vpop.f32.mrf.mxu0  ;;  %7245 = vmatprep.subr.bf16.mxu1 %v7930_v11  ;;  %v7973_v17 = vld [vmem:[%s8366_s14 + $0xaa0] sm:$0xff]  }
 0x160   : > { %v5021_v24 = vadd.f32 %v6931_v19, %v8701_v37  ;;  %v6953_v25 = vadd.f32 %v6952_v21, %v6951_v16  ;;  %7224 = vmatpush3.bf16.msra.mxu0 %v7931_v14  ;;  %v7943_v37 = vld [vmem:[%s8366_s14 + $0x918] sm:$0xff]   ;;  %v7971_v14 = vld [vmem:[%s8366_s14 + $0xae0] sm:$0xff]   ;;  %v7978_v22 = vld [vmem:[%s8366_s14 + $0xa50] sm:$0xff]  }
 0x161   : > { %v6954_v27 = vpop.f32.mrf.mxu1  ;;  %v6933_v28 = vpop.f32.mrf.mxu0  ;;  %7225 = vmatprep.subr.bf16.mxu0 %v7933_v18  ;;  %v7972_v16 = vld [vmem:[%s8366_s14 + $0xa20] sm:$0xff]   ;;  %v7974_v18 = vld [vmem:[%s8366_s14 + $0xa58] sm:$0xff]  }
 0x162   : > { %v8746_v30 = vadd.f32 %v6953_v25, %v5021_v24  ;;  %7246 = vmatpush3.bf16.msra.mxu1 %v7932_v15  ;;  %v7975_v19 = vld [vmem:[%s8366_s14 + $0xad8] sm:$0xff]   ;;  %v7980_v24 = vld [vmem:[%s8366_s14 + $0xa10] sm:$0xff]   ;;  %v7983_v27 = vld [vmem:[%s8366_s14 + $0xac8] sm:$0xff]  }
 0x163   : > { %v6955_v32 = vpop.f32.mrf.mxu1  ;;  %7247 = vmatprep.subr.bf16.mxu1 %v7934_v20  ;;  %v7976_v20 = vld [vmem:[%s8366_s14 + $0xa18] sm:$0xff]   ;;  %v7981_v25 = vld [vmem:[%s8366_s14 + $0xa90] sm:$0xff]   ;;  %v263_v28 = vld [vmem:[%s8376_s10 + $0x28] sm:$0xff] }
 0x164   : > { %7226 = vmatpush3.bf16.msra.mxu0 %v7935_v23  ;;  %v7977_v21 = vld [vmem:[%s8366_s14 + $0xa98] sm:$0xff]   ;;  %v7979_v23 = vld [vmem:[%s8366_s14 + $0xad0] sm:$0xff]   ;;  %v7985_v32 = vld [vmem:[%s8366_s14 + $0xa88] sm:$0xff]  }
 0x165   : > { %7227 = vmatprep.subr.bf16.mxu0 %v7937_v29  ;;  %v7984_v29 = vld [vmem:[%s8366_s14 + $0xa08] sm:$0xff]  }
 0x166   : > { %7248 = vmatpush3.bf16.msra.mxu1 %v7936_v26  ;;  %v7982_v26 = vld [vmem:[%s8366_s14 + $0xa48] sm:$0xff]  }
 0x167   : > { %7249 = vmatprep.subr.bf16.mxu1 %v7938_v31  ;;  %v1543_v31 = vcombine.high %v263_v28, %v263_v28 }
 0x168   : > { %7228 = vmatpush3.bf16.msra.mxu0 %v7939_v33  ;;  %v7986_v33 = vld [vmem:[%s8366_s14 + $0xa40] sm:$0xff]  }
 0x169   : > { %7229 = vmatprep.subr.bf16.mxu0 %v7941_v35  ;;  %v8804_v35 = vrot.slane %v1543_v31, %v8414_v42  ;;  %v8026_v31 = vld [vmem:[%s8366_s14 + $0xcb8] sm:$0xff]  }
 0x16a   : > { %7250 = vmatpush3.bf16.msra.mxu1 %v7940_v34 }
 0x16b   : > { %7251 = vmatprep.subr.bf16.mxu1 %v7942_v36  ;;  %v7987_v36 = vld [vmem:[%s8366_s14 + $0xac0] sm:$0xff]  }
 0x16c   : > { %7230 = vmatpush3.bf16.msra.mxu0 %v7943_v37  ;;  %v7988_v37 = vld [vmem:[%s8366_s14 + $0xa00] sm:$0xff]  }
 0x16d   : > { %7231 = vmatprep.subr.bf16.mxu0 %v7945_v39  ;;  %v1559_v39 = vcombine.high %v8804_v35, %v8804_v35 }
 0x16e   : > { %7252 = vmatpush3.bf16.msra.mxu1 %v7944_v38 }
 0x16f   : > { %7253 = vmatprep.subr.bf16.mxu1 %v7946_v40  ;;  %v7989_v40 = vld [vmem:[%s8366_s14 + $0xa80] sm:$0xff]  }
 0x170   : > { %7232 = vmatpush3.bf16.msra.mxu0 %v7947_v41 }
 0x171   : > { %7233 = vmatprep.subr.bf16.mxu0 %v7949_v44  ;;  %v7990_v44 = vld [vmem:[%s8366_s14 + $0xb78] sm:$0xff]  }
 0x172   : > { %7254 = vmatpush3.bf16.msra.mxu1 %v7948_v43 }
 0x173   : > { %7255 = vmatprep.subr.bf16.mxu1 %v7950_v45  ;;  %v7991_v45 = vld [vmem:[%s8366_s14 + $0xbf8] sm:$0xff]  }
 0x174   : > { %7234 = vmatpush3.bf16.msra.mxu0 %v7951_v46  ;;  %v1587_v46 = vrot.slane %v1559_v39, %v8414_v42 }
 0x175   : > { %7235 = vmatprep.subr.bf16.mxu0 %v7953_v48  ;;  %v7993_v48 = vld [vmem:[%s8366_s14 + $0xbb8] sm:$0xff]  }
 0x176   : > { %7256 = vmatpush3.bf16.msra.mxu1 %v7952_v47  ;;  %v7992_v47 = vld [vmem:[%s8366_s14 + $0xb38] sm:$0xff]  }
 0x177   : > { %7257 = vmatprep.subr.bf16.mxu1 %v7954_v49 }
 0x178   : > { %7236 = vmatpush3.bf16.msra.mxu0 %v7955_v50  ;;  %v7994_v50 = vld [vmem:[%s8366_s14 + $0xb70] sm:$0xff]  }
 0x179   : > { %7265 = vmatprep.subr.bf16.mxu0 %v7958_v53 }
 0x17a   : > { %7258 = vmatpush3.bf16.msra.mxu1 %v7956_v51  ;;  %v7995_v51 = vld [vmem:[%s8366_s14 + $0xbf0] sm:$0xff]  }
 0x17b   : > { %v6973_v61 = vpop.f32.mrf.mxu0  ;;  %5579 = vmatmul.mubr.bf16.vlgmr.msra.gmra.mxu0 %v1524_v52  ;;  %7287 = vmatprep.subr.bf16.mxu1 %v7959_v54  ;;  %v1591_v52 = vcombine.high %v1587_v46, %v1587_v46  ;;  %v7996_v54 = vld [vmem:[%s8366_s14 + $0xb30] sm:$0xff]  }
 0x17c   : > { %7266 = vmatpush3.bf16.msra.mxu0 %v7960_v55  ;;  %v7997_v55 = vld [vmem:[%s8366_s14 + $0xbb0] sm:$0xff]  }
 0x17d   : > { %v6995_v63 = vpop.f32.mrf.mxu1  ;;  %5619 = vmatmul.mubr.bf16.vlgmr.msra.gmra.mxu1 %v1540_v57  ;;  %v6974_v0 = vpop.f32.mrf.mxu0  ;;  %7267 = vmatprep.subr.bf16.mxu0 %v7962_v58  ;;  %v7998_v58 = vld [vmem:[%s8366_s14 + $0xb68] sm:$0xff]  }
 0x17e   : > { %7288 = vmatpush3.bf16.msra.mxu1 %v7961_v56  ;;  %v6975_v2 = vadd.f32 %v6974_v0, %v6973_v61  ;;  %v7999_v61 = vld [vmem:[%s8366_s14 + $0xbe8] sm:$0xff]  }
 0x17f   : > { %v6996_v4 = vpop.f32.mrf.mxu1  ;;  %v6976_v5 = vpop.f32.mrf.mxu0  ;;  %7289 = vmatprep.subr.bf16.mxu1 %v7963_v59 }
 0x180   : > { %v5101_v7 = vadd.f32 %v6975_v2, %v8746_v30  ;;  %v6997_v8 = vadd.f32 %v6996_v4, %v6995_v63  ;;  %7268 = vmatpush3.bf16.msra.mxu0 %v7964_v60  ;;  %v1550_v30 = vrot.slane %v263_v28, %v8414_v42  ;;  %v8000_v63 = vld [vmem:[%s8366_s14 + $0xb28] sm:$0xff]   ;;  %v8002_v5 = vld [vmem:[%s8366_s14 + $0xb60] sm:$0xff]   ;;  %v8023_v28 = vld [vmem:[%s8366_s14 + $0xc78] sm:$0xff]  }
 0x181   : > { %v6998_v10 = vpop.f32.mrf.mxu1  ;;  %v6977_v11 = vpop.f32.mrf.mxu0  ;;  %7269 = vmatprep.subr.bf16.mxu0 %v7966_v1  ;;  %v8001_v2 = vld [vmem:[%s8366_s14 + $0xba8] sm:$0xff]  }
 0x182   : > { %v8783_v13 = vadd.f32 %v6997_v8, %v5101_v7  ;;  %7290 = vmatpush3.bf16.msra.mxu1 %v7965_v62  ;;  %v1558_v34 = vcombine.high %v1550_v30, %v1550_v30  ;;  %v1566_v43 = vrot.slane %v1550_v30, %v8414_v42  ;;  %v8003_v7 = vld [vmem:[%s8366_s14 + $0xbe0] sm:$0xff]   ;;  %v8006_v11 = vld [vmem:[%s8366_s14 + $0xb58] sm:$0xff]  }
 0x183   : > { %v6999_v15 = vpop.f32.mrf.mxu1  ;;  %7291 = vmatprep.subr.bf16.mxu1 %v7967_v3  ;;  %v8005_v10 = vld [vmem:[%s8366_s14 + $0xba0] sm:$0xff]   ;;  %v8025_v30 = vld [vmem:[%s8366_s14 + $0xc38] sm:$0xff]  }
 0x184   : > { %7270 = vmatpush3.bf16.msra.mxu0 %v7968_v6  ;;  %v1580_v38 = vrot.slane %v1558_v34, %v8414_v42  ;;  %v1588_v49 = vcombine.high %v1566_v43, %v1566_v43  ;;  %v8010_v15 = vld [vmem:[%s8366_s14 + $0xb50] sm:$0xff]  }
 0x185   : > { %7271 = vmatprep.subr.bf16.mxu0 %v7970_v12  ;;  %v8007_v12 = vld [vmem:[%s8366_s14 + $0xbd8] sm:$0xff]   ;;  %v8028_v34 = vld [vmem:[%s8366_s14 + $0xcf0] sm:$0xff]  }
 0x186   : > { %7292 = vmatpush3.bf16.msra.mxu1 %v7969_v9  ;;  %5658 = vmatprep.mubr.bf16.mxu0 %v1580_v38  ;;  %v1590_v41 = vcombine.high %v1580_v38, %v1580_v38  ;;  %v8004_v9 = vld [vmem:[%s8366_s14 + $0xb20] sm:$0xff]  }
 0x187   : > { %7293 = vmatprep.subr.bf16.mxu1 %v7971_v14  ;;  %v8009_v14 = vld [vmem:[%s8366_s14 + $0xb98] sm:$0xff]  }
 0x188   : > { %7272 = vmatpush3.bf16.msra.mxu0 %v7972_v16  ;;  %5698 = vmatprep.mubr.bf16.mxu1 %v1590_v41  ;;  %v8011_v16 = vld [vmem:[%s8366_s14 + $0xbd0] sm:$0xff]  }
 0x189   : > { %7273 = vmatprep.subr.bf16.mxu0 %v7974_v18  ;;  %v8013_v18 = vld [vmem:[%s8366_s14 + $0xb90] sm:$0xff]  }
 0x18a   : > { %7294 = vmatpush3.bf16.msra.mxu1 %v7973_v17  ;;  %v8012_v17 = vld [vmem:[%s8366_s14 + $0xb10] sm:$0xff]  }
 0x18b   : > { %7295 = vmatprep.subr.bf16.mxu1 %v7975_v19  ;;  %v8014_v19 = vld [vmem:[%s8366_s14 + $0xb48] sm:$0xff]  }
 0x18c   : > { %7274 = vmatpush3.bf16.msra.mxu0 %v7976_v20  ;;  %v8015_v20 = vld [vmem:[%s8366_s14 + $0xbc8] sm:$0xff]  }
 0x18d   : > { %7275 = vmatprep.subr.bf16.mxu0 %v7978_v22  ;;  %v8017_v22 = vld [vmem:[%s8366_s14 + $0xb88] sm:$0xff]  }
 0x18e   : > { %7296 = vmatpush3.bf16.msra.mxu1 %v7977_v21  ;;  %v8016_v21 = vld [vmem:[%s8366_s14 + $0xb08] sm:$0xff]  }
 0x18f   : > { %7297 = vmatprep.subr.bf16.mxu1 %v7979_v23  ;;  %v8018_v23 = vld [vmem:[%s8366_s14 + $0xb40] sm:$0xff]  }
 0x190   : > { %7276 = vmatpush3.bf16.msra.mxu0 %v7980_v24  ;;  %v8019_v24 = vld [vmem:[%s8366_s14 + $0xbc0] sm:$0xff]  }
 0x191   : > { %7277 = vmatprep.subr.bf16.mxu0 %v7982_v26  ;;  %v8021_v26 = vld [vmem:[%s8366_s14 + $0xb80] sm:$0xff]  }
 0x192   : > { %7298 = vmatpush3.bf16.msra.mxu1 %v7981_v25  ;;  %v8020_v25 = vld [vmem:[%s8366_s14 + $0xb00] sm:$0xff]  }
 0x193   : > { %7299 = vmatprep.subr.bf16.mxu1 %v7983_v27  ;;  %v1573_v27 = vrot.slane %v8804_v35, %v8414_v42  ;;  %v8029_v35 = vld [vmem:[%s8366_s14 + $0xc30] sm:$0xff]  }
 0x194   : > { %7278 = vmatpush3.bf16.msra.mxu0 %v7984_v29  ;;  %v8024_v29 = vld [vmem:[%s8366_s14 + $0xcf8] sm:$0xff]  }
 0x195   : > { %7279 = vmatprep.subr.bf16.mxu0 %v7986_v33  ;;  %v8027_v33 = vld [vmem:[%s8366_s14 + $0xc70] sm:$0xff]  }
 0x196   : > { %7300 = vmatpush3.bf16.msra.mxu1 %v7985_v32  ;;  %v1589_v32 = vcombine.high %v1573_v27, %v1573_v27 }
 0x197   : > { %7301 = vmatprep.subr.bf16.mxu1 %v7987_v36 }
 0x198   : > { %7280 = vmatpush3.bf16.msra.mxu0 %v7988_v37  ;;  %v8030_v37 = vld [vmem:[%s8366_s14 + $0xcb0] sm:$0xff]  }
 0x199   : > { %7309 = vmatprep.subr.bf16.mxu0 %v7990_v44 }
 0x19a   : > { %7302 = vmatpush3.bf16.msra.mxu1 %v7989_v40  ;;  %v8031_v40 = vld [vmem:[%s8366_s14 + $0xc68] sm:$0xff]  }
 0x19b   : > { %v7017_v53 = vpop.f32.mrf.mxu0  ;;  %5659 = vmatmul.mubr.bf16.vlgmr.msra.gmra.mxu0 %v1566_v43  ;;  %7331 = vmatprep.subr.bf16.mxu1 %v7991_v45  ;;  %v8032_v43 = vld [vmem:[%s8366_s14 + $0xce8] sm:$0xff]  }
 0x19c   : > { %7310 = vmatpush3.bf16.msra.mxu0 %v7992_v47  ;;  %5738 = vmatprep.mubr.bf16.mxu0 %v1587_v46  ;;  %v8033_v46 = vld [vmem:[%s8366_s14 + $0xc28] sm:$0xff]  }
 0x19d   : > { %v7039_v56 = vpop.f32.mrf.mxu1  ;;  %5699 = vmatmul.mubr.bf16.vlgmr.msra.gmra.mxu1 %v1588_v49  ;;  %v7018_v57 = vpop.f32.mrf.mxu0  ;;  %7311 = vmatprep.subr.bf16.mxu0 %v7994_v50  ;;  %v8034_v49 = vld [vmem:[%s8366_s14 + $0xca8] sm:$0xff]  }
 0x19e   : > { %7332 = vmatpush3.bf16.msra.mxu1 %v7993_v48  ;;  %v7019_v59 = vadd.f32 %v7018_v57, %v7017_v53  ;;  %5778 = vmatprep.mubr.bf16.mxu1 %v1591_v52  ;;  %v8035_v52 = vld [vmem:[%s8366_s14 + $0xc60] sm:$0xff]  }
 0x19f   : > { %v7040_v60 = vpop.f32.mrf.mxu1  ;;  %v7020_v62 = vpop.f32.mrf.mxu0  ;;  %7333 = vmatprep.subr.bf16.mxu1 %v7995_v51  ;;  %v8038_v57 = vld [vmem:[%s8366_s14 + $0xca0] sm:$0xff]  }
 0x1a0   : > { %v5181_v0 = vadd.f32 %v7019_v59, %v8783_v13  ;;  %v7041_v1 = vadd.f32 %v7040_v60, %v7039_v56  ;;  %7312 = vmatpush3.bf16.msra.mxu0 %v7996_v54  ;;  %v8008_v13 = vld [vmem:[%s8366_s14 + $0xb18] sm:$0xff]   ;;  %v8036_v54 = vld [vmem:[%s8366_s14 + $0xce0] sm:$0xff]   ;;  %v8043_v62 = vld [vmem:[%s8366_s14 + $0xc50] sm:$0xff]  }
 0x1a1   : > { %v7042_v3 = vpop.f32.mrf.mxu1  ;;  %v7021_v4 = vpop.f32.mrf.mxu0  ;;  %7313 = vmatprep.subr.bf16.mxu0 %v7998_v58  ;;  %v8037_v56 = vld [vmem:[%s8366_s14 + $0xc20] sm:$0xff]   ;;  %v8039_v58 = vld [vmem:[%s8366_s14 + $0xc58] sm:$0xff]  }
 0x1a2   : > { %v8828_v6 = vadd.f32 %v7041_v1, %v5181_v0  ;;  %7334 = vmatpush3.bf16.msra.mxu1 %v7997_v55  ;;  %v8040_v59 = vld [vmem:[%s8366_s14 + $0xcd8] sm:$0xff]   ;;  %v8045_v0 = vld [vmem:[%s8366_s14 + $0xc10] sm:$0xff]   ;;  %v8048_v3 = vld [vmem:[%s8366_s14 + $0xcc8] sm:$0xff]  }
 0x1a3   : > { %v7043_v8 = vpop.f32.mrf.mxu1  ;;  %7335 = vmatprep.subr.bf16.mxu1 %v7999_v61  ;;  %v8041_v61 = vld [vmem:[%s8366_s14 + $0xc18] sm:$0xff]   ;;  %v8046_v1 = vld [vmem:[%s8366_s14 + $0xc90] sm:$0xff]  }
 0x1a4   : > { %7314 = vmatpush3.bf16.msra.mxu0 %v8000_v63  ;;  %v8042_v60 = vld [vmem:[%s8366_s14 + $0xc98] sm:$0xff]   ;;  %v8044_v63 = vld [vmem:[%s8366_s14 + $0xcd0] sm:$0xff]   ;;  %v8051_v8 = vld [vmem:[%s8366_s14 + $0xc40] sm:$0xff]  }
 0x1a5   : > { %7315 = vmatprep.subr.bf16.mxu0 %v8002_v5  ;;  %v264_v4 = vld [vmem:[%s8376_s10 + $0x30] sm:$0xff] }
 0x1a6   : > { %7336 = vmatpush3.bf16.msra.mxu1 %v8001_v2  ;;  %v8047_v2 = vld [vmem:[%s8366_s14 + $0xc48] sm:$0xff]  }
 0x1a7   : > { %7337 = vmatprep.subr.bf16.mxu1 %v8003_v7  ;;  %v8049_v5 = vld [vmem:[%s8366_s14 + $0xc08] sm:$0xff]   ;;  %v1592_v7 = vcombine.high %v264_v4, %v264_v4 }
 0x1a8   : > { %7316 = vmatpush3.bf16.msra.mxu0 %v8004_v9  ;;  %v8050_v9 = vld [vmem:[%s8366_s14 + $0xc88] sm:$0xff]  }
 0x1a9   : > { %7317 = vmatprep.subr.bf16.mxu0 %v8006_v11  ;;  %v8886_v11 = vrot.slane %v1592_v7, %v8414_v42 }
 0x1aa   : > { %7338 = vmatpush3.bf16.msra.mxu1 %v8005_v10 }
 0x1ab   : > { %7339 = vmatprep.subr.bf16.mxu1 %v8007_v12  ;;  %v8052_v12 = vld [vmem:[%s8366_s14 + $0xcc0] sm:$0xff]  }
 0x1ac   : > { %7318 = vmatpush3.bf16.msra.mxu0 %v8008_v13  ;;  %v8053_v13 = vld [vmem:[%s8366_s14 + $0xc00] sm:$0xff]  }
 0x1ad   : > { %7319 = vmatprep.subr.bf16.mxu0 %v8010_v15  ;;  %v1608_v15 = vcombine.high %v8886_v11, %v8886_v11 }
 0x1ae   : > { %7340 = vmatpush3.bf16.msra.mxu1 %v8009_v14 }
 0x1af   : > { %7341 = vmatprep.subr.bf16.mxu1 %v8011_v16 }
 0x1b0   : > { %7320 = vmatpush3.bf16.msra.mxu0 %v8012_v17  ;;  %v8055_v17 = vld [vmem:[%s8366_s14 + $0xd78] sm:$0xff]  }
 0x1b1   : > { %7321 = vmatprep.subr.bf16.mxu0 %v8014_v19 }
 0x1b2   : > { %7342 = vmatpush3.bf16.msra.mxu1 %v8013_v18  ;;  %v8054_v18 = vld [vmem:[%s8366_s14 + $0xc80] sm:$0xff]  }
 0x1b3   : > { %7343 = vmatprep.subr.bf16.mxu1 %v8015_v20  ;;  %v1636_v20 = vrot.slane %v1608_v15, %v8414_v42  ;;  %v8096_v15 = vld [vmem:[%s8366_s14 + $0xe68] sm:$0xff]  }
 0x1b4   : > { %7322 = vmatpush3.bf16.msra.mxu0 %v8016_v21  ;;  %v8056_v21 = vld [vmem:[%s8366_s14 + $0xdf8] sm:$0xff]  }
 0x1b5   : > { %7323 = vmatprep.subr.bf16.mxu0 %v8018_v23 }
 0x1b6   : > { %7344 = vmatpush3.bf16.msra.mxu1 %v8017_v22  ;;  %v8057_v22 = vld [vmem:[%s8366_s14 + $0xd38] sm:$0xff]  }
 0x1b7   : > { %7345 = vmatprep.subr.bf16.mxu1 %v8019_v24  ;;  %v8059_v24 = vld [vmem:[%s8366_s14 + $0xd70] sm:$0xff]  }
 0x1b8   : > { %7324 = vmatpush3.bf16.msra.mxu0 %v8020_v25  ;;  %v8058_v25 = vld [vmem:[%s8366_s14 + $0xdb8] sm:$0xff]  }
 0x1b9   : > { %7353 = vmatprep.subr.bf16.mxu0 %v8023_v28  ;;  %v8060_v28 = vld [vmem:[%s8366_s14 + $0xdf0] sm:$0xff]  }
 0x1ba   : > { %7346 = vmatpush3.bf16.msra.mxu1 %v8021_v26  ;;  %v1640_v26 = vcombine.high %v1636_v20, %v1636_v20 }
 0x1bb   : > { %v7061_v36 = vpop.f32.mrf.mxu0  ;;  %5739 = vmatmul.mubr.bf16.vlgmr.msra.gmra.mxu0 %v1573_v27  ;;  %7375 = vmatprep.subr.bf16.mxu1 %v8024_v29  ;;  %v8061_v29 = vld [vmem:[%s8366_s14 + $0xd30] sm:$0xff]  }
 0x1bc   : > { %7354 = vmatpush3.bf16.msra.mxu0 %v8025_v30 }
 0x1bd   : > { %v7083_v38 = vpop.f32.mrf.mxu1  ;;  %5779 = vmatmul.mubr.bf16.vlgmr.msra.gmra.mxu1 %v1589_v32  ;;  %v7062_v39 = vpop.f32.mrf.mxu0  ;;  %7355 = vmatprep.subr.bf16.mxu0 %v8027_v33  ;;  %v8063_v32 = vld [vmem:[%s8366_s14 + $0xd68] sm:$0xff]  }
 0x1be   : > { %7376 = vmatpush3.bf16.msra.mxu1 %v8026_v31  ;;  %v7063_v41 = vadd.f32 %v7062_v39, %v7061_v36 }
 0x1bf   : > { %v7084_v44 = vpop.f32.mrf.mxu1  ;;  %v7064_v45 = vpop.f32.mrf.mxu0  ;;  %7377 = vmatprep.subr.bf16.mxu1 %v8028_v34  ;;  %v8062_v34 = vld [vmem:[%s8366_s14 + $0xdb0] sm:$0xff]  }
 0x1c0   : > { %v5261_v47 = vadd.f32 %v7063_v41, %v8828_v6  ;;  %v7085_v48 = vadd.f32 %v7084_v44, %v7083_v38  ;;  %7356 = vmatpush3.bf16.msra.mxu0 %v8029_v35  ;;  %v1599_v6 = vrot.slane %v264_v4, %v8414_v42  ;;  %v8067_v44 = vld [vmem:[%s8366_s14 + $0xd60] sm:$0xff]  }
 0x1c1   : > { %v7086_v50 = vpop.f32.mrf.mxu1  ;;  %v7065_v51 = vpop.f32.mrf.mxu0  ;;  %7357 = vmatprep.subr.bf16.mxu0 %v8031_v40  ;;  %v8065_v40 = vld [vmem:[%s8366_s14 + $0xd28] sm:$0xff]   ;;  %v8086_v4 = vld [vmem:[%s8366_s14 + $0xd80] sm:$0xff]  }
 0x1c2   : > { %v8865_v53 = vadd.f32 %v7085_v48, %v5261_v47  ;;  %7378 = vmatpush3.bf16.msra.mxu1 %v8030_v37  ;;  %v1607_v10 = vcombine.high %v1599_v6, %v1599_v6  ;;  %v1615_v16 = vrot.slane %v1599_v6, %v8414_v42  ;;  %v8064_v37 = vld [vmem:[%s8366_s14 + $0xde8] sm:$0xff]   ;;  %v8068_v48 = vld [vmem:[%s8366_s14 + $0xde0] sm:$0xff]   ;;  %v8071_v50 = vld [vmem:[%s8366_s14 + $0xd58] sm:$0xff]  }
 0x1c3   : > { %v7087_v55 = vpop.f32.mrf.mxu1  ;;  %7379 = vmatprep.subr.bf16.mxu1 %v8032_v43  ;;  %v8070_v51 = vld [vmem:[%s8366_s14 + $0xda0] sm:$0xff]   ;;  %v8090_v6 = vld [vmem:[%s8366_s14 + $0xe38] sm:$0xff]  }
 0x1c4   : > { %7358 = vmatpush3.bf16.msra.mxu0 %v8033_v46  ;;  %v1629_v14 = vrot.slane %v1607_v10, %v8414_v42  ;;  %v1637_v23 = vcombine.high %v1615_v16, %v1615_v16  ;;  %v8066_v46 = vld [vmem:[%s8366_s14 + $0xda8] sm:$0xff]   ;;  %v8074_v55 = vld [vmem:[%s8366_s14 + $0xd98] sm:$0xff]  }
 0x1c5   : > { %7359 = vmatprep.subr.bf16.mxu0 %v8035_v52  ;;  %v8072_v52 = vld [vmem:[%s8366_s14 + $0xdd8] sm:$0xff]  }
 0x1c6   : > { %7380 = vmatpush3.bf16.msra.mxu1 %v8034_v49  ;;  %5818 = vmatprep.mubr.bf16.mxu0 %v1629_v14  ;;  %v1639_v19 = vcombine.high %v1629_v14, %v1629_v14  ;;  %v8069_v49 = vld [vmem:[%s8366_s14 + $0xd20] sm:$0xff]  }
 0x1c7   : > { %7381 = vmatprep.subr.bf16.mxu1 %v8036_v54  ;;  %v8075_v54 = vld [vmem:[%s8366_s14 + $0xd50] sm:$0xff]  }
 0x1c8   : > { %7360 = vmatpush3.bf16.msra.mxu0 %v8037_v56  ;;  %5858 = vmatprep.mubr.bf16.mxu1 %v1639_v19  ;;  %v8076_v56 = vld [vmem:[%s8366_s14 + $0xdd0] sm:$0xff]  }
 0x1c9   : > { %7361 = vmatprep.subr.bf16.mxu0 %v8039_v58  ;;  %v8079_v58 = vld [vmem:[%s8366_s14 + $0xd48] sm:$0xff]  }
 0x1ca   : > { %7382 = vmatpush3.bf16.msra.mxu1 %v8038_v57  ;;  %v8077_v57 = vld [vmem:[%s8366_s14 + $0xd10] sm:$0xff]  }
 0x1cb   : > { %7383 = vmatprep.subr.bf16.mxu1 %v8040_v59  ;;  %v8078_v59 = vld [vmem:[%s8366_s14 + $0xd90] sm:$0xff]  }
 0x1cc   : > { %7362 = vmatpush3.bf16.msra.mxu0 %v8041_v61  ;;  %v8080_v61 = vld [vmem:[%s8366_s14 + $0xdc8] sm:$0xff]  }
 0x1cd   : > { %7363 = vmatprep.subr.bf16.mxu0 %v8043_v62  ;;  %v8083_v62 = vld [vmem:[%s8366_s14 + $0xd40] sm:$0xff]  }
 0x1ce   : > { %7384 = vmatpush3.bf16.msra.mxu1 %v8042_v60  ;;  %v8081_v60 = vld [vmem:[%s8366_s14 + $0xd08] sm:$0xff]  }
 0x1cf   : > { %7385 = vmatprep.subr.bf16.mxu1 %v8044_v63  ;;  %v8082_v63 = vld [vmem:[%s8366_s14 + $0xd88] sm:$0xff]  }
 0x1d0   : > { %7364 = vmatpush3.bf16.msra.mxu0 %v8045_v0  ;;  %v8084_v0 = vld [vmem:[%s8366_s14 + $0xdc0] sm:$0xff]  }
 0x1d1   : > { %7365 = vmatprep.subr.bf16.mxu0 %v8047_v2  ;;  %v1622_v2 = vrot.slane %v8886_v11, %v8414_v42  ;;  %v8093_v11 = vld [vmem:[%s8366_s14 + $0xef0] sm:$0xff]  }
 0x1d2   : > { %7386 = vmatpush3.bf16.msra.mxu1 %v8046_v1  ;;  %v8085_v1 = vld [vmem:[%s8366_s14 + $0xd00] sm:$0xff]  }
 0x1d3   : > { %7387 = vmatprep.subr.bf16.mxu1 %v8048_v3  ;;  %v8088_v3 = vld [vmem:[%s8366_s14 + $0xe78] sm:$0xff]   ;;  %v1638_v7 = vcombine.high %v1622_v2, %v1622_v2 }
 0x1d4   : > { %7366 = vmatpush3.bf16.msra.mxu0 %v8049_v5  ;;  %v8089_v5 = vld [vmem:[%s8366_s14 + $0xef8] sm:$0xff]  }
 0x1d5   : > { %7367 = vmatprep.subr.bf16.mxu0 %v8051_v8  ;;  %v8092_v8 = vld [vmem:[%s8366_s14 + $0xe70] sm:$0xff]  }
 0x1d6   : > { %7388 = vmatpush3.bf16.msra.mxu1 %v8050_v9  ;;  %v8091_v9 = vld [vmem:[%s8366_s14 + $0xeb8] sm:$0xff]  }
 0x1d7   : > { %7389 = vmatprep.subr.bf16.mxu1 %v8052_v12  ;;  %v8094_v12 = vld [vmem:[%s8366_s14 + $0xe30] sm:$0xff]  }
 0x1d8   : > { %7368 = vmatpush3.bf16.msra.mxu0 %v8053_v13 }
 0x1d9   : > { %7397 = vmatprep.subr.bf16.mxu0 %v8055_v17  ;;  %v8095_v17 = vld [vmem:[%s8366_s14 + $0xeb0] sm:$0xff]  }
 0x1da   : > { %7390 = vmatpush3.bf16.msra.mxu1 %v8054_v18 }
 0x1db   : > { %v7105_v27 = vpop.f32.mrf.mxu0  ;;  %5819 = vmatmul.mubr.bf16.vlgmr.msra.gmra.mxu0 %v1615_v16  ;;  %7419 = vmatprep.subr.bf16.mxu1 %v8056_v21 }
 0x1dc   : > { %7398 = vmatpush3.bf16.msra.mxu0 %v8057_v22  ;;  %5898 = vmatprep.mubr.bf16.mxu0 %v1636_v20  ;;  %v8097_v20 = vld [vmem:[%s8366_s14 + $0xee8] sm:$0xff]  }
 0x1dd   : > { %v7127_v30 = vpop.f32.mrf.mxu1  ;;  %5859 = vmatmul.mubr.bf16.vlgmr.msra.gmra.mxu1 %v1637_v23  ;;  %v7106_v31 = vpop.f32.mrf.mxu0  ;;  %7399 = vmatprep.subr.bf16.mxu0 %v8059_v24  ;;  %v8098_v23 = vld [vmem:[%s8366_s14 + $0xe28] sm:$0xff]  }
 0x1de   : > { %7420 = vmatpush3.bf16.msra.mxu1 %v8058_v25  ;;  %v7107_v33 = vadd.f32 %v7106_v31, %v7105_v27  ;;  %5938 = vmatprep.mubr.bf16.mxu1 %v1640_v26  ;;  %v8100_v26 = vld [vmem:[%s8366_s14 + $0xe60] sm:$0xff]  }
 0x1df   : > { %v7128_v36 = vpop.f32.mrf.mxu1  ;;  %v7108_v35 = vpop.f32.mrf.mxu0  ;;  %7421 = vmatprep.subr.bf16.mxu1 %v8060_v28  ;;  %v8099_v28 = vld [vmem:[%s8366_s14 + $0xea8] sm:$0xff]   ;;  %v8102_v31 = vld [vmem:[%s8366_s14 + $0xe20] sm:$0xff]  }
 0x1e0   : > { %v5341_v38 = vadd.f32 %v7107_v33, %v8865_v53  ;;  %v7129_v39 = vadd.f32 %v7128_v36, %v7127_v30  ;;  %7400 = vmatpush3.bf16.msra.mxu0 %v8061_v29  ;;  %v8073_v53 = vld [vmem:[%s8366_s14 + $0xd18] sm:$0xff]   ;;  %v8101_v30 = vld [vmem:[%s8366_s14 + $0xee0] sm:$0xff]   ;;  %v8108_v35 = vld [vmem:[%s8366_s14 + $0xe50] sm:$0xff]  }
 0x1e1   : > { %v7130_v41 = vpop.f32.mrf.mxu1  ;;  %v7109_v43 = vpop.f32.mrf.mxu0  ;;  %7401 = vmatprep.subr.bf16.mxu0 %v8063_v32  ;;  %v8104_v32 = vld [vmem:[%s8366_s14 + $0xe58] sm:$0xff]   ;;  %v8103_v33 = vld [vmem:[%s8366_s14 + $0xea0] sm:$0xff]  }
 0x1e2   : > { %v8909_v45 = vadd.f32 %v7129_v39, %v5341_v38  ;;  %7422 = vmatpush3.bf16.msra.mxu1 %v8062_v34  ;;  %v8105_v34 = vld [vmem:[%s8366_s14 + $0xed8] sm:$0xff]   ;;  %v8109_v38 = vld [vmem:[%s8366_s14 + $0xed0] sm:$0xff]   ;;  %v8113_v43 = vld [vmem:[%s8366_s14 + $0xec8] sm:$0xff]  }
 0x1e3   : > { %v7131_v47 = vpop.f32.mrf.mxu1  ;;  %7423 = vmatprep.subr.bf16.mxu1 %v8064_v37  ;;  %v8106_v36 = vld [vmem:[%s8366_s14 + $0xe18] sm:$0xff]   ;;  %v8110_v39 = vld [vmem:[%s8366_s14 + $0xe10] sm:$0xff]  }
 0x1e4   : > { %7402 = vmatpush3.bf16.msra.mxu0 %v8065_v40  ;;  %v8107_v37 = vld [vmem:[%s8366_s14 + $0xe98] sm:$0xff]   ;;  %v8112_v40 = vld [vmem:[%s8366_s14 + $0xe48] sm:$0xff]   ;;  %v8111_v41 = vld [vmem:[%s8366_s14 + $0xe90] sm:$0xff]  }
 0x1e5   : > { %7403 = vmatprep.subr.bf16.mxu0 %v8067_v44  ;;  %v265_v44 = vld [vmem:[%s8376_s10 + $0x38] sm:$0xff] }
 0x1e6   : > { %7424 = vmatpush3.bf16.msra.mxu1 %v8066_v46  ;;  %v1648_v46 = vrot.slane %v265_v44, %v8414_v42  ;;  %v1641_v47 = vcombine.high %v265_v44, %v265_v44 }
 0x1e7   : > { %7425 = vmatprep.subr.bf16.mxu1 %v8068_v48  ;;  %v8116_v48 = vld [vmem:[%s8366_s14 + $0xe40] sm:$0xff]  }
 0x1e8   : > { %7404 = vmatpush3.bf16.msra.mxu0 %v8069_v49  ;;  %v8115_v49 = vld [vmem:[%s8366_s14 + $0xe88] sm:$0xff]  }
 0x1e9   : > { %7405 = vmatprep.subr.bf16.mxu0 %v8071_v50  ;;  %v1656_v50 = vcombine.high %v1648_v46, %v1648_v46 }
 0x1ea   : > { %7426 = vmatpush3.bf16.msra.mxu1 %v8070_v51  ;;  %v8968_v51 = vrot.slane %v1641_v47, %v8414_v42 }
 0x1eb   : > { %7427 = vmatprep.subr.bf16.mxu1 %v8072_v52  ;;  %v8117_v52 = vld [vmem:[%s8366_s14 + $0xec0] sm:$0xff]  }
 0x1ec   : > { %7406 = vmatpush3.bf16.msra.mxu0 %v8073_v53  ;;  %v8118_v53 = vld [vmem:[%s8366_s14 + $0xe00] sm:$0xff]  }
 0x1ed   : > { %7407 = vmatprep.subr.bf16.mxu0 %v8075_v54  ;;  %v1678_v54 = vrot.slane %v1656_v50, %v8414_v42 }
 0x1ee   : > { %7428 = vmatpush3.bf16.msra.mxu1 %v8074_v55  ;;  %v1657_v55 = vcombine.high %v8968_v51, %v8968_v51 }
 0x1ef   : > { %7429 = vmatprep.subr.bf16.mxu1 %v8076_v56  ;;  %v1664_v56 = vrot.slane %v1648_v46, %v8414_v42 }
 0x1f0   : > { %7408 = vmatpush3.bf16.msra.mxu0 %v8077_v57  ;;  %v8120_v57 = vld [vmem:[%s8366_s14 + $0xf78] sm:$0xff]  }
 0x1f1   : > { %7409 = vmatprep.subr.bf16.mxu0 %v8079_v58  ;;  %v8119_v58 = vld [vmem:[%s8366_s14 + $0xe80] sm:$0xff]  }
 0x1f2   : > { %7430 = vmatpush3.bf16.msra.mxu1 %v8078_v59  ;;  %v1688_v59 = vcombine.high %v1678_v54, %v1678_v54 }
 0x1f3   : > { %7431 = vmatprep.subr.bf16.mxu1 %v8080_v61  ;;  %v1685_v61 = vrot.slane %v1657_v55, %v8414_v42 }
 0x1f4   : > { %7410 = vmatpush3.bf16.msra.mxu0 %v8081_v60  ;;  %v8121_v60 = vld [vmem:[%s8366_s14 + $0xff8] sm:$0xff]  }
 0x1f5   : > { %7411 = vmatprep.subr.bf16.mxu0 %v8083_v62  ;;  %v8122_v62 = vld [vmem:[%s8366_s14 + $0xf38] sm:$0xff]  }
 0x1f6   : > { %7432 = vmatpush3.bf16.msra.mxu1 %v8082_v63  ;;  %v1686_v63 = vcombine.high %v1664_v56, %v1664_v56 }
 0x1f7   : > { %7433 = vmatprep.subr.bf16.mxu1 %v8084_v0  ;;  %v8124_v0 = vld [vmem:[%s8366_s14 + $0xf70] sm:$0xff]  }
 0x1f8   : > { %7412 = vmatpush3.bf16.msra.mxu0 %v8085_v1  ;;  %v8123_v1 = vld [vmem:[%s8366_s14 + $0xfb8] sm:$0xff]  }
 0x1f9   : > { %7441 = vmatprep.subr.bf16.mxu0 %v8088_v3 }
 0x1fa   : > { %7434 = vmatpush3.bf16.msra.mxu1 %v8086_v4  ;;  %v8125_v4 = vld [vmem:[%s8366_s14 + $0xff0] sm:$0xff]  }
 0x1fb   : > { %v7149_v10 = vpop.f32.mrf.mxu0  ;;  %5899 = vmatmul.mubr.bf16.vlgmr.msra.gmra.mxu0 %v1622_v2  ;;  %7463 = vmatprep.subr.bf16.mxu1 %v8089_v5  ;;  %v1689_v2 = vcombine.high %v1685_v61, %v1685_v61  ;;  %v8126_v5 = vld [vmem:[%s8366_s14 + $0xf30] sm:$0xff]  }
 0x1fc   : > { %7442 = vmatpush3.bf16.msra.mxu0 %v8090_v6  ;;  %5978 = vmatprep.mubr.bf16.mxu0 %v1678_v54 }
 0x1fd   : > { %v7171_v13 = vpop.f32.mrf.mxu1  ;;  %5939 = vmatmul.mubr.bf16.vlgmr.msra.gmra.mxu1 %v1638_v7  ;;  %v7150_v14 = vpop.f32.mrf.mxu0  ;;  %7443 = vmatprep.subr.bf16.mxu0 %v8092_v8  ;;  %v8128_v8 = vld [vmem:[%s8366_s14 + $0xf68] sm:$0xff]  }
 0x1fe   : > { %7464 = vmatpush3.bf16.msra.mxu1 %v8091_v9  ;;  %v7151_v16 = vadd.f32 %v7150_v14, %v7149_v10  ;;  %6018 = vmatprep.mubr.bf16.mxu1 %v1688_v59  ;;  %v8127_v10 = vld [vmem:[%s8366_s14 + $0xfb0] sm:$0xff]  }
 0x1ff   : > { %v7172_v18 = vpop.f32.mrf.mxu1  ;;  %v7152_v19 = vpop.f32.mrf.mxu0  ;;  %7465 = vmatprep.subr.bf16.mxu1 %v8093_v11 }
 0x200   : > { %v5421_v21 = vadd.f32 %v7151_v16, %v8909_v45  ;;  %v7173_v22 = vadd.f32 %v7172_v18, %v7171_v13  ;;  %7444 = vmatpush3.bf16.msra.mxu0 %v8094_v12  ;;  %v8114_v45 = vld [vmem:[%s8366_s14 + $0xe08] sm:$0xff]   ;;  %v8132_v19 = vld [vmem:[%s8366_s14 + $0xf60] sm:$0xff]  }
 0x201   : > { %v7174_v24 = vpop.f32.mrf.mxu1  ;;  %v7153_v25 = vpop.f32.mrf.mxu0  ;;  %7445 = vmatprep.subr.bf16.mxu0 %v8096_v15  ;;  %v8129_v13 = vld [vmem:[%s8366_s14 + $0xfe8] sm:$0xff]  }
 0x202   : > { %v8946_v27 = vadd.f32 %v7173_v22, %v5421_v21  ;;  %7466 = vmatpush3.bf16.msra.mxu1 %v8095_v17  ;;  %v8130_v16 = vld [vmem:[%s8366_s14 + $0xf28] sm:$0xff]   ;;  %v8134_v24 = vld [vmem:[%s8366_s14 + $0xf20] sm:$0xff]   ;;  %v8136_v25 = vld [vmem:[%s8366_s14 + $0xf58] sm:$0xff]  }
 0x203   : > { %v7175_v29 = vpop.f32.mrf.mxu1  ;;  %7467 = vmatprep.subr.bf16.mxu1 %v8097_v20  ;;  %v8131_v21 = vld [vmem:[%s8366_s14 + $0xfa8] sm:$0xff]  }
 0x204   : > { %7446 = vmatpush3.bf16.msra.mxu0 %v8098_v23  ;;  %v8133_v23 = vld [vmem:[%s8366_s14 + $0xfe0] sm:$0xff]   ;;  %v8140_v29 = vld [vmem:[%s8366_s14 + $0xf50] sm:$0xff]  }
 0x205   : > { %7447 = vmatprep.subr.bf16.mxu0 %v8100_v26  ;;  %v8135_v26 = vld [vmem:[%s8366_s14 + $0xfa0] sm:$0xff]  }
 0x206   : > { %7468 = vmatpush3.bf16.msra.mxu1 %v8099_v28  ;;  %v8138_v28 = vld [vmem:[%s8366_s14 + $0xf18] sm:$0xff]  }
 0x207   : > { %7469 = vmatprep.subr.bf16.mxu1 %v8101_v30  ;;  %v8139_v30 = vld [vmem:[%s8366_s14 + $0xf98] sm:$0xff]  }
 0x208   : > { %7448 = vmatpush3.bf16.msra.mxu0 %v8102_v31  ;;  %v8141_v31 = vld [vmem:[%s8366_s14 + $0xfd0] sm:$0xff]  }
 0x209   : > { %7449 = vmatprep.subr.bf16.mxu0 %v8104_v32  ;;  %v8142_v32 = vld [vmem:[%s8366_s14 + $0xf10] sm:$0xff]  }
 0x20a   : > { %7470 = vmatpush3.bf16.msra.mxu1 %v8103_v33  ;;  %v8144_v33 = vld [vmem:[%s8366_s14 + $0xf48] sm:$0xff]  }
 0x20b   : > { %7471 = vmatprep.subr.bf16.mxu1 %v8105_v34  ;;  %v8143_v34 = vld [vmem:[%s8366_s14 + $0xf90] sm:$0xff]  }
 0x20c   : > { %7450 = vmatpush3.bf16.msra.mxu0 %v8106_v36  ;;  %v8145_v36 = vld [vmem:[%s8366_s14 + $0xfc8] sm:$0xff]  }
 0x20d   : > { %7451 = vmatprep.subr.bf16.mxu0 %v8108_v35  ;;  %v8146_v35 = vld [vmem:[%s8366_s14 + $0xf08] sm:$0xff]  }
 0x20e   : > { %7472 = vmatpush3.bf16.msra.mxu1 %v8107_v37  ;;  %v8148_v37 = vld [vmem:[%s8366_s14 + $0xf40] sm:$0xff]  }
 0x20f   : > { %7473 = vmatprep.subr.bf16.mxu1 %v8109_v38  ;;  %v8147_v38 = vld [vmem:[%s8366_s14 + $0xf88] sm:$0xff]  }
 0x210   : > { %7452 = vmatpush3.bf16.msra.mxu0 %v8110_v39  ;;  %v8149_v39 = vld [vmem:[%s8366_s14 + $0xfc0] sm:$0xff]  }
 0x211   : > { %7453 = vmatprep.subr.bf16.mxu0 %v8112_v40  ;;  %v8150_v40 = vld [vmem:[%s8366_s14 + $0xf00] sm:$0xff]  }
 0x212   : > { %7474 = vmatpush3.bf16.msra.mxu1 %v8111_v41  ;;  %v1671_v41 = vrot.slane %v8968_v51, %v8414_v42 }
 0x213   : > { %7475 = vmatprep.subr.bf16.mxu1 %v8113_v43  ;;  %v8151_v43 = vld [vmem:[%s8366_s14 + $0xf80] sm:$0xff]  }
 0x214   : > { %7454 = vmatpush3.bf16.msra.mxu0 %v8114_v45  ;;  %v1687_v44 = vcombine.high %v1671_v41, %v1671_v41 }
 0x215   : > { %7455 = vmatprep.subr.bf16.mxu0 %v8116_v48 }
 0x216   : > { %7476 = vmatpush3.bf16.msra.mxu1 %v8115_v49 }
 0x217   : > { %7477 = vmatprep.subr.bf16.mxu1 %v8117_v52 }
 0x218   : > { %7456 = vmatpush3.bf16.msra.mxu0 %v8118_v53 }
 0x219   : > { %7485 = vmatprep.subr.bf16.mxu0 %v8120_v57 }
 0x21a   : > { %7478 = vmatpush3.bf16.msra.mxu1 %v8119_v58 }
 0x21b   : > { %v7193_v3 = vpop.f32.mrf.mxu0  ;;  %5979 = vmatmul.mubr.bf16.vlgmr.msra.gmra.mxu0 %v1664_v56  ;;  %7507 = vmatprep.subr.bf16.mxu1 %v8121_v60 }
 0x21c   : > { %7486 = vmatpush3.bf16.msra.mxu0 %v8122_v62  ;;  %6058 = vmatprep.mubr.bf16.mxu0 %v1685_v61 }
 0x21d   : > { %v7215_v6 = vpop.f32.mrf.mxu1  ;;  %6019 = vmatmul.mubr.bf16.vlgmr.msra.gmra.mxu1 %v1686_v63  ;;  %v7194_v7 = vpop.f32.mrf.mxu0  ;;  %7487 = vmatprep.subr.bf16.mxu0 %v8124_v0 }
 0x21e   : > { %7508 = vmatpush3.bf16.msra.mxu1 %v8123_v1  ;;  %v7195_v9 = vadd.f32 %v7194_v7, %v7193_v3  ;;  %6098 = vmatprep.mubr.bf16.mxu1 %v1689_v2 }
 0x21f   : > { %v7216_v11 = vpop.f32.mrf.mxu1  ;;  %v7196_v12 = vpop.f32.mrf.mxu0  ;;  %7509 = vmatprep.subr.bf16.mxu1 %v8125_v4 }
 0x220   : > { %v5501_v14 = vadd.f32 %v7195_v9, %v8946_v27  ;;  %v7217_v15 = vadd.f32 %v7216_v11, %v7215_v6  ;;  %7488 = vmatpush3.bf16.msra.mxu0 %v8126_v5  ;;  %v8137_v27 = vld [vmem:[%s8366_s14 + $0xfd8] sm:$0xff]  }
 0x221   : > { %v7218_v17 = vpop.f32.mrf.mxu1  ;;  %v7197_v18 = vpop.f32.mrf.mxu0  ;;  %7489 = vmatprep.subr.bf16.mxu0 %v8128_v8 }
 0x222   : > { %v5541_v20 = vadd.f32 %v7217_v15, %v5501_v14  ;;  %7510 = vmatpush3.bf16.msra.mxu1 %v8127_v10 }
 0x223   : > { %v7219_v22 = vpop.f32.mrf.mxu1  ;;  %7511 = vmatprep.subr.bf16.mxu1 %v8129_v13 }
 0x224   : > { %7490 = vmatpush3.bf16.msra.mxu0 %v8130_v16 }
 0x225   : > { %7491 = vmatprep.subr.bf16.mxu0 %v8132_v19 }
 0x226   : > { %7512 = vmatpush3.bf16.msra.mxu1 %v8131_v21 }
 0x227   : > { %7513 = vmatprep.subr.bf16.mxu1 %v8133_v23 }
 0x228   : > { %7492 = vmatpush3.bf16.msra.mxu0 %v8134_v24 }
 0x229   : > { %7493 = vmatprep.subr.bf16.mxu0 %v8136_v25 }
 0x22a   : > { %7514 = vmatpush3.bf16.msra.mxu1 %v8135_v26 }
 0x22b   : > { %7515 = vmatprep.subr.bf16.mxu1 %v8137_v27 }
 0x22c   : > { %7494 = vmatpush3.bf16.msra.mxu0 %v8138_v28 }
 0x22d   : > { %7495 = vmatprep.subr.bf16.mxu0 %v8140_v29 }
 0x22e   : > { %7516 = vmatpush3.bf16.msra.mxu1 %v8139_v30 }
 0x22f   : > { %7517 = vmatprep.subr.bf16.mxu1 %v8141_v31 }
 0x230   : > { %7496 = vmatpush3.bf16.msra.mxu0 %v8142_v32 }
 0x231   : > { %7497 = vmatprep.subr.bf16.mxu0 %v8144_v33 }
 0x232   : > { %7518 = vmatpush3.bf16.msra.mxu1 %v8143_v34 }
 0x233   : > { %7519 = vmatprep.subr.bf16.mxu1 %v8145_v36 }
 0x234   : > { %7498 = vmatpush3.bf16.msra.mxu0 %v8146_v35 }
 0x235   : > { %7499 = vmatprep.subr.bf16.mxu0 %v8148_v37 }
 0x236   : > { %7520 = vmatpush3.bf16.msra.mxu1 %v8147_v38 }
 0x237   : > { %7521 = vmatprep.subr.bf16.mxu1 %v8149_v39 }
 0x238   : > { %7500 = vmatpush3.bf16.msra.mxu0 %v8150_v40 }
 0x23a   : > { %7522 = vmatpush3.bf16.msra.mxu1 %v8151_v43 }
 0x23b   : > { %v7237_v45 = vpop.f32.mrf.mxu0  ;;  %6059 = vmatmul.mubr.bf16.vlgmr.msra.gmra.mxu0 %v1671_v41 }
 0x23d   : > { %v7259_v46 = vpop.f32.mrf.mxu1  ;;  %6099 = vmatmul.mubr.bf16.vlgmr.msra.gmra.mxu1 %v1687_v44  ;;  %v7238_v47 = vpop.f32.mrf.mxu0 }
 0x23e   : > { %v7239_v48 = vadd.f32 %v7238_v47, %v7237_v45 }
 0x23f   : > { %v7260_v49 = vpop.f32.mrf.mxu1  ;;  %v7240_v50 = vpop.f32.mrf.mxu0 }
 0x240   : > { %v5581_v52 = vadd.f32 %v7239_v48, %v5541_v20  ;;  %v7261_v53 = vadd.f32 %v7260_v49, %v7259_v46 }
 0x241   : > { %v7262_v54 = vpop.f32.mrf.mxu1  ;;  %v7241_v55 = vpop.f32.mrf.mxu0 }
 0x242   : > { %v5621_v56 = vadd.f32 %v7261_v53, %v5581_v52 }
 0x243   : > { %v7263_v42 = vpop.f32.mrf.mxu1 }
 0x25b   : > { %v7281_v51 = vpop.f32.mrf.mxu0 }
 0x25d   : > { %v7303_v57 = vpop.f32.mrf.mxu1  ;;  %v7282_v58 = vpop.f32.mrf.mxu0 }
 0x25e   : > { %v7283_v59 = vadd.f32 %v7282_v58, %v7281_v51 }
 0x25f   : > { %v7304_v61 = vpop.f32.mrf.mxu1  ;;  %v7284_v60 = vpop.f32.mrf.mxu0 }
 0x260   : > { %v5661_v62 = vadd.f32 %v7283_v59, %v5621_v56  ;;  %v7305_v63 = vadd.f32 %v7304_v61, %v7303_v57  ;;  %v257_v61 = vld [vmem:[#allocation2] sm:$0x3] }
 0x261   : > { %v7306_v0 = vpop.f32.mrf.mxu1  ;;  %v7285_v1 = vpop.f32.mrf.mxu0 }
 0x262   : > { %v5701_v2 = vadd.f32 %v7305_v63, %v5661_v62 }
 0x263   : > { %v7307_v3 = vpop.f32.mrf.mxu1 }
 0x27b   : > { %v7325_v4 = vpop.f32.mrf.mxu0 }
 0x27d   : > { %v7347_v5 = vpop.f32.mrf.mxu1  ;;  %v7326_v6 = vpop.f32.mrf.mxu0 }
 0x27e   : > { %v7327_v7 = vadd.f32 %v7326_v6, %v7325_v4 }
 0x27f   : > { %v7348_v8 = vpop.f32.mrf.mxu1  ;;  %v7328_v9 = vpop.f32.mrf.mxu0 }
 0x280   : > { %v5741_v10 = vadd.f32 %v7327_v7, %v5701_v2  ;;  %v7349_v11 = vadd.f32 %v7348_v8, %v7347_v5 }
 0x281   : > { %v7350_v12 = vpop.f32.mrf.mxu1  ;;  %v7329_v13 = vpop.f32.mrf.mxu0 }
 0x282   : > { %v5781_v14 = vadd.f32 %v7349_v11, %v5741_v10 }
 0x283   : > { %v7351_v15 = vpop.f32.mrf.mxu1 }
 0x29b   : > { %v7369_v16 = vpop.f32.mrf.mxu0 }
 0x29d   : > { %v7391_v17 = vpop.f32.mrf.mxu1  ;;  %v7370_v18 = vpop.f32.mrf.mxu0 }
 0x29e   : > { %v7371_v19 = vadd.f32 %v7370_v18, %v7369_v16 }
 0x29f   : > { %v7392_v20 = vpop.f32.mrf.mxu1  ;;  %v7372_v21 = vpop.f32.mrf.mxu0 }
 0x2a0   : > { %v5821_v22 = vadd.f32 %v7371_v19, %v5781_v14  ;;  %v7393_v23 = vadd.f32 %v7392_v20, %v7391_v17 }
 0x2a1   : > { %v7394_v24 = vpop.f32.mrf.mxu1  ;;  %v7373_v25 = vpop.f32.mrf.mxu0 }
 0x2a2   : > { %v5861_v26 = vadd.f32 %v7393_v23, %v5821_v22 }
 0x2a3   : > { %v7395_v27 = vpop.f32.mrf.mxu1 }
 0x2bb   : > { %v7413_v28 = vpop.f32.mrf.mxu0 }
 0x2bd   : > { %v7435_v29 = vpop.f32.mrf.mxu1  ;;  %v7414_v30 = vpop.f32.mrf.mxu0 }
 0x2be   : > { %v7415_v45 = vadd.f32 %v7414_v30, %v7413_v28 }
 0x2bf   : > { %v7436_v31 = vpop.f32.mrf.mxu1  ;;  %v7416_v32 = vpop.f32.mrf.mxu0 }
 0x2c0   : > { %v5901_v46 = vadd.f32 %v7415_v45, %v5861_v26  ;;  %v7437_v47 = vadd.f32 %v7436_v31, %v7435_v29 }
 0x2c1   : > { %v7438_v33 = vpop.f32.mrf.mxu1  ;;  %v7417_v34 = vpop.f32.mrf.mxu0 }
 0x2c2   : > { %v5941_v49 = vadd.f32 %v7437_v47, %v5901_v46 }
 0x2c3   : > { %v7439_v36 = vpop.f32.mrf.mxu1 }
 0x2db   : > { %v7457_v35 = vpop.f32.mrf.mxu0 }
 0x2dd   : > { %v7479_v37 = vpop.f32.mrf.mxu1  ;;  %v7458_v38 = vpop.f32.mrf.mxu0 }
 0x2de   : > { %v7459_v48 = vadd.f32 %v7458_v38, %v7457_v35 }
 0x2df   : > { %v7480_v39 = vpop.f32.mrf.mxu1  ;;  %v7460_v40 = vpop.f32.mrf.mxu0 }
 0x2e0   : > { %v5981_v50 = vadd.f32 %v7459_v48, %v5941_v49  ;;  %v7481_v52 = vadd.f32 %v7480_v39, %v7479_v37 }
 0x2e1   : > { %v7482_v41 = vpop.f32.mrf.mxu1  ;;  %v7461_v43 = vpop.f32.mrf.mxu0 }
 0x2e2   : > { %v6021_v56 = vadd.f32 %v7481_v52, %v5981_v50 }
 0x2e3   : > { %v7483_v44 = vpop.f32.mrf.mxu1 }
 0x2fb   : > { %v7501_v53 = vpop.f32.mrf.mxu0 }
 0x2fd   : > { %v7523_v54 = vpop.f32.mrf.mxu1  ;;  %v7502_v55 = vpop.f32.mrf.mxu0 }
 0x2fe   : > { %v7503_v42 = vadd.f32 %v7502_v55, %v7501_v53 }
 0x2ff   : > { %v7524_v51 = vpop.f32.mrf.mxu1  ;;  %v7504_v57 = vpop.f32.mrf.mxu0 }
 0x300   : > { %v6061_v58 = vadd.f32 %v7503_v42, %v6021_v56  ;;  %v7525_v59 = vadd.f32 %v7524_v51, %v7523_v54 }
 0x301   : > { %v7526_v60 = vpop.f32.mrf.mxu1  ;;  %v7505_v62 = vpop.f32.mrf.mxu0 }
 0x302   : > { %v6101_v63 = vadd.f32 %v7525_v59, %v6061_v58  ;;  %6111 = sbr.rel (%p6817_p1) target bundleno = 1318 (0x526), region = 52 }
 0x303   : > { %v7527_v0 = vpop.f32.mrf.mxu1 }
 0x304   : > { %v6106_v1 = vadd.f32 %v6101_v63, %v257_v61 }
 0x306   : > { %6107 = vst [vmem:[#allocation2] sm:$0x3] %v6106_v1 }
 0x307   : > { %v6137_v2 = vld [vmem:[%s9099_s3 + $0x78] sm:$0xff]  ;;  %v8254_v3 = vmov 0.0   ;;  %v6136_v4 = vld [vmem:[%s9099_s3 + $0x70] sm:$0xff]  ;;  %vm8255_vm0 = vmmov 0   ;;  %v6135_v5 = vld [vmem:[%s9099_s3 + $0x68] sm:$0xff]  ;;  %vm6215_vm1 = vcmask 74752  }
 0x308   : > { %7546 = vmatprep.subr.mxu0 %v8254_v3  ;;  %7578 = vmatprep.mubr.msk.f32.mxu0 %vm8255_vm0, %v8254_v3  ;;  %v6134_v6 = vld [vmem:[%s9099_s3 + $0x60] sm:$0xff]  ;;  %v6133_v7 = vld [vmem:[%s9099_s3 + $0x58] sm:$0xff]  ;;  %v6132_v8 = vld [vmem:[%s9099_s3 + $0x50] sm:$0xff] }
 0x309   : > { %7547 = vmatpush3.msra.mxu0 %v6137_v2  ;;  %v6131_v9 = vld [vmem:[%s9099_s3 + $0x48] sm:$0xff]  ;;  %v6130_v10 = vld [vmem:[%s9099_s3 + $0x40] sm:$0xff]  ;;  %v6129_v11 = vld [vmem:[%s9099_s3 + $0x38] sm:$0xff] }
 0x30a   : > { %7548 = vmatprep.subr.mxu0 %v8254_v3  ;;  %v6128_v12 = vld [vmem:[%s9099_s3 + $0x30] sm:$0xff]  ;;  %v6127_v13 = vld [vmem:[%s9099_s3 + $0x28] sm:$0xff]  ;;  %v6126_v14 = vld [vmem:[%s9099_s3 + $0x20] sm:$0xff] }
 0x30b   : > { %7549 = vmatpush3.msra.mxu0 %v6136_v4  ;;  %v6818_v16 = vld [vmem:[%s9098_s2] ss:$0 sm:$0xff]  ;;  %v6125_v17 = vld [vmem:[%s9099_s3 + $0x18] sm:$0xff]  ;;  %v6124_v18 = vld [vmem:[%s9099_s3 + $0x10] sm:$0xff] }
 0x30c   : > { %7550 = vmatprep.subr.mxu0 %v8254_v3  ;;  %v6123_v20 = vld [vmem:[%s9099_s3 + $0x8] sm:$0xff]  ;;  %v6122_v21 = vld [vmem:[%s9099_s3] sm:$0xff] }
 0x30d   : > { %7551 = vmatpush3.msra.mxu0 %v6135_v5  ;;  %v6112_v15 = vld [vmem:[#allocation2] sm:$0x3] }
 0x30e   : > { %7552 = vmatprep.subr.mxu0 %v8254_v3  ;;  %v6120_v19 = vadd.f32 %v6818_v16, %v6112_v15  ;;  %v6819_v23 = vld [vmem:[%s9100_s4] ss:$0 sm:$0xff] }
 0x30f   : > { %7553 = vmatpush3.msra.mxu0 %v6134_v6 }
 0x310   : > { %7554 = vmatprep.subr.mxu0 %v8254_v3  ;;  %v6121_v22 = vmax.f32 %v6120_v19, 0.0 }
 0x311   : > { %7555 = vmatpush3.msra.mxu0 %v6133_v7 }
 0x312   : > { %7556 = vmatprep.subr.mxu0 %v8254_v3 }
 0x313   : > { %7557 = vmatpush3.msra.mxu0 %v6132_v8 }
 0x314   : > { %7558 = vmatprep.subr.mxu0 %v8254_v3 }
 0x315   : > { %7559 = vmatpush3.msra.mxu0 %v6131_v9 }
 0x316   : > { %7560 = vmatprep.subr.mxu0 %v8254_v3 }
 0x317   : > { %7561 = vmatpush3.msra.mxu0 %v6130_v10 }
 0x318   : > { %7562 = vmatprep.subr.mxu0 %v8254_v3 }
 0x319   : > { %7563 = vmatpush3.msra.mxu0 %v6129_v11 }
 0x31a   : > { %7564 = vmatprep.subr.mxu0 %v8254_v3 }
 0x31b   : > { %7565 = vmatpush3.msra.mxu0 %v6128_v12 }
 0x31c   : > { %7566 = vmatprep.subr.mxu0 %v8254_v3 }
 0x31d   : > { %7567 = vmatpush3.msra.mxu0 %v6127_v13 }
 0x31e   : > { %7568 = vmatprep.subr.mxu0 %v8254_v3 }
 0x31f   : > { %7569 = vmatpush3.msra.mxu0 %v6126_v14 }
 0x320   : > { %7570 = vmatprep.subr.mxu0 %v8254_v3 }
 0x321   : > { %7571 = vmatpush3.msra.mxu0 %v6125_v17 }
 0x322   : > { %7572 = vmatprep.subr.mxu0 %v8254_v3 }
 0x323   : > { %7573 = vmatpush3.msra.mxu0 %v6124_v18 }
 0x324   : > { %7574 = vmatprep.subr.mxu0 %v8254_v3 }
 0x325   : > { %7575 = vmatpush3.msra.mxu0 %v6123_v20 }
 0x326   : > { %7576 = vmatprep.subr.mxu0 %v8254_v3 }
 0x327   : > { %7577 = vmatpush3.msra.mxu0 %v6122_v21 }
 0x328   : > { %7579 = vmatmul.mubr.f32.vlgmr.msra.gmra.mxu0 %v6121_v22 }
 0x3e8   : > { %v6211_v24 = vpop.f32.mrf.mxu0 }
 0x3e9   : > { %v6212_v25 = vadd.f32 %v6819_v23, %v6211_v24 }
 0x3ea   : > { %v7580_v26 = vpop.f32.mrf.mxu0 }
 0x3eb   : > { %v6216_v27 = vsel %vm6215_vm1, %v6212_v25, -inf }
 0x3ec   : > { %6217 = vmax.xlane.f32.xlu0 %v6216_v27 }
 0x475   : > { %v6218_v28 = vpop.xlane.xlu0 %6217 }
 0x476   : > { %v6219_v29 = vsub.f32 %v6212_v25, %v6218_v28 }
 0x478   : > { %v6220_v30 = vmul.f32 1.442695, %v6219_v29 }
 0x47a   : > { %8153 = vpow2.f32 %v6220_v30 }
 0x487   : > { %v8154_v31 = vpop.eup %8153 }
 0x488   : > { %v6222_v32 = vsel %vm6215_vm1, %v8154_v31, 0.0 }
 0x489   : > { %6223 = vadd.xlane.f32.xlu0 %v6222_v32 }
 0x512   : > { %v6224_v33 = vpop.xlane.xlu0 %6223 }
 0x513   : > { %8155 = vlog2.f32 %v6224_v33 }
 0x520   : > { %v8156_v34 = vpop.eup %8155 }
 0x521   : > { %v6226_v36 = vmul.f32 0.6931472, %v8156_v34 }
 0x523   : > { %v6227_v35 = vsub.f32 %v6219_v29, %v6226_v36 }
 0x525   : > { %6228 = vst.msk [vmem:[#allocation6] sm:$0x3] %vm6215_vm1, %v6227_v35 }
 0x526 PF: > { %p7592_p2 = scmp.eq.s32.totalorder %s8306_s22, 17  ;;  %s8256_s15 = smov [#allocation6]  }
 0x527   : > { %s6236_s8 = sshll.u32 %s8256_s15, 4  ;;  %s6237_s8 = int_to_ptr.vmem [resolvable:$true] %s6236_s8 }
 0x528   : > { %s8185_s21 = scalar_lea.vmem %s6237_s8, 32  ;;  %p8192_p6 = scmp.lt.s32.totalorder %s6237_s8, %s6237_s8 }
 0x529   : > { %p8186_p3 = scmp.ne.s32.totalorder %s6237_s8, %s8185_s21  ;;  %p8193_p10 = scmp.lt.s32.totalorder %s8185_s21, %s8185_s21 }
 0x52b   : > { %p8187_p4 = pnand %p8186_p3, %p7592_p2  ;;  %p8194_p12 = por %p8193_p10, %p8192_p6 }
 0x52d   : > { %p8188_p5 = pneg %p8187_p4 }
 0x52f   : > { %p8195_p11 = pnand %p8194_p12, %p8188_p5 }
 0x531   : > { %8198 = shalt.err (!%p8195_p11)
}
 0x532   : > { %7584 = dma.vmem_to_hbm [thread:$0]  (%p7592_p2), %s6237_s8, 32, %s9101_s5, [#allocation5]  }
 0x533   : > { %8230 = dma.done.wait (%p7592_p2), [#allocation5], 32  }
 0x534   : > { %8232 = vsyncadd (%p7592_p2), [#allocation5], 4294967264 }
 0x535 PF: > { %p16_p13 = scmp.ge.s32.totalorder %s8309_s23, 20   ;;  %s9107_s18 = smov %s8239_s19 }
 0x536   : > { %s9108_s19 = smov %s8243_s20  ;;  %s9109_s20 = smov %s8319_s26 }
 0x537   : > { %s9110_s21 = smov %s8309_s23  ;;  %18 = sbr.rel (!%p16_p13) target bundleno = 4 (0x4), region = 88 }
 0x53c   :  { %6249 = vsyncpa [#allocation4], 1 }
 0x53d   :  { %6251 = vsyncpa [#allocation4 + $0x1], 1 }
 0x53e   :  { %6252 = vsyncpa [#allocation5], 1 }
 0x53f   :  { %6254 = vsyncpa [#allocation5 + $0x1], 1 }

</bundles_post_ra>
